<compile_context>
chip_gen: v7x
topology: tpu7x:2x2x1
jax: 0.10.0
libtpu: 0.0.40
codegen_flags: <defaults>
</compile_context>

<pallas_src>
import functools

import jax
import jax.numpy as jnp
from jax.experimental import pallas as pl
from jax.experimental.pallas import tpu as pltpu


def _round_up(x, m):
    return (x + m - 1) // m * m


def _cdiv(a, b):
    return (a + b - 1) // b


# M*K*N below this (or N < 64) -> plain XLA dot instead of a Pallas launch.
_XLA_FLOP_THRESHOLD = 256 * 1024


# ----------------------------------------------------------------------------
# Pallas kernel: fused (bf16 @ bf16 -> f32) matmul + bias + activation,
# single K step, weights VMEM-resident.
# ----------------------------------------------------------------------------

def _matmul_bias_act_kernel(x_ref, w_ref, b_ref, o_ref, *, act, slope):
    y = jnp.dot(x_ref[...], w_ref[...], preferred_element_type=jnp.float32)
    y = y + b_ref[...]
    if act == "relu":
        y = jnp.maximum(y, 0.0)
    elif act == "leaky_relu":
        y = jnp.where(y >= 0.0, y, slope * y)
    o_ref[...] = y.astype(o_ref.dtype)


def linear_pallas(x, w, b, act="none", slope=0.2, out_dtype=jnp.bfloat16,
                  tm_target=512):
    """y = act(x @ w + b); x:(M,K) w:(K,N) b:(N,). bf16 MXU matmul, f32 accum."""
    M, K = x.shape
    K2, N = w.shape
    assert K == K2
    Np = _round_up(N, 128)
    Kp = _round_up(K, 128)      # single K step; max Kp in this model is 4096
    Mp = _round_up(M, 8)

    # M tiling: bounds VMEM independently of batch size, and guarantees >= 2
    # M tiles whenever M allows so the "parallel" axis can shard across the
    # two v7x TensorCores (harmless extra step on v5e/v6e).
    if Mp <= 8:
        tm = Mp
    else:
        tm = min(tm_target, _round_up(_cdiv(Mp, 2), 8))
    Mp = _round_up(Mp, tm)

    xp = jnp.pad(x.astype(jnp.bfloat16), ((0, Mp - M), (0, Kp - K)))
    wp = jnp.pad(w.astype(jnp.bfloat16), ((0, Kp - K), (0, Np - N)))
    bp = jnp.pad(b.astype(jnp.float32)[None, :], ((0, 0), (0, Np - N)))

    # VMEM budget: double-buffered x tiles + (constant-index) weight block +
    # double-buffered output tiles + bias.  Capped well below v7x's 64 MiB.
    out_size = jnp.dtype(out_dtype).itemsize
    est = (2 * tm * Kp * 2 + 2 * Kp * Np * 2
           + 2 * tm * Np * out_size + 2 * Np * 4)
    vmem_limit = int(min(max(2 * est, 16 * 1024 * 1024), 40 * 1024 * 1024))

    kernel = functools.partial(_matmul_bias_act_kernel, act=act, slope=slope)
    out = pl.pallas_call(
        kernel,
        out_shape=jax.ShapeDtypeStruct((Mp, Np), out_dtype),
        grid_spec=pltpu.PrefetchScalarGridSpec(
            num_scalar_prefetch=0,
            grid=(Mp // tm,),
            in_specs=[
                pl.BlockSpec((tm, Kp), lambda i: (i, 0)),
                pl.BlockSpec((Kp, Np), lambda i: (0, 0)),   # VMEM-resident
                pl.BlockSpec((1, Np), lambda i: (0, 0)),
            ],
            out_specs=pl.BlockSpec((tm, Np), lambda i: (i, 0)),
        ),
        compiler_params=pltpu.CompilerParams(
            dimension_semantics=("parallel",),
            vmem_limit_bytes=vmem_limit),
    )(xp, wp, bp)
    return out[:M, :N]


def dense(x, w, b, act="none", slope=0.2, out_dtype=jnp.bfloat16):
    """Dispatch: tiny matmuls to plain XLA (no launch overhead / lane padding),
    everything else to the fused Pallas kernel."""
    M, K = x.shape
    _, N = w.shape
    if N < 64 or M * K * N < _XLA_FLOP_THRESHOLD:
        y = jnp.dot(x.astype(jnp.float32), w.astype(jnp.float32),
                    preferred_element_type=jnp.float32) + b.astype(jnp.float32)
        if act == "relu":
            y = jnp.maximum(y, 0.0)
        elif act == "leaky_relu":
            y = jnp.where(y >= 0.0, y, slope * y)
        return y.astype(out_dtype)
    return linear_pallas(x, w, b, act=act, slope=slope, out_dtype=out_dtype)


# ----------------------------------------------------------------------------
# JAX glue: BN folding, NHWC im2col, 4-tap bilinear grid_sample, 2x2 eigs
# ----------------------------------------------------------------------------

def fold_bn(w, b, bn, eps=1e-5):
    """Fold eval-mode BatchNorm into the preceding (in,out) weight matrix."""
    gamma, beta, mean, var = bn
    scale = gamma / jnp.sqrt(var + eps)
    return w * scale[None, :], (b - mean) * scale + beta


def im2col_nhwc(x, k, stride, pad):
    """x: (B,H,W,C) -> patches (B*Ho*Wo, k*k*C), last axis ordered (kh,kw,ci)."""
    B, H, W, C = x.shape
    xp = jnp.pad(x, ((0, 0), (pad, pad), (pad, pad), (0, 0)))
    Ho = (H + 2 * pad - k) // stride + 1
    Wo = (W + 2 * pad - k) // stride + 1
    cols = []
    for i in range(k):
        for j in range(k):
            cols.append(xp[:,
                           i:i + stride * (Ho - 1) + 1:stride,
                           j:j + stride * (Wo - 1) + 1:stride, :])
    patches = jnp.concatenate(cols, axis=-1)          # (B, Ho, Wo, k*k*C)
    return patches.reshape(B * Ho * Wo, k * k * C), Ho, Wo
    # TODO(synk): longer term, fuse im2col into the Pallas kernel (gather the
    # shifted windows in-kernel) to avoid materializing the 9x patch tensor.


def conv2d_nhwc(x, w, b, stride, pad, bn=None, act="none",
                out_dtype=jnp.bfloat16):
    """PyTorch-semantics Conv2d on channels-last activations.
    x: (B,H,W,Cin); w: PyTorch layout (Cout,Cin,kh,kw); returns (B,Ho,Wo,Cout)."""
    B = x.shape[0]
    Cout, Cin, kh, kw = w.shape
    patches, Ho, Wo = im2col_nhwc(x.astype(jnp.bfloat16), kh, stride, pad)
    # (kh, kw, Cin, Cout) matches the patch channel ordering (kh, kw, ci).
    wm = jnp.transpose(w, (2, 3, 1, 0)).reshape(kh * kw * Cin, Cout)
    bm = b
    if bn is not None:
        wm, bm = fold_bn(wm, bm, bn)                  # fold in f32
    out = dense(patches, wm, bm, act=act, out_dtype=out_dtype)
    return out.reshape(B, Ho, Wo, Cout)


def symmetric_2x2_min_eigvec(a, b, c):
    """Eigenvector of smallest eigenvalue of [[a,b],[b,c]] (torch.symeig order).

    Sign convention is deterministic but may differ from LAPACK's (eigenvector
    sign is inherently ambiguous)."""
    half = 0.5 * (a - c)
    rad = jnp.sqrt(half * half + b * b)
    lam = 0.5 * (a + c) - rad
    v1 = jnp.stack([b, lam - a], axis=-1)
    v2 = jnp.stack([lam - c, b], axis=-1)
    n1 = jnp.sum(v1 * v1, axis=-1)
    n2 = jnp.sum(v2 * v2, axis=-1)
    v = jnp.where((n1 >= n2)[..., None], v1, v2)
    nrm = jnp.sqrt(jnp.maximum(jnp.sum(v * v, axis=-1, keepdims=True), 1e-30))
    default = jnp.broadcast_to(jnp.array([1.0, 0.0], jnp.float32), v.shape)
    v = jnp.where(nrm > 1e-12, v / nrm, default)
    return v[..., 0], v[..., 1]


def grid_sample_rotation(x, tcos, tsin):
    """F.affine_grid + F.grid_sample for theta=[[c,s,0],[-s,c,0]] as a 4-tap
    gather bilinear sample (align_corners=False, zero padding). Plain-JAX
    gather: O(B*784*4)."""
    B, C, H, W = x.shape
    ys = (2.0 * jnp.arange(H, dtype=jnp.float32) + 1.0) / H - 1.0
    xs = (2.0 * jnp.arange(W, dtype=jnp.float32) + 1.0) / W - 1.0
    by = jnp.repeat(ys, W)            # (H*W,)
    bx = jnp.tile(xs, H)              # (H*W,)
    gx = tcos[:, None] * bx[None] + tsin[:, None] * by[None]
    gy = -tsin[:, None] * bx[None] + tcos[:, None] * by[None]
    ix = ((gx + 1.0) * W - 1.0) / 2.0
    iy = ((gy + 1.0) * H - 1.0) / 2.0
    x0 = jnp.floor(ix)
    y0 = jnp.floor(iy)
    x1 = x0 + 1.0
    y1 = y0 + 1.0
    wx1 = ix - x0
    wx0 = 1.0 - wx1
    wy1 = iy - y0
    wy0 = 1.0 - wy1
    xf = x.reshape(B, H * W).astype(jnp.float32)
    out = jnp.zeros((B, H * W), jnp.float32)
    for cx, cy, wgt in ((x0, y0, wx0 * wy0), (x1, y0, wx1 * wy0),
                        (x0, y1, wx0 * wy1), (x1, y1, wx1 * wy1)):
        valid = (cx >= 0) & (cx <= W - 1) & (cy >= 0) & (cy <= H - 1)
        src = (jnp.clip(cy, 0, H - 1) * W + jnp.clip(cx, 0, W - 1)).astype(jnp.int32)
        vals = jnp.take_along_axis(xf, src, axis=1)
        out = out + jnp.where(valid, wgt, 0.0) * vals
    return out.reshape(B, C, H, W)


# ----------------------------------------------------------------------------
# Parameters (deterministic init; shapes follow EncoderSTN with nh=256)
# ----------------------------------------------------------------------------

def init_params(key, nz=64, nh=256, dim_domain=1):
    def nrm(k, shape, fan_in):
        return jax.random.normal(k, shape, jnp.float32) / jnp.sqrt(float(fan_in))

    def bn(c):
        return (jnp.ones((c,), jnp.float32), jnp.zeros((c,), jnp.float32),
                jnp.zeros((c,), jnp.float32), jnp.ones((c,), jnp.float32))

    ks = jax.random.split(key, 10)
    p = {}
    # fc_stn: Linear(dd+784, nh) LReLU Drop Linear(nh,nh) BN LReLU Drop Linear(nh,3)
    p["stn_w1"] = nrm(ks[0], (dim_domain + 784, nh), dim_domain + 784)
    p["stn_b1"] = jnp.zeros((nh,), jnp.float32)
    p["stn_w2"] = nrm(ks[1], (nh, nh), nh)
    p["stn_b2"] = jnp.zeros((nh,), jnp.float32)
    p["stn_bn"] = bn(nh)
    p["stn_w3"] = nrm(ks[2], (nh, 3), nh)
    p["stn_b3"] = jnp.zeros((3,), jnp.float32)
    # init_weight_STN (as in SO.__init__): zero image part of first layer,
    # zero its bias, zero last layer weight, last bias = [0.99, 0.01, 0.99]
    p["stn_w1"] = p["stn_w1"].at[dim_domain:, :].set(0.0)
    p["stn_w3"] = jnp.zeros((nh, 3), jnp.float32)
    p["stn_b3"] = jnp.array([1 - 0.01, 0.01, 1 - 0.01], jnp.float32)
    # conv stack
    p["c1_w"] = nrm(ks[3], (nh, 1, 3, 3), 1 * 9)
    p["c1_b"] = jnp.zeros((nh,), jnp.float32)
    p["c1_bn"] = bn(nh)
    p["c2_w"] = nrm(ks[4], (nh, nh, 3, 3), nh * 9)
    p["c2_b"] = jnp.zeros((nh,), jnp.float32)
    p["c2_bn"] = bn(nh)
    p["c3_w"] = nrm(ks[5], (nh, nh, 3, 3), nh * 9)
    p["c3_b"] = jnp.zeros((nh,), jnp.float32)
    p["c3_bn"] = bn(nh)
    p["c4_w"] = nrm(ks[6], (nz, nh, 4, 4), nh * 16)
    p["c4_b"] = jnp.zeros((nz,), jnp.float32)
    # fc_pred
    p["p1_w"] = nrm(ks[7], (nh, nz, 1, 1), nz)
    p["p1_b"] = jnp.zeros((nh,), jnp.float32)
    p["p1_bn"] = bn(nh)
    p["p2_w"] = nrm(ks[8], (nh, nh, 1, 1), nh)
    p["p2_b"] = jnp.zeros((nh,), jnp.float32)
    p["p2_bn"] = bn(nh)
    p["p3_w"] = nrm(ks[9], (nh, 10), nh)
    p["p3_b"] = jnp.zeros((10,), jnp.float32)
    return p


# ----------------------------------------------------------------------------
# SO.forward  ==  EncoderSTN.forward + argmax
# ----------------------------------------------------------------------------

def so_forward(params, x, u):
    """x: (B,1,28,28) float32, u: (B,) float32 (dim_domain=1).
    Returns (f=log_softmax logits, x_align, e=z, g=argmax)."""
    B = x.shape[0]

    # --- STN: fc_stn MLP (Dropout = identity, BN folded / eval mode) ---
    # TODO(synk): training-mode BatchNorm/Dropout not implemented (eval mode).
    inp = jnp.concatenate([u[:, None], x.reshape(B, -1)], axis=1)      # (B, 785)
    h = dense(inp, params["stn_w1"], params["stn_b1"],
              act="leaky_relu", slope=0.2)
    w2, b2 = fold_bn(params["stn_w2"], params["stn_b2"], params["stn_bn"])
    h = dense(h, w2, b2, act="leaky_relu", slope=0.2)
    a_vec = dense(h, params["stn_w3"], params["stn_b3"],
                  out_dtype=jnp.float32)                                # (B, 3)

    # convert_Avec_to_A + torch.symeig (2x2, analytic) -> rotation params
    tcos, tsin = symmetric_2x2_min_eigvec(a_vec[:, 0], a_vec[:, 1], a_vec[:, 2])
    # theta_angle = arctan2(tsin, tcos)  (stored but unused in forward outputs)

    # affine_grid + grid_sample as a 4-tap bilinear gather (plain JAX).
    x_align = grid_sample_rotation(x.astype(jnp.float32), tcos, tsin)   # (B,1,28,28)

    # --- conv stack, NHWC end-to-end (BN folded, ReLU fused, Dropout identity) ---
    xh = jnp.transpose(x_align, (0, 2, 3, 1))                           # (B,28,28,1)
    h1 = conv2d_nhwc(xh, params["c1_w"], params["c1_b"], 2, 1,
                     bn=params["c1_bn"], act="relu")                    # (B,14,14,nh)
    h2 = conv2d_nhwc(h1, params["c2_w"], params["c2_b"], 2, 1,
                     bn=params["c2_bn"], act="relu")                    # (B,7,7,nh)
    h3 = conv2d_nhwc(h2, params["c3_w"], params["c3_b"], 2, 1,
                     bn=params["c3_bn"], act="relu")                    # (B,4,4,nh)
    z_nhwc = conv2d_nhwc(h3, params["c4_w"], params["c4_b"], 1, 0,
                         bn=None, act="relu")                           # (B,1,1,nz)

    # --- fc_pred: 1x1 convs on 1x1 spatial == linears, then squeeze + Linear ---
    zf = z_nhwc.reshape(B, -1)                                          # (B, nz)
    w, b = fold_bn(params["p1_w"][:, :, 0, 0].T, params["p1_b"], params["p1_bn"])
    hp = dense(zf, w, b, act="relu")
    w, b = fold_bn(params["p2_w"][:, :, 0, 0].T, params["p2_b"], params["p2_bn"])
    hp = dense(hp, w, b, act="relu")
    logits = dense(hp, params["p3_w"], params["p3_b"],
                   out_dtype=jnp.float32)                               # (B,10)

    # tiny (B,10) log_softmax: plain JAX (a standalone Pallas launch is overhead)
    f = jax.nn.log_softmax(logits, axis=-1)                             # (B,10)
    g = jnp.argmax(f, axis=1)                                           # (B,)
    z = jnp.transpose(z_nhwc, (0, 3, 1, 2)).astype(jnp.float32)         # (B,nz,1,1)
    return f, x_align, z, g


if __name__ == "__main__":
    key = jax.random.PRNGKey(0)
    kx, ku, kp = jax.random.split(key, 3)
    B = 2
    x = jax.random.uniform(kx, (B, 1, 28, 28), jnp.float32)
    u = jax.random.uniform(ku, (B,), jnp.float32)       # domain index, dim_domain=1
    params = init_params(kp, nz=64, nh=256, dim_domain=1)

    f, x_align, z, g = jax.jit(so_forward)(params, x, u)
    jax.block_until_ready((f, x_align, z, g))

    assert f.shape == (B, 10)
    assert x_align.shape == (B, 1, 28, 28)
    assert z.shape == (B, 64, 1, 1)
    assert g.shape == (B,)
    print("KERNEL_OK")
</pallas_src>

<mosaic_0001>
module attributes {stable_mosaic.version = 11 : i64} {
  func.func private @main(%arg0: i32) attributes {dimension_semantics = [#tpu.dimension_semantics<core_parallel>], iteration_bounds = array<i64: 2>, tpu.core_type = #tpu.core_type<sc_scalar_subcore>, window_params = []} {
    return
  }
}

module attributes {stable_mosaic.version = 11 : i64} {
  func.func private @main(%arg0: i32) attributes {dimension_semantics = [#tpu.dimension_semantics<core_parallel>], iteration_bounds = array<i64: 2>, tpu.core_type = #tpu.core_type<sc_scalar_subcore>, window_params = []} {
    return
  }
}

module attributes {stable_mosaic.version = 11 : i64} {
  func.func @_matmul_bias_act_kernel(%arg0: i32, %arg1: memref<8x896xbf16, #tpu.memory_space<vmem>>, %arg2: memref<896x256xbf16, #tpu.memory_space<vmem>>, %arg3: memref<1x256xf32, #tpu.memory_space<vmem>>, %arg4: memref<8x256xbf16, #tpu.memory_space<vmem>>) attributes {dimension_semantics = [#tpu.dimension_semantics<parallel>], iteration_bounds = array<i64: 1>, scalar_prefetch = 0 : i64, scratch_operands = 0 : i64, tpu.core_type = #tpu.core_type<tc>, window_params = [{transform_indices = @transform_0, window_bounds = array<i64: 8, 896>}, {pipeline_mode = #tpu.pipeline_mode<synchronous>, transform_indices = @transform_1, window_bounds = array<i64: 896, 256>}, {pipeline_mode = #tpu.pipeline_mode<synchronous>, transform_indices = @transform_2, window_bounds = array<i64: 1, 256>}, {transform_indices = @transform_3, window_bounds = array<i64: 8, 256>}]} {
    %c0 = arith.constant 0 : index
    %c0_0 = arith.constant 0 : index
    %0 = vector.load %arg1[%c0, %c0_0] : memref<8x896xbf16, #tpu.memory_space<vmem>>, vector<8x896xbf16>
    %c0_1 = arith.constant 0 : index
    %c0_2 = arith.constant 0 : index
    %1 = vector.load %arg2[%c0_1, %c0_2] : memref<896x256xbf16, #tpu.memory_space<vmem>>, vector<896x256xbf16>
    %cst = arith.constant dense<0.000000e+00> : vector<8x256xf32>
    %2 = tpu.matmul %0, %1, %cst {dimension_numbers = #tpu.dot_dimension_numbers<[1], [0], [0], [1], [0, 0, 1, 1], [], []>} : vector<8x896xbf16>, vector<896x256xbf16>, vector<8x256xf32> -> vector<8x256xf32>
    %c0_3 = arith.constant 0 : index
    %c0_4 = arith.constant 0 : index
    %3 = vector.load %arg3[%c0_3, %c0_4] : memref<1x256xf32, #tpu.memory_space<vmem>>, vector<1x256xf32>
    %4 = vector.broadcast %3 : vector<1x256xf32> to vector<8x256xf32>
    %5 = arith.addf %2, %4 : vector<8x256xf32>
    %cst_5 = arith.constant 0.000000e+00 : f32
    %6 = vector.broadcast %cst_5 : f32 to vector<8x256xf32>
    %7 = arith.cmpf oge, %5, %6 : vector<8x256xf32>
    %cst_6 = arith.constant 2.000000e-01 : f32
    %8 = vector.broadcast %cst_6 : f32 to vector<8x256xf32>
    %9 = arith.mulf %8, %5 : vector<8x256xf32>
    %10 = arith.select %7, %5, %9 : vector<8x256xi1>, vector<8x256xf32>
    %11 = arith.truncf %10 : vector<8x256xf32> to vector<8x256xbf16>
    %c0_7 = arith.constant 0 : index
    %c0_8 = arith.constant 0 : index
    %12 = vector.load %arg4[%c0_7, %c0_8] : memref<8x256xbf16, #tpu.memory_space<vmem>>, vector<8x256xbf16>
    tpu.vector_store %arg4[%c0_7, %c0_8], %11 {strides = array<i32>} : memref<8x256xbf16, #tpu.memory_space<vmem>>, vector<8x256xbf16>,
    return
  }
  func.func @transform_0(%arg0: i32) -> (i32, i32) {
    %c0_i32 = arith.constant 0 : i32
    %c0_i32_0 = arith.constant 0 : i32
    return %arg0, %c0_i32 : i32, i32
  }
  func.func @transform_1(%arg0: i32) -> (i32, i32) {
    %c0_i32 = arith.constant 0 : i32
    %c0_i32_0 = arith.constant 0 : i32
    %c0_i32_1 = arith.constant 0 : i32
    return %c0_i32, %c0_i32_0 : i32, i32
  }
  func.func @transform_2(%arg0: i32) -> (i32, i32) {
    %c0_i32 = arith.constant 0 : i32
    %c0_i32_0 = arith.constant 0 : i32
    %c0_i32_1 = arith.constant 0 : i32
    return %c0_i32, %c0_i32_0 : i32, i32
  }
  func.func @transform_3(%arg0: i32) -> (i32, i32) {
    %c0_i32 = arith.constant 0 : i32
    %c0_i32_0 = arith.constant 0 : i32
    return %arg0, %c0_i32 : i32, i32
  }
}

module attributes {stable_mosaic.version = 11 : i64} {
  func.func @_matmul_bias_act_kernel(%arg0: i32, %arg1: memref<200x128xbf16, #tpu.memory_space<vmem>>, %arg2: memref<128x256xbf16, #tpu.memory_space<vmem>>, %arg3: memref<1x256xf32, #tpu.memory_space<vmem>>, %arg4: memref<200x256xbf16, #tpu.memory_space<vmem>>) attributes {dimension_semantics = [#tpu.dimension_semantics<parallel>], iteration_bounds = array<i64: 2>, scalar_prefetch = 0 : i64, scratch_operands = 0 : i64, tpu.core_type = #tpu.core_type<tc>, window_params = [{transform_indices = @transform_0, window_bounds = array<i64: 200, 128>}, {pipeline_mode = #tpu.pipeline_mode<synchronous>, transform_indices = @transform_1, window_bounds = array<i64: 128, 256>}, {pipeline_mode = #tpu.pipeline_mode<synchronous>, transform_indices = @transform_2, window_bounds = array<i64: 1, 256>}, {transform_indices = @transform_3, window_bounds = array<i64: 200, 256>}]} {
    %c0 = arith.constant 0 : index
    %c0_0 = arith.constant 0 : index
    %0 = vector.load %arg1[%c0, %c0_0] : memref<200x128xbf16, #tpu.memory_space<vmem>>, vector<200x128xbf16>
    %c0_1 = arith.constant 0 : index
    %c0_2 = arith.constant 0 : index
    %1 = vector.load %arg2[%c0_1, %c0_2] : memref<128x256xbf16, #tpu.memory_space<vmem>>, vector<128x256xbf16>
    %cst = arith.constant dense<0.000000e+00> : vector<200x256xf32>
    %2 = tpu.matmul %0, %1, %cst {dimension_numbers = #tpu.dot_dimension_numbers<[1], [0], [0], [1], [0, 0, 1, 1], [], []>} : vector<200x128xbf16>, vector<128x256xbf16>, vector<200x256xf32> -> vector<200x256xf32>
    %c0_3 = arith.constant 0 : index
    %c0_4 = arith.constant 0 : index
    %3 = vector.load %arg3[%c0_3, %c0_4] : memref<1x256xf32, #tpu.memory_space<vmem>>, vector<1x256xf32>
    %4 = vector.broadcast %3 : vector<1x256xf32> to vector<200x256xf32>
    %5 = arith.addf %2, %4 : vector<200x256xf32>
    %cst_5 = arith.constant 0.000000e+00 : f32
    %6 = vector.broadcast %cst_5 : f32 to vector<200x256xf32>
    %7 = arith.maximumf %5, %6 : vector<200x256xf32>
    %8 = arith.truncf %7 : vector<200x256xf32> to vector<200x256xbf16>
    %c0_6 = arith.constant 0 : index
    %c0_7 = arith.constant 0 : index
    %9 = vector.load %arg4[%c0_6, %c0_7] : memref<200x256xbf16, #tpu.memory_space<vmem>>, vector<200x256xbf16>
    tpu.vector_store %arg4[%c0_6, %c0_7], %8 {strides = array<i32>} : memref<200x256xbf16, #tpu.memory_space<vmem>>, vector<200x256xbf16>,
    return
  }
  func.func @transform_0(%arg0: i32) -> (i32, i32) {
    %c0_i32 = arith.constant 0 : i32
    %c0_i32_0 = arith.constant 0 : i32
    return %arg0, %c0_i32 : i32, i32
  }
  func.func @transform_1(%arg0: i32) -> (i32, i32) {
    %c0_i32 = arith.constant 0 : i32
    %c0_i32_0 = arith.constant 0 : i32
    %c0_i32_1 = arith.constant 0 : i32
    return %c0_i32, %c0_i32_0 : i32, i32
  }
  func.func @transform_2(%arg0: i32) -> (i32, i32) {
    %c0_i32 = arith.constant 0 : i32
    %c0_i32_0 = arith.constant 0 : i32
    %c0_i32_1 = arith.constant 0 : i32
    return %c0_i32, %c0_i32_0 : i32, i32
  }
  func.func @transform_3(%arg0: i32) -> (i32, i32) {
    %c0_i32 = arith.constant 0 : i32
    %c0_i32_0 = arith.constant 0 : i32
    return %arg0, %c0_i32 : i32, i32
  }
}

module attributes {stable_mosaic.version = 11 : i64} {
  func.func @_matmul_bias_act_kernel(%arg0: i32, %arg1: memref<56x2304xbf16, #tpu.memory_space<vmem>>, %arg2: memref<2304x256xbf16, #tpu.memory_space<vmem>>, %arg3: memref<1x256xf32, #tpu.memory_space<vmem>>, %arg4: memref<56x256xbf16, #tpu.memory_space<vmem>>) attributes {dimension_semantics = [#tpu.dimension_semantics<parallel>], iteration_bounds = array<i64: 2>, scalar_prefetch = 0 : i64, scratch_operands = 0 : i64, tpu.core_type = #tpu.core_type<tc>, window_params = [{transform_indices = @transform_0, window_bounds = array<i64: 56, 2304>}, {pipeline_mode = #tpu.pipeline_mode<synchronous>, transform_indices = @transform_1, window_bounds = array<i64: 2304, 256>}, {pipeline_mode = #tpu.pipeline_mode<synchronous>, transform_indices = @transform_2, window_bounds = array<i64: 1, 256>}, {transform_indices = @transform_3, window_bounds = array<i64: 56, 256>}]} {
    %c0 = arith.constant 0 : index
    %c0_0 = arith.constant 0 : index
    %0 = vector.load %arg1[%c0, %c0_0] : memref<56x2304xbf16, #tpu.memory_space<vmem>>, vector<56x2304xbf16>
    %c0_1 = arith.constant 0 : index
    %c0_2 = arith.constant 0 : index
    %1 = vector.load %arg2[%c0_1, %c0_2] : memref<2304x256xbf16, #tpu.memory_space<vmem>>, vector<2304x256xbf16>
    %cst = arith.constant dense<0.000000e+00> : vector<56x256xf32>
    %2 = tpu.matmul %0, %1, %cst {dimension_numbers = #tpu.dot_dimension_numbers<[1], [0], [0], [1], [0, 0, 1, 1], [], []>} : vector<56x2304xbf16>, vector<2304x256xbf16>, vector<56x256xf32> -> vector<56x256xf32>
    %c0_3 = arith.constant 0 : index
    %c0_4 = arith.constant 0 : index
    %3 = vector.load %arg3[%c0_3, %c0_4] : memref<1x256xf32, #tpu.memory_space<vmem>>, vector<1x256xf32>
    %4 = vector.broadcast %3 : vector<1x256xf32> to vector<56x256xf32>
    %5 = arith.addf %2, %4 : vector<56x256xf32>
    %cst_5 = arith.constant 0.000000e+00 : f32
    %6 = vector.broadcast %cst_5 : f32 to vector<56x256xf32>
    %7 = arith.maximumf %5, %6 : vector<56x256xf32>
    %8 = arith.truncf %7 : vector<56x256xf32> to vector<56x256xbf16>
    %c0_6 = arith.constant 0 : index
    %c0_7 = arith.constant 0 : index
    %9 = vector.load %arg4[%c0_6, %c0_7] : memref<56x256xbf16, #tpu.memory_space<vmem>>, vector<56x256xbf16>
    tpu.vector_store %arg4[%c0_6, %c0_7], %8 {strides = array<i32>} : memref<56x256xbf16, #tpu.memory_space<vmem>>, vector<56x256xbf16>,
    return
  }
  func.func @transform_0(%arg0: i32) -> (i32, i32) {
    %c0_i32 = arith.constant 0 : i32
    %c0_i32_0 = arith.constant 0 : i32
    return %arg0, %c0_i32 : i32, i32
  }
  func.func @transform_1(%arg0: i32) -> (i32, i32) {
    %c0_i32 = arith.constant 0 : i32
    %c0_i32_0 = arith.constant 0 : i32
    %c0_i32_1 = arith.constant 0 : i32
    return %c0_i32, %c0_i32_0 : i32, i32
  }
  func.func @transform_2(%arg0: i32) -> (i32, i32) {
    %c0_i32 = arith.constant 0 : i32
    %c0_i32_0 = arith.constant 0 : i32
    %c0_i32_1 = arith.constant 0 : i32
    return %c0_i32, %c0_i32_0 : i32, i32
  }
  func.func @transform_3(%arg0: i32) -> (i32, i32) {
    %c0_i32 = arith.constant 0 : i32
    %c0_i32_0 = arith.constant 0 : i32
    return %arg0, %c0_i32 : i32, i32
  }
}

module attributes {stable_mosaic.version = 11 : i64} {
  func.func @_matmul_bias_act_kernel(%arg0: i32, %arg1: memref<16x2304xbf16, #tpu.memory_space<vmem>>, %arg2: memref<2304x256xbf16, #tpu.memory_space<vmem>>, %arg3: memref<1x256xf32, #tpu.memory_space<vmem>>, %arg4: memref<16x256xbf16, #tpu.memory_space<vmem>>) attributes {dimension_semantics = [#tpu.dimension_semantics<parallel>], iteration_bounds = array<i64: 2>, scalar_prefetch = 0 : i64, scratch_operands = 0 : i64, tpu.core_type = #tpu.core_type<tc>, window_params = [{transform_indices = @transform_0, window_bounds = array<i64: 16, 2304>}, {pipeline_mode = #tpu.pipeline_mode<synchronous>, transform_indices = @transform_1, window_bounds = array<i64: 2304, 256>}, {pipeline_mode = #tpu.pipeline_mode<synchronous>, transform_indices = @transform_2, window_bounds = array<i64: 1, 256>}, {transform_indices = @transform_3, window_bounds = array<i64: 16, 256>}]} {
    %c0 = arith.constant 0 : index
    %c0_0 = arith.constant 0 : index
    %0 = vector.load %arg1[%c0, %c0_0] : memref<16x2304xbf16, #tpu.memory_space<vmem>>, vector<16x2304xbf16>
    %c0_1 = arith.constant 0 : index
    %c0_2 = arith.constant 0 : index
    %1 = vector.load %arg2[%c0_1, %c0_2] : memref<2304x256xbf16, #tpu.memory_space<vmem>>, vector<2304x256xbf16>
    %cst = arith.constant dense<0.000000e+00> : vector<16x256xf32>
    %2 = tpu.matmul %0, %1, %cst {dimension_numbers = #tpu.dot_dimension_numbers<[1], [0], [0], [1], [0, 0, 1, 1], [], []>} : vector<16x2304xbf16>, vector<2304x256xbf16>, vector<16x256xf32> -> vector<16x256xf32>
    %c0_3 = arith.constant 0 : index
    %c0_4 = arith.constant 0 : index
    %3 = vector.load %arg3[%c0_3, %c0_4] : memref<1x256xf32, #tpu.memory_space<vmem>>, vector<1x256xf32>
    %4 = vector.broadcast %3 : vector<1x256xf32> to vector<16x256xf32>
    %5 = arith.addf %2, %4 : vector<16x256xf32>
    %cst_5 = arith.constant 0.000000e+00 : f32
    %6 = vector.broadcast %cst_5 : f32 to vector<16x256xf32>
    %7 = arith.maximumf %5, %6 : vector<16x256xf32>
    %8 = arith.truncf %7 : vector<16x256xf32> to vector<16x256xbf16>
    %c0_6 = arith.constant 0 : index
    %c0_7 = arith.constant 0 : index
    %9 = vector.load %arg4[%c0_6, %c0_7] : memref<16x256xbf16, #tpu.memory_space<vmem>>, vector<16x256xbf16>
    tpu.vector_store %arg4[%c0_6, %c0_7], %8 {strides = array<i32>} : memref<16x256xbf16, #tpu.memory_space<vmem>>, vector<16x256xbf16>,
    return
  }
  func.func @transform_0(%arg0: i32) -> (i32, i32) {
    %c0_i32 = arith.constant 0 : i32
    %c0_i32_0 = arith.constant 0 : i32
    return %arg0, %c0_i32 : i32, i32
  }
  func.func @transform_1(%arg0: i32) -> (i32, i32) {
    %c0_i32 = arith.constant 0 : i32
    %c0_i32_0 = arith.constant 0 : i32
    %c0_i32_1 = arith.constant 0 : i32
    return %c0_i32, %c0_i32_0 : i32, i32
  }
  func.func @transform_2(%arg0: i32) -> (i32, i32) {
    %c0_i32 = arith.constant 0 : i32
    %c0_i32_0 = arith.constant 0 : i32
    %c0_i32_1 = arith.constant 0 : i32
    return %c0_i32, %c0_i32_0 : i32, i32
  }
  func.func @transform_3(%arg0: i32) -> (i32, i32) {
    %c0_i32 = arith.constant 0 : i32
    %c0_i32_0 = arith.constant 0 : i32
    return %arg0, %c0_i32 : i32, i32
  }
}

module attributes {stable_mosaic.version = 11 : i64} {
  func.func @_matmul_bias_act_kernel(%arg0: i32, %arg1: memref<8x4096xbf16, #tpu.memory_space<vmem>>, %arg2: memref<4096x128xbf16, #tpu.memory_space<vmem>>, %arg3: memref<1x128xf32, #tpu.memory_space<vmem>>, %arg4: memref<8x128xbf16, #tpu.memory_space<vmem>>) attributes {dimension_semantics = [#tpu.dimension_semantics<parallel>], iteration_bounds = array<i64: 1>, scalar_prefetch = 0 : i64, scratch_operands = 0 : i64, tpu.core_type = #tpu.core_type<tc>, window_params = [{transform_indices = @transform_0, window_bounds = array<i64: 8, 4096>}, {pipeline_mode = #tpu.pipeline_mode<synchronous>, transform_indices = @transform_1, window_bounds = array<i64: 4096, 128>}, {pipeline_mode = #tpu.pipeline_mode<synchronous>, transform_indices = @transform_2, window_bounds = array<i64: 1, 128>}, {transform_indices = @transform_3, window_bounds = array<i64: 8, 128>}]} {
    %c0 = arith.constant 0 : index
    %c0_0 = arith.constant 0 : index
    %0 = vector.load %arg1[%c0, %c0_0] : memref<8x4096xbf16, #tpu.memory_space<vmem>>, vector<8x4096xbf16>
    %c0_1 = arith.constant 0 : index
    %c0_2 = arith.constant 0 : index
    %1 = vector.load %arg2[%c0_1, %c0_2] : memref<4096x128xbf16, #tpu.memory_space<vmem>>, vector<4096x128xbf16>
    %cst = arith.constant dense<0.000000e+00> : vector<8x128xf32>
    %2 = tpu.matmul %0, %1, %cst {dimension_numbers = #tpu.dot_dimension_numbers<[1], [0], [0], [1], [0, 0, 1, 1], [], []>} : vector<8x4096xbf16>, vector<4096x128xbf16>, vector<8x128xf32> -> vector<8x128xf32>
    %c0_3 = arith.constant 0 : index
    %c0_4 = arith.constant 0 : index
    %3 = vector.load %arg3[%c0_3, %c0_4] : memref<1x128xf32, #tpu.memory_space<vmem>>, vector<1x128xf32>
    %4 = vector.broadcast %3 : vector<1x128xf32> to vector<8x128xf32>
    %5 = arith.addf %2, %4 : vector<8x128xf32>
    %cst_5 = arith.constant 0.000000e+00 : f32
    %6 = vector.broadcast %cst_5 : f32 to vector<8x128xf32>
    %7 = arith.maximumf %5, %6 : vector<8x128xf32>
    %8 = arith.truncf %7 : vector<8x128xf32> to vector<8x128xbf16>
    %c0_6 = arith.constant 0 : index
    %c0_7 = arith.constant 0 : index
    %9 = vector.load %arg4[%c0_6, %c0_7] : memref<8x128xbf16, #tpu.memory_space<vmem>>, vector<8x128xbf16>
    tpu.vector_store %arg4[%c0_6, %c0_7], %8 {strides = array<i32>} : memref<8x128xbf16, #tpu.memory_space<vmem>>, vector<8x128xbf16>,
    return
  }
  func.func @transform_0(%arg0: i32) -> (i32, i32) {
    %c0_i32 = arith.constant 0 : i32
    %c0_i32_0 = arith.constant 0 : i32
    return %arg0, %c0_i32 : i32, i32
  }
  func.func @transform_1(%arg0: i32) -> (i32, i32) {
    %c0_i32 = arith.constant 0 : i32
    %c0_i32_0 = arith.constant 0 : i32
    %c0_i32_1 = arith.constant 0 : i32
    return %c0_i32, %c0_i32_0 : i32, i32
  }
  func.func @transform_2(%arg0: i32) -> (i32, i32) {
    %c0_i32 = arith.constant 0 : i32
    %c0_i32_0 = arith.constant 0 : i32
    %c0_i32_1 = arith.constant 0 : i32
    return %c0_i32, %c0_i32_0 : i32, i32
  }
  func.func @transform_3(%arg0: i32) -> (i32, i32) {
    %c0_i32 = arith.constant 0 : i32
    %c0_i32_0 = arith.constant 0 : i32
    return %arg0, %c0_i32 : i32, i32
  }
}

</mosaic_0001>

<bundles_post_ra>
// kernel: ge.4
= control target key start
LH: loop header
LB: loop body
LE: loop exit
PB: predicated region body
PF: predicated region fallthrough
CT: control target
= control target key end

     0   :  { %v15_v2 = vmov 0   ;;  %s40_s0 = inlined_call_operand.vmem [shape: f32[2], index: 0, kind: input, shape index: {}]   ;;  %s41_s1 = inlined_call_operand.vmem [shape: f32[2], index: 1, kind: input, shape index: {}]   ;;  %s42_s2 = inlined_call_operand.vmem [shape: pred[2], index: 2, kind: output, shape index: {}]  }
   0x1   :  { %v3_v0 = vld [vmem:[%s40_s0] sm:$0x1] }
   0x2   :  { %v4_v1 = vld [vmem:[%s41_s1] sm:$0x1] }
   0x3   :  { %vm7_vm0 = vcmp.ge.f32.partialorder %v3_v0, %v4_v1 }
   0x4   :  { %v8_v3 = vsel %vm7_vm0, 1, %v15_v2 }
   0x5   :  { %v10_v4 = vpack.c.b16 %v15_v2, %v8_v3 }
   0x7   :  { %v11_v5 = vpack.c.b8 %v15_v2, %v10_v4 }
   0x9   :  { %13 = vst [vmem:[%s42_s2] sm:$0x1] %v11_v5 }

// kernel: tile.9
= control target key start
LH: loop header
LB: loop body
LE: loop exit
PB: predicated region body
PF: predicated region fallthrough
CT: control target
= control target key end

     0   :  { %s40_s0 = inlined_call_operand.vmem [shape: f32[28], index: 0, kind: input, shape index: {}]   ;;  %s41_s1 = inlined_call_operand.vmem [shape: f32[28,28], index: 1, kind: output, shape index: {}]  }
   0x1   :  { %v4_v0 = vld [vmem:[%s40_s0] ss:$0 sm:$0xff] }
   0x2   :  { %5 = vst [vmem:[%s41_s1] sm:$0xff] %v4_v0  ;;  %12 = vst [vmem:[%s41_s1 + $0x8] sm:$0xff] %v4_v0 }
   0x3   :  { %13 = vst [vmem:[%s41_s1 + $0x10] sm:$0xff] %v4_v0  ;;  %14 = vst [vmem:[%s41_s1 + $0x18] sm:$0xff] %v4_v0 }

// kernel: mul.103
= control target key start
LH: loop header
LB: loop body
LE: loop exit
PB: predicated region body
PF: predicated region fallthrough
CT: control target
= control target key end

     0   :  { %vm9_vm0 = vcmask 31744   ;;  %vm37_vm1 = vcmask 97280   ;;  %vm23_vm2 = vcmask 64512   ;;  %vm41_vm3 = vcmask 130048   ;;  %s321_s18 = smov 124   ;;  %s322_s23 = smov 116   ;;  %s574_s0 = inlined_call_operand.vmem [shape: f32[28,28], index: 0, kind: input, shape index: {}]   ;;  %s575_s1 = inlined_call_operand.vmem [shape: f32[784], index: 1, kind: output, shape index: {}]  }
   0x1   :  { %v232_v0 = vld [vmem:[%s574_s0 + $0x9] sm:$0x1]   ;;  %v240_v2 = vld [vmem:[%s574_s0 + $0x1b] sm:$0x1]   ;;  %v236_v5 = vld [vmem:[%s574_s0 + $0x12] sm:$0x1]  }
   0x2   :  { %v233_v1 = vld [vmem:[%s574_s0 + $0x9] sm:$0x1]   ;;  %v241_v4 = vld [vmem:[%s574_s0 + $0x1b] sm:$0x1]   ;;  %v237_v6 = vld [vmem:[%s574_s0 + $0x12] sm:$0x1]  }
   0x3   :  { %v10_v3 = vsel %vm9_vm0, %v233_v1, %v232_v0  ;;  %v38_v7 = vsel %vm37_vm1, %v241_v4, %v240_v2  ;;  %v244_v8 = vld [vmem:[%s574_s0 + $0x4] sm:$0x1]   ;;  %v24_v10 = vsel %vm23_vm2, %v237_v6, %v236_v5  ;;  %vm27_vm4 = vcmask 162816   ;;  %v247_v12 = vld [vmem:[%s574_s0 + $0xd] sm:$0x1]   ;;  %s323_s3 = smov 120  }
   0x4   :  { %11 = vrot.lane.b32.xlu0 %v10_v3, %s321_s18  ;;  %v245_v9 = vld [vmem:[%s574_s0 + $0x4] sm:$0x1]   ;;  %39 = vrot.lane.b32.xlu1 %v38_v7, %s322_s23  ;;  %v248_v13 = vld [vmem:[%s574_s0 + $0xd] sm:$0x1]   ;;  %vm13_vm5 = vcmask 195584   ;;  %s324_s4 = smov 112  }
   0x5   :  { %v52_v11 = vsel %vm41_vm3, %v245_v9, %v244_v8  ;;  %v251_v14 = vld [vmem:[%s574_s0 + $0x16] sm:$0x1]   ;;  %v65_v16 = vsel %vm27_vm4, %v248_v13, %v247_v12  ;;  %s325_s5 = smov 108   ;;  %s326_s6 = smov 104   ;;  %v255_v18 = vld [vmem:[%s574_s0 + $0x8] sm:$0x1]  }
   0x6   :  { %v252_v15 = vld [vmem:[%s574_s0 + $0x16] sm:$0x1]   ;;  %v257_v19 = vld [vmem:[%s574_s0 + $0x11] sm:$0x1]   ;;  %s327_s11 = smov 96   ;;  %s328_s12 = smov 92  }
   0x7   :  { %v79_v17 = vsel %vm13_vm5, %v252_v15, %v251_v14  ;;  %v259_v20 = vld [vmem:[%s574_s0 + $0x1a] sm:$0x1]   ;;  %v261_v21 = vld [vmem:[%s574_s0 + $0x3] sm:$0x1]   ;;  %vm3_vm6 = vcmask 228352   ;;  %s329_s21 = smov 88  }
   0x8   :  { %25 = vrot.lane.b32.xlu0 %v24_v10, %s323_s3  ;;  %53 = vrot.lane.b32.xlu1 %v52_v11, %s324_s4  ;;  %v2_v22 = vld [vmem:[%s574_s0] sm:$0x1]   ;;  %s330_s22 = smov 84   ;;  %v262_v23 = vld [vmem:[%s574_s0 + $0xc] sm:$0x1]   ;;  %s331_s27 = smov 80  }
   0x9   :  { %4 = vst.msk [vmem:[%s575_s1] sm:$0x1] %vm3_vm6, %v2_v22   ;;  %v264_v24 = vld [vmem:[%s574_s0 + $0x15] sm:$0x1]   ;;  %s332_s28 = smov 76   ;;  %s333_s4 = smov 68  }
   0xa   :  { %v266_v25 = vld [vmem:[%s574_s0 + $0x7] sm:$0x1]   ;;  %v268_v26 = vld [vmem:[%s574_s0 + $0x10] sm:$0x1]   ;;  %v270_v27 = vld [vmem:[%s574_s0 + $0x19] sm:$0x1]  }
   0xb   :  { %v272_v28 = vld [vmem:[%s574_s0 + $0x2] sm:$0x1]   ;;  %s335_s10 = smov 60   ;;  %v273_v29 = vld [vmem:[%s574_s0 + $0xb] sm:$0x1]   ;;  %s337_s16 = smov 52  }
   0xc   :  { %66 = vrot.lane.b32.xlu0 %v65_v16, %s325_s5  ;;  %80 = vrot.lane.b32.xlu1 %v79_v17, %s326_s6  ;;  %s334_s5 = smov 64   ;;  %v275_v30 = vld [vmem:[%s574_s0 + $0x14] sm:$0x1]   ;;  %s338_s17 = smov 48   ;;  %v277_v31 = vld [vmem:[%s574_s0 + $0x6] sm:$0x1]  }
   0xd   :  { %v279_v32 = vld [vmem:[%s574_s0 + $0xf] sm:$0x1]   ;;  %s340_s23 = smov 36   ;;  %v281_v33 = vld [vmem:[%s574_s0 + $0x18] sm:$0x1]   ;;  %s342_s29 = smov 28  }
   0xe   :  { %v283_v34 = vld [vmem:[%s574_s0 + $0x1] sm:$0x1]   ;;  %v284_v35 = vld [vmem:[%s574_s0 + $0xa] sm:$0x1]   ;;  %v286_v36 = vld [vmem:[%s574_s0 + $0x13] sm:$0x1]  }
   0xf   :  { %s344_s6 = smov 20   ;;  %v288_v37 = vld [vmem:[%s574_s0 + $0x5] sm:$0x1]   ;;  %v290_v38 = vld [vmem:[%s574_s0 + $0xe] sm:$0x1]   ;;  %vm16_vm7 = vcmask 1048544  }
  0x10   :  { %90 = vrot.lane.b32.xlu0 %v255_v18, %s327_s11  ;;  %97 = vrot.lane.b32.xlu1 %v257_v19, %s328_s12  ;;  %s336_s11 = smov 56   ;;  %s346_s12 = smov 8   ;;  %v292_v39 = vld [vmem:[%s574_s0 + $0x17] sm:$0x1]   ;;  %vm44_vm8 = vcmask 1048480   ;;  %vm30_vm9 = vcmask 1048512  }
  0x11   :  { %s347_s0 = smov 4   ;;  %vm58_vm10 = vcmask 1048448   ;;  %vm71_vm11 = vcmask 1048416   ;;  %vm85_vm12 = vcmask 1048384   ;;  %vm92_vm13 = vcmask 1015552  }
  0x12   :  { %vm99_vm14 = vcmask 982752   ;;  %vm106_vm15 = vcmask 949952   ;;  %vm154_vm6 = vcmask 687552  }
  0x14   :  { %104 = vrot.lane.b32.xlu0 %v259_v20, %s329_s21  ;;  %111 = vrot.lane.b32.xlu1 %v261_v21, %s330_s22  ;;  %s339_s22 = smov 40  }
  0x18   :  { %117 = vrot.lane.b32.xlu0 %v262_v23, %s331_s27  ;;  %124 = vrot.lane.b32.xlu1 %v264_v24, %s332_s28  ;;  %s341_s28 = smov 32  }
  0x1c   :  { %131 = vrot.lane.b32.xlu0 %v266_v25, %s333_s4  ;;  %138 = vrot.lane.b32.xlu1 %v268_v26, %s334_s5  ;;  %s343_s5 = smov 24  }
  0x20   :  { %145 = vrot.lane.b32.xlu0 %v270_v27, %s335_s10  ;;  %152 = vrot.lane.b32.xlu1 %v272_v28, %s336_s11  ;;  %s345_s11 = smov 12  }
  0x24   :  { %158 = vrot.lane.b32.xlu0 %v273_v29, %s337_s16  ;;  %165 = vrot.lane.b32.xlu1 %v275_v30, %s338_s17 }
  0x28   :  { %172 = vrot.lane.b32.xlu0 %v277_v31, %s339_s22  ;;  %179 = vrot.lane.b32.xlu1 %v279_v32, %s340_s23 }
  0x2c   :  { %186 = vrot.lane.b32.xlu0 %v281_v33, %s341_s28  ;;  %193 = vrot.lane.b32.xlu1 %v283_v34, %s342_s29 }
  0x30   :  { %199 = vrot.lane.b32.xlu0 %v284_v35, %s343_s5  ;;  %206 = vrot.lane.b32.xlu1 %v286_v36, %s344_s6 }
  0x34   :  { %213 = vrot.lane.b32.xlu0 %v288_v37, %s345_s11  ;;  %220 = vrot.lane.b32.xlu1 %v290_v38, %s346_s12 }
  0x38   :  { %227 = vrot.lane.b32.xlu0 %v292_v39, %s347_s0 }
  0x76   :  { %v12_v40 = vpop.permute.xlu0 %11   ;;  %v40_v41 = vpop.permute.xlu1 %39  }
  0x77   :  { %234 = vst.msk [vmem:[%s575_s1 + $0x2] sm:$0x1] %vm13_vm5, %v12_v40   ;;  %vm147_vm5 = vcmask 720352  }
  0x78   :  { %235 = vst.msk [vmem:[%s575_s1 + $0x1] sm:$0x1] %vm16_vm7, %v12_v40   ;;  %vm160_vm7 = vcmask 654752  }
  0x79   :  { %242 = vst.msk [vmem:[%s575_s1 + $0x6] sm:$0x1] %vm41_vm3, %v40_v41   ;;  %vm133_vm3 = vcmask 785952  }
  0x7a   :  { %243 = vst.msk [vmem:[%s575_s1 + $0x5] sm:$0x1] %vm44_vm8, %v40_v41   ;;  %v26_v42 = vpop.permute.xlu0 %25   ;;  %v54_v43 = vpop.permute.xlu1 %53   ;;  %vm167_vm8 = vcmask 621952  }
  0x7b   :  { %238 = vst.msk [vmem:[%s575_s1 + $0x4] sm:$0x1] %vm27_vm4, %v26_v42   ;;  %vm140_vm4 = vcmask 753152  }
  0x7c   :  { %239 = vst.msk [vmem:[%s575_s1 + $0x3] sm:$0x1] %vm30_vm9, %v26_v42   ;;  %vm174_vm9 = vcmask 556352  }
  0x7d   :  { %246 = vst.msk [vmem:[%s575_s1 + $0x1] sm:$0x1] %vm37_vm1, %v54_v43   ;;  %vm119_vm1 = vcmask 884352  }
  0x7e   :  { %59 = vst.msk [vmem:[%s575_s1] sm:$0x1] %vm58_vm10, %v54_v43   ;;  %v67_v44 = vpop.permute.xlu0 %66   ;;  %v81_v45 = vpop.permute.xlu1 %80   ;;  %vm181_vm10 = vcmask 523552  }
  0x7f   :  { %249 = vst.msk [vmem:[%s575_s1 + $0x3] sm:$0x1] %vm23_vm2, %v67_v44   ;;  %vm126_vm2 = vcmask 851552  }
  0x80   :  { %250 = vst.msk [vmem:[%s575_s1 + $0x2] sm:$0x1] %vm71_vm11, %v67_v44   ;;  %vm188_vm11 = vcmask 490752  }
  0x81   :  { %253 = vst.msk [vmem:[%s575_s1 + $0x5] sm:$0x1] %vm9_vm0, %v81_v45   ;;  %vm113_vm0 = vcmask 917152  }
  0x82   :  { %254 = vst.msk [vmem:[%s575_s1 + $0x4] sm:$0x1] %vm85_vm12, %v81_v45   ;;  %v91_v46 = vpop.permute.xlu0 %90   ;;  %v98_v47 = vpop.permute.xlu1 %97   ;;  %vm195_vm12 = vcmask 457952  }
  0x83   :  { %256 = vst.msk [vmem:[%s575_s1 + $0x1] sm:$0x1] %vm92_vm13, %v91_v46   ;;  %vm201_vm13 = vcmask 425152  }
  0x84   :  { %258 = vst.msk [vmem:[%s575_s1 + $0x3] sm:$0x1] %vm99_vm14, %v98_v47   ;;  %vm208_vm14 = vcmask 392352  }
  0x86   :  { %v105_v48 = vpop.permute.xlu0 %104   ;;  %v112_v49 = vpop.permute.xlu1 %111  }
  0x87   :  { %260 = vst.msk [vmem:[%s575_s1 + $0x5] sm:$0x1] %vm106_vm15, %v105_v48   ;;  %vm215_vm15 = vcmask 326752  }
  0x88   :  { %114 = vst.msk [vmem:[%s575_s1] sm:$0x1] %vm113_vm0, %v112_v49   ;;  %vm222_vm0 = vcmask 293952  }
  0x8a   :  { %v118_v50 = vpop.permute.xlu0 %117   ;;  %v125_v51 = vpop.permute.xlu1 %124  }
  0x8b   :  { %263 = vst.msk [vmem:[%s575_s1 + $0x2] sm:$0x1] %vm119_vm1, %v118_v50   ;;  %vm229_vm1 = vcmask 261152  }
  0x8c   :  { %265 = vst.msk [vmem:[%s575_s1 + $0x4] sm:$0x1] %vm126_vm2, %v125_v51  }
  0x8e   :  { %v132_v52 = vpop.permute.xlu0 %131   ;;  %v139_v53 = vpop.permute.xlu1 %138  }
  0x8f   :  { %267 = vst.msk [vmem:[%s575_s1 + $0x1] sm:$0x1] %vm133_vm3, %v132_v52  }
  0x90   :  { %269 = vst.msk [vmem:[%s575_s1 + $0x3] sm:$0x1] %vm140_vm4, %v139_v53  }
  0x92   :  { %v146_v54 = vpop.permute.xlu0 %145   ;;  %v153_v55 = vpop.permute.xlu1 %152  }
  0x93   :  { %271 = vst.msk [vmem:[%s575_s1 + $0x5] sm:$0x1] %vm147_vm5, %v146_v54  }
  0x94   :  { %155 = vst.msk [vmem:[%s575_s1] sm:$0x1] %vm154_vm6, %v153_v55  }
  0x96   :  { %v159_v56 = vpop.permute.xlu0 %158   ;;  %v166_v57 = vpop.permute.xlu1 %165  }
  0x97   :  { %274 = vst.msk [vmem:[%s575_s1 + $0x2] sm:$0x1] %vm160_vm7, %v159_v56  }
  0x98   :  { %276 = vst.msk [vmem:[%s575_s1 + $0x4] sm:$0x1] %vm167_vm8, %v166_v57  }
  0x9a   :  { %v173_v58 = vpop.permute.xlu0 %172   ;;  %v180_v59 = vpop.permute.xlu1 %179  }
  0x9b   :  { %278 = vst.msk [vmem:[%s575_s1 + $0x1] sm:$0x1] %vm174_vm9, %v173_v58  }
  0x9c   :  { %280 = vst.msk [vmem:[%s575_s1 + $0x3] sm:$0x1] %vm181_vm10, %v180_v59  }
  0x9e   :  { %v187_v60 = vpop.permute.xlu0 %186   ;;  %v194_v61 = vpop.permute.xlu1 %193  }
  0x9f   :  { %282 = vst.msk [vmem:[%s575_s1 + $0x5] sm:$0x1] %vm188_vm11, %v187_v60  }
  0xa0   :  { %196 = vst.msk [vmem:[%s575_s1] sm:$0x1] %vm195_vm12, %v194_v61  }
  0xa2   :  { %v200_v62 = vpop.permute.xlu0 %199   ;;  %v207_v63 = vpop.permute.xlu1 %206  }
  0xa3   :  { %285 = vst.msk [vmem:[%s575_s1 + $0x2] sm:$0x1] %vm201_vm13, %v200_v62  }
  0xa4   :  { %287 = vst.msk [vmem:[%s575_s1 + $0x4] sm:$0x1] %vm208_vm14, %v207_v63  }
  0xa6   :  { %v214_v0 = vpop.permute.xlu0 %213   ;;  %v221_v1 = vpop.permute.xlu1 %220  }
  0xa7   :  { %289 = vst.msk [vmem:[%s575_s1 + $0x1] sm:$0x1] %vm215_vm15, %v214_v0  }
  0xa8   :  { %291 = vst.msk [vmem:[%s575_s1 + $0x3] sm:$0x1] %vm222_vm0, %v221_v1  }
  0xaa   :  { %v228_v2 = vpop.permute.xlu0 %227  }
  0xab   :  { %293 = vst.msk [vmem:[%s575_s1 + $0x5] sm:$0x1] %vm229_vm1, %v228_v2  }

// kernel: so_forward.5
= control target key start
LH: loop header
LB: loop body
LE: loop exit
PB: predicated region body
PF: predicated region fallthrough
CT: control target
= control target key end

     0   :  { %8 = vsyncpa [#allocation3], 0  ;;  %s1258_s12 = smov [#allocation2]   ;;  %s1649_s0 = inlined_call_operand.vmem [shape: bf16[8,896], index: 0, kind: input, shape index: {}]   ;;  %s1650_s1 = inlined_call_operand.vmem [shape: bf16[896,256], index: 1, kind: input, shape index: {}]   ;;  %s1651_s2 = inlined_call_operand.hbm [shape: f32[1,256], index: 2, kind: input, shape index: {}]   ;;  %s1652_s3 = inlined_call_operand.vmem [shape: bf16[8,256], index: 3, kind: output, shape index: {}]  }
   0x1   :  { %s19_s13 = sshll.u32 %s1258_s12, 4  ;;  %s1234_s16 = scalar_lea.hbm %s1651_s2, 32  ;;  %s20_s13 = int_to_ptr.vmem [resolvable:$true] %s19_s13 }
   0x2   :  { %p1235_p0 = scmp.ne.s32.totalorder %s1651_s2, %s1234_s16  ;;  %p1238_p1 = scmp.lt.u32.totalorder %s1234_s16, %s1651_s2 }
   0x4   :  { %p1240_p2 = pnand %p1238_p1, %p1235_p0 }
   0x6   :  { %1243 = shalt.err (!%p1240_p2)
}
   0x7   :  { %s1244_s21 = scalar_lea.vmem %s20_s13, 32  ;;  %p1249_p4 = scmp.lt.s32.totalorder %s20_s13, %s20_s13 }
   0x8   :  { %p1245_p3 = scmp.ne.s32.totalorder %s20_s13, %s1244_s21  ;;  %p1250_p5 = scmp.lt.s32.totalorder %s1244_s21, %s1244_s21 }
   0xa   :  { %p1251_p6 = por %p1250_p5, %p1249_p4 }
   0xc   :  { %p1252_p7 = pnand %p1251_p6, %p1245_p3 }
   0xe   :  { %1255 = shalt.err (!%p1252_p7)
}
   0xf   :  { %22 = dma.hbm_to_vmem [thread:$0]  %s1651_s2, 32, %s20_s13, [#allocation3]  }
  0x10   :  { %1256 = dma.done.wait [#allocation3], 32  }
  0x11   :  { %1257 = vsyncadd [#allocation3], 4294967264  ;;  %v1059_v0 = vld [vmem:[%s1650_s1 + $0x4] ss:$8 sps:$4 sm:$0xff]   ;;  %v1063_v2 = vld [vmem:[%s1650_s1] ss:$8 sps:$4 sm:$0xff]  }
  0x12   :  { %v1061_v1 = vld [vmem:[%s1650_s1 + $0x204] ss:$8 sps:$4 sm:$0xff]   ;;  %740 = vmatprep.subr.bf16.mxu1 %v1059_v0  ;;  %v1064_v3 = vld [vmem:[%s1650_s1 + $0x200] ss:$8 sps:$4 sm:$0xff]   ;;  %v1065_v4 = vld [vmem:[%s1650_s1 + $0x14] ss:$8 sps:$4 sm:$0xff]  }
  0x13   :  { %822 = vmatprep.subr.bf16.mxu0 %v1061_v1  ;;  %741 = vmatpush1.bf16.msra.mxu1 %v1063_v2  ;;  %v1067_v5 = vld [vmem:[%s1650_s1 + $0x214] ss:$8 sps:$4 sm:$0xff]   ;;  %v1069_v6 = vld [vmem:[%s1650_s1 + $0x10] ss:$8 sps:$4 sm:$0xff]   ;;  %v1071_v8 = vld [vmem:[%s1650_s1 + $0x24] ss:$8 sps:$4 sm:$0xff]  }
  0x14   :  { %823 = vmatpush1.bf16.msra.mxu0 %v1064_v3  ;;  %742 = vmatprep.subr.bf16.mxu1 %v1065_v4  ;;  %v1070_v7 = vld [vmem:[%s1650_s1 + $0x210] ss:$8 sps:$4 sm:$0xff]   ;;  %v1073_v9 = vld [vmem:[%s1650_s1 + $0x224] ss:$8 sps:$4 sm:$0xff]   ;;  %v1075_v10 = vld [vmem:[%s1650_s1 + $0x20] ss:$8 sps:$4 sm:$0xff]  }
  0x15   :  { %824 = vmatprep.subr.bf16.mxu0 %v1067_v5  ;;  %v1076_v11 = vld [vmem:[%s1650_s1 + $0x220] ss:$8 sps:$4 sm:$0xff]   ;;  %v1077_v12 = vld [vmem:[%s1650_s1 + $0x34] ss:$8 sps:$4 sm:$0xff]   ;;  %v1081_v14 = vld [vmem:[%s1650_s1 + $0x30] ss:$8 sps:$4 sm:$0xff]  }
  0x16   :  { %v1079_v13 = vld [vmem:[%s1650_s1 + $0x234] ss:$8 sps:$4 sm:$0xff]   ;;  %v1082_v15 = vld [vmem:[%s1650_s1 + $0x230] ss:$8 sps:$4 sm:$0xff]   ;;  %v1083_v16 = vld [vmem:[%s1650_s1 + $0x44] ss:$8 sps:$4 sm:$0xff]  }
  0x17   :  { %743 = vmatpush1.bf16.msra.mxu1 %v1069_v6  ;;  %v1085_v17 = vld [vmem:[%s1650_s1 + $0x244] ss:$8 sps:$4 sm:$0xff]   ;;  %v1087_v18 = vld [vmem:[%s1650_s1 + $0x40] ss:$8 sps:$4 sm:$0xff]   ;;  %v1089_v20 = vld [vmem:[%s1650_s1 + $0x54] ss:$8 sps:$4 sm:$0xff]  }
  0x18   :  { %825 = vmatpush1.bf16.msra.mxu0 %v1070_v7  ;;  %744 = vmatprep.subr.bf16.mxu1 %v1071_v8  ;;  %v1088_v19 = vld [vmem:[%s1650_s1 + $0x240] ss:$8 sps:$4 sm:$0xff]   ;;  %v1091_v21 = vld [vmem:[%s1650_s1 + $0x254] ss:$8 sps:$4 sm:$0xff]   ;;  %v1093_v22 = vld [vmem:[%s1650_s1 + $0x50] ss:$8 sps:$4 sm:$0xff]  }
  0x19   :  { %826 = vmatprep.subr.bf16.mxu0 %v1073_v9  ;;  %v1094_v23 = vld [vmem:[%s1650_s1 + $0x250] ss:$8 sps:$4 sm:$0xff]   ;;  %v1095_v24 = vld [vmem:[%s1650_s1 + $0x64] ss:$8 sps:$4 sm:$0xff]   ;;  %v1099_v26 = vld [vmem:[%s1650_s1 + $0x60] ss:$8 sps:$4 sm:$0xff]  }
  0x1a   :  { %v1097_v25 = vld [vmem:[%s1650_s1 + $0x264] ss:$8 sps:$4 sm:$0xff]   ;;  %v1100_v27 = vld [vmem:[%s1650_s1 + $0x260] ss:$8 sps:$4 sm:$0xff]   ;;  %v1101_v28 = vld [vmem:[%s1650_s1 + $0x74] ss:$8 sps:$4 sm:$0xff]  }
  0x1b   :  { %745 = vmatpush1.bf16.msra.mxu1 %v1075_v10  ;;  %v1103_v29 = vld [vmem:[%s1650_s1 + $0x274] ss:$8 sps:$4 sm:$0xff]   ;;  %v1105_v30 = vld [vmem:[%s1650_s1 + $0x70] ss:$8 sps:$4 sm:$0xff]   ;;  %v1107_v32 = vld [vmem:[%s1650_s1 + $0x84] ss:$8 sps:$4 sm:$0xff]  }
  0x1c   :  { %827 = vmatpush1.bf16.msra.mxu0 %v1076_v11  ;;  %746 = vmatprep.subr.bf16.mxu1 %v1077_v12  ;;  %v1106_v31 = vld [vmem:[%s1650_s1 + $0x270] ss:$8 sps:$4 sm:$0xff]   ;;  %v1109_v33 = vld [vmem:[%s1650_s1 + $0x284] ss:$8 sps:$4 sm:$0xff]   ;;  %v1111_v34 = vld [vmem:[%s1650_s1 + $0x80] ss:$8 sps:$4 sm:$0xff]  }
  0x1d   :  { %828 = vmatprep.subr.bf16.mxu0 %v1079_v13  ;;  %v1112_v35 = vld [vmem:[%s1650_s1 + $0x280] ss:$8 sps:$4 sm:$0xff]   ;;  %v1113_v36 = vld [vmem:[%s1650_s1 + $0x94] ss:$8 sps:$4 sm:$0xff]   ;;  %v1117_v38 = vld [vmem:[%s1650_s1 + $0x90] ss:$8 sps:$4 sm:$0xff]  }
  0x1e   :  { %v1115_v37 = vld [vmem:[%s1650_s1 + $0x294] ss:$8 sps:$4 sm:$0xff]   ;;  %v1118_v39 = vld [vmem:[%s1650_s1 + $0x290] ss:$8 sps:$4 sm:$0xff]   ;;  %v1119_v40 = vld [vmem:[%s1650_s1 + $0xa4] ss:$8 sps:$4 sm:$0xff]  }
  0x1f   :  { %747 = vmatpush1.bf16.msra.mxu1 %v1081_v14  ;;  %v1121_v41 = vld [vmem:[%s1650_s1 + $0x2a4] ss:$8 sps:$4 sm:$0xff]   ;;  %v1123_v42 = vld [vmem:[%s1650_s1 + $0xa0] ss:$8 sps:$4 sm:$0xff]   ;;  %v1125_v44 = vld [vmem:[%s1650_s1 + $0xb4] ss:$8 sps:$4 sm:$0xff]  }
  0x20   :  { %829 = vmatpush1.bf16.msra.mxu0 %v1082_v15  ;;  %748 = vmatprep.subr.bf16.mxu1 %v1083_v16  ;;  %v1124_v43 = vld [vmem:[%s1650_s1 + $0x2a0] ss:$8 sps:$4 sm:$0xff]   ;;  %v1127_v45 = vld [vmem:[%s1650_s1 + $0x2b4] ss:$8 sps:$4 sm:$0xff]   ;;  %v1129_v47 = vld [vmem:[%s1650_s1 + $0xb0] ss:$8 sps:$4 sm:$0xff]  }
  0x21   :  { %830 = vmatprep.subr.bf16.mxu0 %v1085_v17  ;;  %v27_v46 = vld [vmem:[%s1649_s0] sm:$0xff]  ;;  %v1130_v49 = vld [vmem:[%s1650_s1 + $0x2b0] ss:$8 sps:$4 sm:$0xff]   ;;  %v1137_v56 = vld [vmem:[%s1650_s1 + $0xd4] ss:$8 sps:$4 sm:$0xff]   ;;  %v1259_v16 = vmov 0  }
  0x22   :  { %v925_v48 = vcombine.high %v27_v46, %v27_v46  ;;  %v29_v50 = vld [vmem:[%s1649_s0 + $0x10] sm:$0xff]  ;;  %v1131_v51 = vld [vmem:[%s1650_s1 + $0xc4] ss:$8 sps:$4 sm:$0xff]   ;;  %v1135_v54 = vld [vmem:[%s1650_s1 + $0xc0] ss:$8 sps:$4 sm:$0xff]   ;;  %v924_v6 = vcombine.low %v27_v46, %v27_v46 }
  0x23   :  { %749 = vmatpush1.bf16.msra.mxu1 %v1087_v18  ;;  %v1133_v52 = vld [vmem:[%s1650_s1 + $0x2c4] ss:$8 sps:$4 sm:$0xff]   ;;  %v929_v53 = vcombine.high %v29_v50, %v29_v50  ;;  %v1136_v55 = vld [vmem:[%s1650_s1 + $0x2c0] ss:$8 sps:$4 sm:$0xff]   ;;  %v1139_v57 = vld [vmem:[%s1650_s1 + $0x2d4] ss:$8 sps:$4 sm:$0xff]   ;;  %v928_v7 = vcombine.low %v29_v50, %v29_v50 }
  0x24   :  { %831 = vmatpush1.bf16.msra.mxu0 %v1088_v19  ;;  %750 = vmatprep.subr.bf16.mxu1 %v1089_v20  ;;  %v1141_v58 = vld [vmem:[%s1650_s1 + $0xd0] ss:$8 sps:$4 sm:$0xff]   ;;  %v1143_v60 = vld [vmem:[%s1650_s1 + $0xe4] ss:$8 sps:$4 sm:$0xff]   ;;  %v1147_v62 = vld [vmem:[%s1650_s1 + $0xe0] ss:$8 sps:$4 sm:$0xff]  }
  0x25   :  { %832 = vmatprep.subr.bf16.mxu0 %v1091_v21  ;;  %772 = vmatprep.mubr.bf16.mxu1 %v925_v48  ;;  %v1142_v59 = vld [vmem:[%s1650_s1 + $0x2d0] ss:$8 sps:$4 sm:$0xff]   ;;  %v1145_v61 = vld [vmem:[%s1650_s1 + $0x2e4] ss:$8 sps:$4 sm:$0xff]   ;;  %v1148_v63 = vld [vmem:[%s1650_s1 + $0x2e0] ss:$8 sps:$4 sm:$0xff]  }
  0x26   :  { %854 = vmatprep.mubr.bf16.mxu0 %v929_v53  ;;  %v1149_v0 = vld [vmem:[%s1650_s1 + $0xf4] ss:$8 sps:$4 sm:$0xff]   ;;  %v1153_v2 = vld [vmem:[%s1650_s1 + $0xf0] ss:$8 sps:$4 sm:$0xff]   ;;  %v1159_v4 = vld [vmem:[%s1650_s1 + $0x104] ss:$8 sps:$4 sm:$0xff]  }
  0x27   :  { %751 = vmatpush1.bf16.msra.mxu1 %v1093_v22  ;;  %v1151_v1 = vld [vmem:[%s1650_s1 + $0x2f4] ss:$8 sps:$4 sm:$0xff]   ;;  %v1154_v3 = vld [vmem:[%s1650_s1 + $0x2f0] ss:$8 sps:$4 sm:$0xff]   ;;  %v1164_v5 = vld [vmem:[%s1650_s1 + $0x304] ss:$8 sps:$4 sm:$0xff]  }
  0x28   :  { %833 = vmatpush1.bf16.msra.mxu0 %v1094_v23  ;;  %752 = vmatprep.subr.bf16.mxu1 %v1095_v24  ;;  %v1157_v8 = vld [vmem:[%s1650_s1 + $0x100] ss:$8 sps:$4 sm:$0xff]   ;;  %v1167_v10 = vld [vmem:[%s1650_s1 + $0x114] ss:$8 sps:$4 sm:$0xff]   ;;  %v1165_v12 = vld [vmem:[%s1650_s1 + $0x110] ss:$8 sps:$4 sm:$0xff]  }
  0x29   :  { %834 = vmatprep.subr.bf16.mxu0 %v1097_v25  ;;  %v1162_v9 = vld [vmem:[%s1650_s1 + $0x300] ss:$8 sps:$4 sm:$0xff]   ;;  %v1170_v11 = vld [vmem:[%s1650_s1 + $0x314] ss:$8 sps:$4 sm:$0xff]   ;;  %v1168_v13 = vld [vmem:[%s1650_s1 + $0x310] ss:$8 sps:$4 sm:$0xff]  }
  0x2a   :  { %v1173_v14 = vld [vmem:[%s1650_s1 + $0x124] ss:$8 sps:$4 sm:$0xff]   ;;  %v1171_v17 = vld [vmem:[%s1650_s1 + $0x120] ss:$8 sps:$4 sm:$0xff]   ;;  %v1179_v19 = vld [vmem:[%s1650_s1 + $0x134] ss:$8 sps:$4 sm:$0xff]  }
  0x2b   :  { %753 = vmatpush1.bf16.msra.mxu1 %v1099_v26  ;;  %v1176_v15 = vld [vmem:[%s1650_s1 + $0x324] ss:$8 sps:$4 sm:$0xff]   ;;  %v1174_v18 = vld [vmem:[%s1650_s1 + $0x320] ss:$8 sps:$4 sm:$0xff]   ;;  %v1182_v20 = vld [vmem:[%s1650_s1 + $0x334] ss:$8 sps:$4 sm:$0xff]  }
  0x2c   :  { %835 = vmatpush1.bf16.msra.mxu0 %v1100_v27  ;;  %754 = vmatprep.subr.bf16.mxu1 %v1101_v28  ;;  %v1177_v21 = vld [vmem:[%s1650_s1 + $0x130] ss:$8 sps:$4 sm:$0xff]   ;;  %v1541_v23 = vld [vmem:[%s1649_s0 + $0x8] sm:$0xff]  ;;  %v1219_v48 = vld [vmem:[%s1650_s1 + $0x1b4] ss:$8 sps:$4 sm:$0xff]  }
  0x2d   :  { %836 = vmatprep.subr.bf16.mxu0 %v1103_v29  ;;  %v1180_v22 = vld [vmem:[%s1650_s1 + $0x330] ss:$8 sps:$4 sm:$0xff]   ;;  %v1185_v24 = vld [vmem:[%s1650_s1 + $0x144] ss:$8 sps:$4 sm:$0xff]   ;;  %v927_v26 = vcombine.high %v1541_v23, %v1541_v23  ;;  %v1183_v27 = vld [vmem:[%s1650_s1 + $0x140] ss:$8 sps:$4 sm:$0xff]  }
  0x2e   :  { %v1188_v25 = vld [vmem:[%s1650_s1 + $0x344] ss:$8 sps:$4 sm:$0xff]   ;;  %v1186_v28 = vld [vmem:[%s1650_s1 + $0x340] ss:$8 sps:$4 sm:$0xff]   ;;  %v1191_v29 = vld [vmem:[%s1650_s1 + $0x154] ss:$8 sps:$4 sm:$0xff]  }
  0x2f   :  { %755 = vmatpush1.bf16.msra.mxu1 %v1105_v30  ;;  %v1194_v30 = vld [vmem:[%s1650_s1 + $0x354] ss:$8 sps:$4 sm:$0xff]   ;;  %v1216_v46 = vld [vmem:[%s1650_s1 + $0x1a4] ss:$8 sps:$4 sm:$0xff]   ;;  %v1223_v53 = vld [vmem:[%s1650_s1 + $0x1d0] ss:$8 sps:$4 sm:$0xff]  }
  0x30   :  { %837 = vmatpush1.bf16.msra.mxu0 %v1106_v31  ;;  %756 = vmatprep.subr.bf16.mxu1 %v1107_v32  ;;  %v1189_v31 = vld [vmem:[%s1650_s1 + $0x150] ss:$8 sps:$4 sm:$0xff]   ;;  %v1222_v50 = vld [vmem:[%s1650_s1 + $0x1c4] ss:$8 sps:$4 sm:$0xff]  }
  0x31   :  { %838 = vmatprep.subr.bf16.mxu0 %v1109_v33  ;;  %v1192_v32 = vld [vmem:[%s1650_s1 + $0x350] ss:$8 sps:$4 sm:$0xff]   ;;  %v1197_v33 = vld [vmem:[%s1650_s1 + $0x164] ss:$8 sps:$4 sm:$0xff]  }
  0x33   :  { %757 = vmatpush1.bf16.msra.mxu1 %v1111_v34  ;;  %v1200_v34 = vld [vmem:[%s1650_s1 + $0x364] ss:$8 sps:$4 sm:$0xff]  }
  0x34   :  { %839 = vmatpush1.bf16.msra.mxu0 %v1112_v35  ;;  %758 = vmatprep.subr.bf16.mxu1 %v1113_v36  ;;  %v1195_v35 = vld [vmem:[%s1650_s1 + $0x160] ss:$8 sps:$4 sm:$0xff]  }
  0x35   :  { %840 = vmatprep.subr.bf16.mxu0 %v1115_v37  ;;  %v1198_v36 = vld [vmem:[%s1650_s1 + $0x360] ss:$8 sps:$4 sm:$0xff]   ;;  %v1203_v37 = vld [vmem:[%s1650_s1 + $0x174] ss:$8 sps:$4 sm:$0xff]  }
  0x37   :  { %759 = vmatpush1.bf16.msra.mxu1 %v1117_v38  ;;  %v1206_v38 = vld [vmem:[%s1650_s1 + $0x374] ss:$8 sps:$4 sm:$0xff]  }
  0x38   :  { %841 = vmatpush1.bf16.msra.mxu0 %v1118_v39  ;;  %760 = vmatprep.subr.bf16.mxu1 %v1119_v40  ;;  %v1201_v39 = vld [vmem:[%s1650_s1 + $0x170] ss:$8 sps:$4 sm:$0xff]  }
  0x39   :  { %842 = vmatprep.subr.bf16.mxu0 %v1121_v41  ;;  %v1204_v40 = vld [vmem:[%s1650_s1 + $0x370] ss:$8 sps:$4 sm:$0xff]   ;;  %v1209_v41 = vld [vmem:[%s1650_s1 + $0x184] ss:$8 sps:$4 sm:$0xff]  }
  0x3b   :  { %761 = vmatpush1.bf16.msra.mxu1 %v1123_v42  ;;  %v1210_v42 = vld [vmem:[%s1649_s0 + $0x18] ss:$0 sps:$4 sm:$0xff]  }
  0x3c   :  { %843 = vmatpush1.bf16.msra.mxu0 %v1124_v43  ;;  %762 = vmatprep.subr.bf16.mxu1 %v1125_v44  ;;  %v1207_v43 = vld [vmem:[%s1650_s1 + $0x180] ss:$8 sps:$4 sm:$0xff]   ;;  %v1213_v44 = vld [vmem:[%s1650_s1 + $0x194] ss:$8 sps:$4 sm:$0xff]  }
  0x3d   :  { %844 = vmatprep.subr.bf16.mxu0 %v1127_v45  ;;  %v1211_v45 = vld [vmem:[%s1650_s1 + $0x190] ss:$8 sps:$4 sm:$0xff]  }
  0x3f   :  { %763 = vmatpush1.bf16.msra.mxu1 %v1129_v47  ;;  %v1214_v47 = vld [vmem:[%s1650_s1 + $0x1a0] ss:$8 sps:$4 sm:$0xff]  }
  0x40   :  { %845 = vmatpush1.bf16.msra.mxu0 %v1130_v49  ;;  %764 = vmatprep.subr.bf16.mxu1 %v1131_v51  ;;  %v1217_v49 = vld [vmem:[%s1650_s1 + $0x1b0] ss:$8 sps:$4 sm:$0xff]   ;;  %v1220_v51 = vld [vmem:[%s1650_s1 + $0x1c0] ss:$8 sps:$4 sm:$0xff]  }
  0x41   :  { %846 = vmatprep.subr.bf16.mxu0 %v1133_v52  ;;  %v1225_v52 = vld [vmem:[%s1650_s1 + $0x1d4] ss:$8 sps:$4 sm:$0xff]  }
  0x43   :  { %765 = vmatpush1.bf16.msra.mxu1 %v1135_v54  ;;  %v1228_v54 = vld [vmem:[%s1650_s1 + $0x1e4] ss:$8 sps:$4 sm:$0xff]  }
  0x44   :  { %847 = vmatpush1.bf16.msra.mxu0 %v1136_v55  ;;  %766 = vmatprep.subr.bf16.mxu1 %v1137_v56  ;;  %v1226_v55 = vld [vmem:[%s1650_s1 + $0x1e0] ss:$8 sps:$4 sm:$0xff]   ;;  %v1231_v56 = vld [vmem:[%s1650_s1 + $0x1f4] ss:$8 sps:$4 sm:$0xff]  }
  0x45   :  { %848 = vmatprep.subr.bf16.mxu0 %v1139_v57  ;;  %v1229_v57 = vld [vmem:[%s1650_s1 + $0x1f0] ss:$8 sps:$4 sm:$0xff]  }
  0x47   :  { %767 = vmatpush1.bf16.msra.mxu1 %v1141_v58  ;;  %v926_v58 = vcombine.low %v1541_v23, %v1541_v23 }
  0x48   :  { %849 = vmatpush1.bf16.msra.mxu0 %v1142_v59  ;;  %768 = vmatprep.subr.bf16.mxu1 %v1143_v60 }
  0x49   :  { %850 = vmatprep.subr.bf16.mxu0 %v1145_v61 }
  0x4b   :  { %769 = vmatpush1.bf16.msra.mxu1 %v1147_v62 }
  0x4c   :  { %851 = vmatpush1.bf16.msra.mxu0 %v1148_v63  ;;  %770 = vmatprep.subr.bf16.mxu1 %v1149_v0  ;;  %v145_v63 = vlaneseq }
  0x4d   :  { %852 = vmatprep.subr.bf16.mxu0 %v1151_v1 }
  0x4e   :  { %v146_v0 = vshrl.u32 %v145_v63, 7 }
  0x4f   :  { %771 = vmatpush1.bf16.msra.mxu1 %v1153_v2  ;;  %v143_v2 = vld [vmem:[#allocation2] sm:$0x3] }
  0x50   :  { %853 = vmatpush1.bf16.msra.mxu0 %v1154_v3  ;;  %781 = vmatprep.subr.bf16.mxu1 %v1159_v4  ;;  %v147_v1 = vsub.s32 0, %v146_v0  ;;  %v151_v3 = vsub.s32 1, %v146_v0 }
  0x51   :  { %863 = vmatprep.subr.bf16.mxu0 %v1164_v5 }
  0x52   :  { %773 = vmatmul.mubr.bf16.vlgmr.msra.gmra.mrb[0].mxu1 %v924_v6  ;;  %v148_v4 = vrot.slane %v143_v2, %v147_v1  ;;  %v152_v5 = vrot.slane %v143_v2, %v151_v3 }
  0x53   :  { %855 = vmatmul.mubr.bf16.vlgmr.msra.gmra.mrb[0].mxu0 %v928_v7  ;;  %782 = vmatpush1.bf16.msra.mxu1 %v1157_v8 }
  0x54   :  { %864 = vmatpush1.bf16.msra.mxu0 %v1162_v9  ;;  %783 = vmatprep.subr.bf16.mxu1 %v1167_v10 }
  0x55   :  { %865 = vmatprep.subr.bf16.mxu0 %v1170_v11  ;;  %895 = vmatprep.mubr.bf16.mxu0 %v1259_v16 }
  0x56   :  { %813 = vmatprep.mubr.bf16.mxu1 %v927_v26 }
  0x57   :  { %784 = vmatpush1.bf16.msra.mxu1 %v1165_v12 }
  0x58   :  { %866 = vmatpush1.bf16.msra.mxu0 %v1168_v13  ;;  %785 = vmatprep.subr.bf16.mxu1 %v1173_v14 }
  0x59   :  { %867 = vmatprep.subr.bf16.mxu0 %v1176_v15 }
  0x5b   :  { %786 = vmatpush1.bf16.msra.mxu1 %v1171_v17 }
  0x5c   :  { %868 = vmatpush1.bf16.msra.mxu0 %v1174_v18  ;;  %787 = vmatprep.subr.bf16.mxu1 %v1179_v19 }
  0x5d   :  { %869 = vmatprep.subr.bf16.mxu0 %v1182_v20 }
  0x5f   :  { %788 = vmatpush1.bf16.msra.mxu1 %v1177_v21 }
  0x60   :  { %870 = vmatpush1.bf16.msra.mxu0 %v1180_v22  ;;  %789 = vmatprep.subr.bf16.mxu1 %v1185_v24 }
  0x61   :  { %871 = vmatprep.subr.bf16.mxu0 %v1188_v25 }
  0x63   :  { %790 = vmatpush1.bf16.msra.mxu1 %v1183_v27 }
  0x64   :  { %872 = vmatpush1.bf16.msra.mxu0 %v1186_v28  ;;  %791 = vmatprep.subr.bf16.mxu1 %v1191_v29 }
  0x65   :  { %873 = vmatprep.subr.bf16.mxu0 %v1194_v30 }
  0x67   :  { %792 = vmatpush1.bf16.msra.mxu1 %v1189_v31 }
  0x68   :  { %874 = vmatpush1.bf16.msra.mxu0 %v1192_v32  ;;  %793 = vmatprep.subr.bf16.mxu1 %v1197_v33 }
  0x69   :  { %875 = vmatprep.subr.bf16.mxu0 %v1200_v34 }
  0x6b   :  { %794 = vmatpush1.bf16.msra.mxu1 %v1195_v35 }
  0x6c   :  { %876 = vmatpush1.bf16.msra.mxu0 %v1198_v36  ;;  %795 = vmatprep.subr.bf16.mxu1 %v1203_v37 }
  0x6d   :  { %877 = vmatprep.subr.bf16.mxu0 %v1206_v38 }
  0x6f   :  { %796 = vmatpush1.bf16.msra.mxu1 %v1201_v39 }
  0x70   :  { %878 = vmatpush1.bf16.msra.mxu0 %v1204_v40  ;;  %797 = vmatprep.subr.bf16.mxu1 %v1209_v41 }
  0x73   :  { %896 = vmatmul.mubr.bf16.vlgmr.msra.gmra.mrb[0].mxu0 %v1210_v42  ;;  %798 = vmatpush1.bf16.msra.mxu1 %v1207_v43 }
  0x74   :  { %799 = vmatprep.subr.bf16.mxu1 %v1213_v44 }
  0x77   :  { %800 = vmatpush1.bf16.msra.mxu1 %v1211_v45 }
  0x78   :  { %801 = vmatprep.subr.bf16.mxu1 %v1216_v46 }
  0x7b   :  { %802 = vmatpush1.bf16.msra.mxu1 %v1214_v47 }
  0x7c   :  { %803 = vmatprep.subr.bf16.mxu1 %v1219_v48 }
  0x7f   :  { %804 = vmatpush1.bf16.msra.mxu1 %v1217_v49 }
  0x80   :  { %805 = vmatprep.subr.bf16.mxu1 %v1222_v50 }
  0x83   :  { %806 = vmatpush1.bf16.msra.mxu1 %v1220_v51 }
  0x84   :  { %807 = vmatprep.subr.bf16.mxu1 %v1225_v52 }
  0x87   :  { %808 = vmatpush1.bf16.msra.mxu1 %v1223_v53 }
  0x88   :  { %809 = vmatprep.subr.bf16.mxu1 %v1228_v54 }
  0x8b   :  { %810 = vmatpush1.bf16.msra.mxu1 %v1226_v55 }
  0x8c   :  { %811 = vmatprep.subr.bf16.mxu1 %v1231_v56 }
  0x8f   :  { %812 = vmatpush1.bf16.msra.mxu1 %v1229_v57 }
  0x92   :  { %814 = vmatmul.mubr.bf16.vlgmr.msra.gmra.mrb[0].mxu1 %v926_v58 }
 0x146   :  { %v897_v59 = vpop.f32.mrb[0].mxu0 }
 0x147   :  { %v899_v60 = vpop.f32.mrb[1].mxu0 }
 0x148   :  { %v901_v61 = vpop.f32.mrb[2].mxu0 }
 0x149   :  { %v902_v62 = vpop.f32.mrb[3].mxu0 }
 0x165   :  { %v815_v6 = vpop.f32.mrb[0].mxu1 }
 0x166   :  { %v1045_v7 = vadd.f32 %v815_v6, %v148_v4  ;;  %v817_v8 = vpop.f32.mrb[1].mxu1 }
 0x167   :  { %v1047_v9 = vadd.f32 %v817_v8, %v152_v5  ;;  %v819_v10 = vpop.f32.mrb[2].mxu1 }
 0x168   :  { %v1046_v11 = vadd.f32 %v1045_v7, %v897_v59  ;;  %v820_v12 = vpop.f32.mrb[3].mxu1 }
 0x169   :  { %v1048_v13 = vadd.f32 %v1047_v9, %v899_v60 }
 0x16a   :  { %vm904_vm0 = vcmp.ge.f32.partialorder %v1046_v11, 0.0  ;;  %v906_v14 = vmul.f32 0.2, %v1046_v11 }
 0x16b   :  { %vm905_vm1 = vcmp.ge.f32.partialorder %v1048_v13, 0.0  ;;  %v907_v15 = vmul.f32 0.2, %v1048_v13 }
 0x16c   :  { %v908_v16 = vsel %vm904_vm0, %v1046_v11, %v906_v14 }
 0x16d   :  { %v909_v17 = vsel %vm905_vm1, %v1048_v13, %v907_v15 }
 0x16e   :  { %v1044_v18 = vpack.c.bf16 %v909_v17, %v908_v16 }
 0x170   :  { %918 = vst [vmem:[%s1652_s3] sm:$0xff] %v1044_v18 }
 0x171   :  { %923 = vsyncpa [#allocation3], 1 }

// kernel: so_forward.6
= control target key start
LH: loop header
LB: loop body
LE: loop exit
PB: predicated region body
PF: predicated region fallthrough
CT: control target
= control target key end

     0   :  { %s1013_s12 = smov 0   ;;  %s1194_s0 = inlined_call_operand.vmem [shape: bf16[400,128], index: 0, kind: input, shape index: {}]   ;;  %s1195_s1 = inlined_call_operand.vmem [shape: bf16[128,256], index: 1, kind: input, shape index: {}]   ;;  %s1196_s2 = inlined_call_operand.vmem [shape: f32[1,256], index: 2, kind: input, shape index: {}]   ;;  %s1197_s3 = inlined_call_operand.vmem [shape: bf16[400,256], index: 3, kind: output, shape index: {}]  }
   0x1 LB: > { %s832_s13 = sadd.s32 4294967295, %s990_s12   ;;  %p836_p0 = scmp.ge.s32.totalorder %s990_s12, 1  ;;  %s990_s12 = sphi %s1013_s12, %s13_s12  }
   0x2   : > { %p138_p1 = scmp.lt.s32.totalorder %s990_s12, 3 }
   0x4   : > { %p139_p2 = pnand %p836_p0, %p138_p1 }
   0x5   : > { %v947_v0 = vld [vmem:[%s1195_s1 + $0x4] ss:$8 sps:$4 sm:$0xff] (!%p139_p2)   ;;  %s163_s16 = smul.u32 (!%p139_p2), 25, %s832_s13  ;;  %v949_v1 = vld [vmem:[%s1195_s1] ss:$8 sps:$4 sm:$0xff] (!%p139_p2)   ;;  %v992_v2 = vmov (!%p139_p2), 0   ;;  %v220_v30 = vlaneseq (!%p139_p2) }
   0x6   : > { %142 = sbr.rel (%p139_p2) target bundleno = 309 (0x135), region = 32  ;;  %418 = vmatprep.mubr.bf16.mxu0 (!%p139_p2), %v992_v2  ;;  %488 = vmatprep.mubr.bf16.mxu1 (!%p139_p2), %v992_v2  ;;  %v950_v3 = vld [vmem:[%s1195_s1 + $0x14] ss:$8 sps:$4 sm:$0xff] (!%p139_p2)   ;;  %v952_v4 = vld [vmem:[%s1195_s1 + $0x10] ss:$8 sps:$4 sm:$0xff] (!%p139_p2)  }
   0x7   : > { %386 = vmatprep.subr.bf16.mxu0 (!%p139_p2), %v947_v0  ;;  %922 = vmatprep.subr.bf16.mxu1 (!%p139_p2), %v947_v0  ;;  %p164_p3 = scmp.lt.s32.totalorder (!%p139_p2), %s163_s16, 49  ;;  %v953_v5 = vld [vmem:[%s1195_s1 + $0x24] ss:$8 sps:$4 sm:$0xff] (!%p139_p2)   ;;  %v955_v6 = vld [vmem:[%s1195_s1 + $0x20] ss:$8 sps:$4 sm:$0xff] (!%p139_p2)   ;;  %v221_v31 = vshrl.u32 (!%p139_p2), %v220_v30, 7 }
   0x8   : > { %387 = vmatpush1.bf16.msra.mxu0 (!%p139_p2), %v949_v1  ;;  %930 = vmatpush1.bf16.msra.mxu1 (!%p139_p2), %v949_v1  ;;  %v956_v7 = vld [vmem:[%s1195_s1 + $0x34] ss:$8 sps:$4 sm:$0xff] (!%p139_p2)   ;;  %v958_v8 = vld [vmem:[%s1195_s1 + $0x30] ss:$8 sps:$4 sm:$0xff] (!%p139_p2)   ;;  %v959_v9 = vld [vmem:[%s1195_s1 + $0x44] ss:$8 sps:$4 sm:$0xff] (!%p139_p2)  }
   0x9   : > { %388 = vmatprep.subr.bf16.mxu0 (!%p139_p2), %v950_v3  ;;  %923 = vmatprep.subr.bf16.mxu1 (!%p139_p2), %v950_v3  ;;  %v961_v10 = vld [vmem:[%s1195_s1 + $0x40] ss:$8 sps:$4 sm:$0xff] (!%p139_p2)   ;;  %v962_v11 = vld [vmem:[%s1195_s1 + $0x54] ss:$8 sps:$4 sm:$0xff] (!%p139_p2)   ;;  %v964_v12 = vld [vmem:[%s1195_s1 + $0x50] ss:$8 sps:$4 sm:$0xff] (!%p139_p2)  }
   0xa   : > { %v965_v13 = vld [vmem:[%s1195_s1 + $0x64] ss:$8 sps:$4 sm:$0xff] (!%p139_p2)   ;;  %v967_v14 = vld [vmem:[%s1195_s1 + $0x60] ss:$8 sps:$4 sm:$0xff] (!%p139_p2)   ;;  %v968_v15 = vld [vmem:[%s1195_s1 + $0x74] ss:$8 sps:$4 sm:$0xff] (!%p139_p2)  }
   0xb   : > { %v970_v16 = vld [vmem:[%s1195_s1 + $0x70] ss:$8 sps:$4 sm:$0xff] (!%p139_p2)   ;;  %v222_v32 = vsub.s32 (!%p139_p2), 0, %v221_v31  ;;  %v218_v33 = vld [vmem:[%s1196_s2] sm:$0x3] (!%p139_p2)  ;;  %v226_v34 = vsub.s32 (!%p139_p2), 1, %v221_v31 }
   0xc   : > { %389 = vmatpush1.bf16.msra.mxu0 (!%p139_p2), %v952_v4  ;;  %931 = vmatpush1.bf16.msra.mxu1 (!%p139_p2), %v952_v4 }
   0xd   : > { %s1199_s16 = smov (!%p164_p3, %s163_s16), 49  ;;  %390 = vmatprep.subr.bf16.mxu0 %v953_v5  ;;  %924 = vmatprep.subr.bf16.mxu1 %v953_v5  ;;  %v1106_v35 = vrot.slane %v218_v33, %v222_v32  ;;  %v1108_v36 = vrot.slane %v218_v33, %v226_v34 }
   0xe   : > { %s837_s25 = sshll.u32 %s1199_s16, 2  ;;  %s896_s28 = sshll.u32 %s1199_s16, 3 }
   0xf   : > { %s1050_s5 = scalar_lea.vmem %s1194_s0, %s837_s25  ;;  %s1122_s30 = scalar_lea.vmem %s1197_s3, %s896_s28 }
  0x10   : > { %391 = vmatpush1.bf16.msra.mxu0 %v955_v6  ;;  %932 = vmatpush1.bf16.msra.mxu1 %v955_v6  ;;  %v971_v17 = vld [vmem:[%s1050_s5] sm:$0xff]   ;;  %v972_v18 = vld [vmem:[%s1050_s5 + $0x38] sm:$0xff]   ;;  %v973_v19 = vld [vmem:[%s1050_s5 + $0x8] sm:$0xff]  }
  0x11   : > { %392 = vmatprep.subr.bf16.mxu0 %v956_v7  ;;  %925 = vmatprep.subr.bf16.mxu1 %v956_v7  ;;  %v974_v20 = vld [vmem:[%s1050_s5 + $0x40] sm:$0xff]   ;;  %v975_v21 = vld [vmem:[%s1050_s5 + $0x10] sm:$0xff]   ;;  %v976_v22 = vld [vmem:[%s1050_s5 + $0x48] sm:$0xff]  }
  0x12   : > { %v977_v23 = vld [vmem:[%s1050_s5 + $0x18] sm:$0xff]   ;;  %v978_v24 = vld [vmem:[%s1050_s5 + $0x50] sm:$0xff]   ;;  %v979_v25 = vld [vmem:[%s1050_s5 + $0x20] sm:$0xff]  }
  0x13   : > { %v980_v26 = vld [vmem:[%s1050_s5 + $0x58] sm:$0xff]   ;;  %v981_v27 = vld [vmem:[%s1050_s5 + $0x28] sm:$0xff]   ;;  %v982_v28 = vld [vmem:[%s1050_s5 + $0x60] ss:$0 sps:$4 sm:$0xff]  }
  0x14   : > { %393 = vmatpush1.bf16.msra.mxu0 %v958_v8  ;;  %933 = vmatpush1.bf16.msra.mxu1 %v958_v8  ;;  %v983_v29 = vld [vmem:[%s1050_s5 + $0x30] sm:$0xff]  }
  0x15   : > { %394 = vmatprep.subr.bf16.mxu0 %v959_v9  ;;  %926 = vmatprep.subr.bf16.mxu1 %v959_v9 }
  0x18   : > { %395 = vmatpush1.bf16.msra.mxu0 %v961_v10  ;;  %934 = vmatpush1.bf16.msra.mxu1 %v961_v10 }
  0x19   : > { %396 = vmatprep.subr.bf16.mxu0 %v962_v11  ;;  %927 = vmatprep.subr.bf16.mxu1 %v962_v11 }
  0x1c   : > { %397 = vmatpush1.bf16.msra.mxu0 %v964_v12  ;;  %935 = vmatpush1.bf16.msra.mxu1 %v964_v12 }
  0x1d   : > { %398 = vmatprep.subr.bf16.mxu0 %v965_v13  ;;  %928 = vmatprep.subr.bf16.mxu1 %v965_v13 }
  0x20   : > { %399 = vmatpush1.bf16.msra.mxu0 %v967_v14  ;;  %936 = vmatpush1.bf16.msra.mxu1 %v967_v14 }
  0x21   : > { %400 = vmatprep.subr.bf16.mxu0 %v968_v15  ;;  %929 = vmatprep.subr.bf16.mxu1 %v968_v15 }
  0x24   : > { %401 = vmatpush1.bf16.msra.mxu0 %v970_v16  ;;  %937 = vmatpush1.bf16.msra.mxu1 %v970_v16 }
  0x27   : > { %419 = vmatmul.mubr.bf16.vlgmr.msra.gmra.mrb[0].mxu0 %v971_v17  ;;  %489 = vmatmul.mubr.bf16.vlgmr.msra.gmra.mrb[0].mxu1 %v972_v18 }
  0x28   : > { %428 = vmatprep.mubr.bf16.mxu0 %v992_v2  ;;  %498 = vmatprep.mubr.bf16.mxu1 %v992_v2 }
  0x2f   : > { %429 = vmatmul.mubr.bf16.gmra.mrb[4].mxu0 %v973_v19  ;;  %499 = vmatmul.mubr.bf16.gmra.mrb[4].mxu1 %v974_v20 }
  0x30   : > { %438 = vmatprep.mubr.bf16.mxu0 %v992_v2  ;;  %508 = vmatprep.mubr.bf16.mxu1 %v992_v2 }
  0x37   : > { %439 = vmatmul.mubr.bf16.gmra.mrb[8].mxu0 %v975_v21  ;;  %509 = vmatmul.mubr.bf16.gmra.mrb[8].mxu1 %v976_v22 }
  0x38   : > { %448 = vmatprep.mubr.bf16.mxu0 %v992_v2  ;;  %518 = vmatprep.mubr.bf16.mxu1 %v992_v2 }
  0x3f   : > { %449 = vmatmul.mubr.bf16.gmra.mrb[12].mxu0 %v977_v23  ;;  %519 = vmatmul.mubr.bf16.gmra.mrb[12].mxu1 %v978_v24 }
  0x40   : > { %458 = vmatprep.mubr.bf16.mxu0 %v992_v2  ;;  %528 = vmatprep.mubr.bf16.mxu1 %v992_v2 }
  0x47   : > { %459 = vmatmul.mubr.bf16.gmra.mrb[16].mxu0 %v979_v25  ;;  %529 = vmatmul.mubr.bf16.gmra.mrb[16].mxu1 %v980_v26 }
  0x48   : > { %468 = vmatprep.mubr.bf16.mxu0 %v992_v2  ;;  %538 = vmatprep.mubr.bf16.mxu1 %v992_v2 }
  0x4f   : > { %469 = vmatmul.mubr.bf16.gmra.mrb[20].mxu0 %v981_v27  ;;  %539 = vmatmul.mubr.bf16.gmra.mrb[20].mxu1 %v982_v28 }
  0x50   : > { %478 = vmatprep.mubr.bf16.mxu0 %v992_v2 }
  0x57   : > { %479 = vmatmul.mubr.bf16.gmra.mrb[24].mxu0 %v983_v29 }
  0xfa   : > { %v420_v37 = vpop.f32.mrb[0].mxu0  ;;  %v490_v38 = vpop.f32.mrb[0].mxu1 }
  0xfb   : > { %v421_v39 = vadd.f32 %v420_v37, %v1106_v35  ;;  %v422_v40 = vpop.f32.mrb[1].mxu0  ;;  %v491_v41 = vadd.f32 %v490_v38, %v1106_v35  ;;  %v492_v42 = vpop.f32.mrb[1].mxu1 }
  0xfc   : > { %v423_v43 = vadd.f32 %v422_v40, %v1108_v36  ;;  %v424_v44 = vpop.f32.mrb[2].mxu0  ;;  %v493_v45 = vadd.f32 %v492_v42, %v1108_v36  ;;  %v494_v46 = vpop.f32.mrb[2].mxu1 }
  0xfd   : > { %v547_v47 = vmax.f32 %v421_v39, 0.0  ;;  %v425_v48 = vadd.f32 %v424_v44, %v1106_v35  ;;  %v426_v49 = vpop.f32.mrb[3].mxu0  ;;  %v575_v50 = vmax.f32 %v491_v41, 0.0  ;;  %v495_v51 = vadd.f32 %v494_v46, %v1106_v35  ;;  %v496_v52 = vpop.f32.mrb[3].mxu1 }
  0xfe   : > { %v548_v53 = vmax.f32 %v423_v43, 0.0  ;;  %v427_v54 = vadd.f32 %v426_v49, %v1108_v36  ;;  %v576_v55 = vmax.f32 %v493_v45, 0.0  ;;  %v497_v56 = vadd.f32 %v496_v52, %v1108_v36 }
  0xff   : > { %v549_v57 = vmax.f32 %v425_v48, 0.0  ;;  %v577_v58 = vmax.f32 %v495_v51, 0.0 }
 0x100   : > { %v897_v59 = vpack.c.bf16 %v548_v53, %v547_v47  ;;  %v550_v60 = vmax.f32 %v427_v54, 0.0  ;;  %v911_v61 = vpack.c.bf16 %v576_v55, %v575_v50  ;;  %v578_v62 = vmax.f32 %v497_v56, 0.0 }
 0x102   : > { %749 = vst [vmem:[%s1122_s30] sm:$0xff] %v897_v59  ;;  %v898_v63 = vpack.c.bf16 %v550_v60, %v549_v57  ;;  %v430_v0 = vpop.f32.mrb[4].mxu0  ;;  %763 = vst [vmem:[%s1122_s30 + $0x70] sm:$0xff] %v911_v61  ;;  %v912_v1 = vpack.c.bf16 %v578_v62, %v577_v58  ;;  %v500_v2 = vpop.f32.mrb[4].mxu1 }
 0x103   : > { %v431_v3 = vadd.f32 %v430_v0, %v1106_v35  ;;  %v432_v4 = vpop.f32.mrb[5].mxu0  ;;  %v501_v5 = vadd.f32 %v500_v2, %v1106_v35  ;;  %v502_v6 = vpop.f32.mrb[5].mxu1 }
 0x104   : > { %750 = vst [vmem:[%s1122_s30 + $0x8] sm:$0xff] %v898_v63  ;;  %v433_v7 = vadd.f32 %v432_v4, %v1108_v36  ;;  %v434_v8 = vpop.f32.mrb[6].mxu0  ;;  %764 = vst [vmem:[%s1122_s30 + $0x78] sm:$0xff] %v912_v1  ;;  %v503_v9 = vadd.f32 %v502_v6, %v1108_v36  ;;  %v504_v10 = vpop.f32.mrb[6].mxu1 }
 0x105   : > { %v551_v11 = vmax.f32 %v431_v3, 0.0  ;;  %v435_v12 = vadd.f32 %v434_v8, %v1106_v35  ;;  %v436_v13 = vpop.f32.mrb[7].mxu0  ;;  %v579_v14 = vmax.f32 %v501_v5, 0.0  ;;  %v505_v15 = vadd.f32 %v504_v10, %v1106_v35  ;;  %v506_v16 = vpop.f32.mrb[7].mxu1 }
 0x106   : > { %v552_v17 = vmax.f32 %v433_v7, 0.0  ;;  %v437_v18 = vadd.f32 %v436_v13, %v1108_v36  ;;  %v580_v19 = vmax.f32 %v503_v9, 0.0  ;;  %v507_v20 = vadd.f32 %v506_v16, %v1108_v36 }
 0x107   : > { %v553_v21 = vmax.f32 %v435_v12, 0.0  ;;  %v581_v22 = vmax.f32 %v505_v15, 0.0 }
 0x108   : > { %v899_v23 = vpack.c.bf16 %v552_v17, %v551_v11  ;;  %v554_v24 = vmax.f32 %v437_v18, 0.0  ;;  %v913_v25 = vpack.c.bf16 %v580_v19, %v579_v14  ;;  %v582_v26 = vmax.f32 %v507_v20, 0.0 }
 0x10a   : > { %751 = vst [vmem:[%s1122_s30 + $0x10] sm:$0xff] %v899_v23  ;;  %v900_v27 = vpack.c.bf16 %v554_v24, %v553_v21  ;;  %v440_v28 = vpop.f32.mrb[8].mxu0  ;;  %765 = vst [vmem:[%s1122_s30 + $0x80] sm:$0xff] %v913_v25  ;;  %v914_v29 = vpack.c.bf16 %v582_v26, %v581_v22  ;;  %v510_v30 = vpop.f32.mrb[8].mxu1 }
 0x10b   : > { %v441_v31 = vadd.f32 %v440_v28, %v1106_v35  ;;  %v442_v32 = vpop.f32.mrb[9].mxu0  ;;  %v511_v33 = vadd.f32 %v510_v30, %v1106_v35  ;;  %v512_v34 = vpop.f32.mrb[9].mxu1 }
 0x10c   : > { %752 = vst [vmem:[%s1122_s30 + $0x18] sm:$0xff] %v900_v27  ;;  %v443_v37 = vadd.f32 %v442_v32, %v1108_v36  ;;  %v444_v38 = vpop.f32.mrb[10].mxu0  ;;  %766 = vst [vmem:[%s1122_s30 + $0x88] sm:$0xff] %v914_v29  ;;  %v513_v39 = vadd.f32 %v512_v34, %v1108_v36  ;;  %v514_v40 = vpop.f32.mrb[10].mxu1 }
 0x10d   : > { %v555_v41 = vmax.f32 %v441_v31, 0.0  ;;  %v445_v42 = vadd.f32 %v444_v38, %v1106_v35  ;;  %v446_v43 = vpop.f32.mrb[11].mxu0  ;;  %v583_v44 = vmax.f32 %v511_v33, 0.0  ;;  %v515_v45 = vadd.f32 %v514_v40, %v1106_v35  ;;  %v516_v46 = vpop.f32.mrb[11].mxu1 }
 0x10e   : > { %v556_v47 = vmax.f32 %v443_v37, 0.0  ;;  %v447_v48 = vadd.f32 %v446_v43, %v1108_v36  ;;  %v584_v49 = vmax.f32 %v513_v39, 0.0  ;;  %v517_v50 = vadd.f32 %v516_v46, %v1108_v36 }
 0x10f   : > { %v557_v51 = vmax.f32 %v445_v42, 0.0  ;;  %v585_v52 = vmax.f32 %v515_v45, 0.0 }
 0x110   : > { %v901_v53 = vpack.c.bf16 %v556_v47, %v555_v41  ;;  %v558_v54 = vmax.f32 %v447_v48, 0.0  ;;  %v915_v55 = vpack.c.bf16 %v584_v49, %v583_v44  ;;  %v586_v56 = vmax.f32 %v517_v50, 0.0 }
 0x112   : > { %753 = vst [vmem:[%s1122_s30 + $0x20] sm:$0xff] %v901_v53  ;;  %v902_v57 = vpack.c.bf16 %v558_v54, %v557_v51  ;;  %v450_v58 = vpop.f32.mrb[12].mxu0  ;;  %767 = vst [vmem:[%s1122_s30 + $0x90] sm:$0xff] %v915_v55  ;;  %v916_v59 = vpack.c.bf16 %v586_v56, %v585_v52  ;;  %v520_v60 = vpop.f32.mrb[12].mxu1 }
 0x113   : > { %v451_v61 = vadd.f32 %v450_v58, %v1106_v35  ;;  %v452_v62 = vpop.f32.mrb[13].mxu0  ;;  %v521_v63 = vadd.f32 %v520_v60, %v1106_v35  ;;  %v522_v0 = vpop.f32.mrb[13].mxu1 }
 0x114   : > { %754 = vst [vmem:[%s1122_s30 + $0x28] sm:$0xff] %v902_v57  ;;  %v453_v1 = vadd.f32 %v452_v62, %v1108_v36  ;;  %v454_v2 = vpop.f32.mrb[14].mxu0  ;;  %768 = vst [vmem:[%s1122_s30 + $0x98] sm:$0xff] %v916_v59  ;;  %v523_v3 = vadd.f32 %v522_v0, %v1108_v36  ;;  %v524_v4 = vpop.f32.mrb[14].mxu1 }
 0x115   : > { %v559_v5 = vmax.f32 %v451_v61, 0.0  ;;  %v455_v6 = vadd.f32 %v454_v2, %v1106_v35  ;;  %v456_v7 = vpop.f32.mrb[15].mxu0  ;;  %v587_v8 = vmax.f32 %v521_v63, 0.0  ;;  %v525_v9 = vadd.f32 %v524_v4, %v1106_v35  ;;  %v526_v10 = vpop.f32.mrb[15].mxu1 }
 0x116   : > { %v560_v11 = vmax.f32 %v453_v1, 0.0  ;;  %v457_v12 = vadd.f32 %v456_v7, %v1108_v36  ;;  %v588_v13 = vmax.f32 %v523_v3, 0.0  ;;  %v527_v14 = vadd.f32 %v526_v10, %v1108_v36 }
 0x117   : > { %v561_v15 = vmax.f32 %v455_v6, 0.0  ;;  %v589_v16 = vmax.f32 %v525_v9, 0.0 }
 0x118   : > { %v903_v17 = vpack.c.bf16 %v560_v11, %v559_v5  ;;  %v562_v18 = vmax.f32 %v457_v12, 0.0  ;;  %v917_v19 = vpack.c.bf16 %v588_v13, %v587_v8  ;;  %v590_v20 = vmax.f32 %v527_v14, 0.0 }
 0x11a   : > { %755 = vst [vmem:[%s1122_s30 + $0x30] sm:$0xff] %v903_v17  ;;  %v904_v21 = vpack.c.bf16 %v562_v18, %v561_v15  ;;  %v460_v22 = vpop.f32.mrb[16].mxu0  ;;  %769 = vst [vmem:[%s1122_s30 + $0xa0] sm:$0xff] %v917_v19  ;;  %v918_v23 = vpack.c.bf16 %v590_v20, %v589_v16  ;;  %v530_v24 = vpop.f32.mrb[16].mxu1 }
 0x11b   : > { %v461_v25 = vadd.f32 %v460_v22, %v1106_v35  ;;  %v462_v26 = vpop.f32.mrb[17].mxu0  ;;  %v531_v27 = vadd.f32 %v530_v24, %v1106_v35  ;;  %v532_v28 = vpop.f32.mrb[17].mxu1 }
 0x11c   : > { %756 = vst [vmem:[%s1122_s30 + $0x38] sm:$0xff] %v904_v21  ;;  %v463_v29 = vadd.f32 %v462_v26, %v1108_v36  ;;  %v464_v30 = vpop.f32.mrb[18].mxu0  ;;  %770 = vst [vmem:[%s1122_s30 + $0xa8] sm:$0xff] %v918_v23  ;;  %v533_v31 = vadd.f32 %v532_v28, %v1108_v36  ;;  %v534_v32 = vpop.f32.mrb[18].mxu1 }
 0x11d   : > { %v563_v33 = vmax.f32 %v461_v25, 0.0  ;;  %v465_v34 = vadd.f32 %v464_v30, %v1106_v35  ;;  %v466_v37 = vpop.f32.mrb[19].mxu0  ;;  %v591_v38 = vmax.f32 %v531_v27, 0.0  ;;  %v535_v39 = vadd.f32 %v534_v32, %v1106_v35  ;;  %v536_v40 = vpop.f32.mrb[19].mxu1 }
 0x11e   : > { %v564_v41 = vmax.f32 %v463_v29, 0.0  ;;  %v467_v42 = vadd.f32 %v466_v37, %v1108_v36  ;;  %v592_v43 = vmax.f32 %v533_v31, 0.0  ;;  %v537_v44 = vadd.f32 %v536_v40, %v1108_v36 }
 0x11f   : > { %v565_v45 = vmax.f32 %v465_v34, 0.0  ;;  %v593_v46 = vmax.f32 %v535_v39, 0.0 }
 0x120   : > { %v905_v47 = vpack.c.bf16 %v564_v41, %v563_v33  ;;  %v566_v48 = vmax.f32 %v467_v42, 0.0  ;;  %v919_v49 = vpack.c.bf16 %v592_v43, %v591_v38  ;;  %v594_v50 = vmax.f32 %v537_v44, 0.0 }
 0x122   : > { %757 = vst [vmem:[%s1122_s30 + $0x40] sm:$0xff] %v905_v47  ;;  %v906_v51 = vpack.c.bf16 %v566_v48, %v565_v45  ;;  %v470_v52 = vpop.f32.mrb[20].mxu0  ;;  %771 = vst [vmem:[%s1122_s30 + $0xb0] sm:$0xff] %v919_v49  ;;  %v920_v53 = vpack.c.bf16 %v594_v50, %v593_v46  ;;  %v540_v54 = vpop.f32.mrb[20].mxu1 }
 0x123   : > { %v471_v55 = vadd.f32 %v470_v52, %v1106_v35  ;;  %v472_v56 = vpop.f32.mrb[21].mxu0  ;;  %v541_v57 = vadd.f32 %v540_v54, %v1106_v35  ;;  %v542_v58 = vpop.f32.mrb[21].mxu1 }
 0x124   : > { %758 = vst [vmem:[%s1122_s30 + $0x48] sm:$0xff] %v906_v51  ;;  %v473_v59 = vadd.f32 %v472_v56, %v1108_v36  ;;  %v474_v60 = vpop.f32.mrb[22].mxu0  ;;  %772 = vst [vmem:[%s1122_s30 + $0xb8] sm:$0xff] %v920_v53  ;;  %v543_v61 = vadd.f32 %v542_v58, %v1108_v36  ;;  %v544_v62 = vpop.f32.mrb[22].mxu1 }
 0x125   : > { %v567_v63 = vmax.f32 %v471_v55, 0.0  ;;  %v475_v0 = vadd.f32 %v474_v60, %v1106_v35  ;;  %v476_v1 = vpop.f32.mrb[23].mxu0  ;;  %v595_v2 = vmax.f32 %v541_v57, 0.0  ;;  %v545_v3 = vpop.f32.mrb[23].mxu1 }
 0x126   : > { %v568_v4 = vmax.f32 %v473_v59, 0.0  ;;  %v477_v5 = vadd.f32 %v476_v1, %v1108_v36  ;;  %v596_v6 = vmax.f32 %v543_v61, 0.0 }
 0x127   : > { %v569_v7 = vmax.f32 %v475_v0, 0.0 }
 0x128   : > { %v907_v8 = vpack.c.bf16 %v568_v4, %v567_v63  ;;  %v570_v9 = vmax.f32 %v477_v5, 0.0  ;;  %v921_v10 = vpack.c.bf16 %v596_v6, %v595_v2 }
 0x12a   : > { %759 = vst [vmem:[%s1122_s30 + $0x50] sm:$0xff] %v907_v8  ;;  %v908_v11 = vpack.c.bf16 %v570_v9, %v569_v7  ;;  %v480_v12 = vpop.f32.mrb[24].mxu0  ;;  %773 = vst [vmem:[%s1122_s30 + $0xc0] sm:$0xff] %v921_v10 }
 0x12b   : > { %v481_v13 = vadd.f32 %v480_v12, %v1106_v35  ;;  %v482_v14 = vpop.f32.mrb[25].mxu0 }
 0x12c   : > { %760 = vst [vmem:[%s1122_s30 + $0x58] sm:$0xff] %v908_v11  ;;  %v483_v15 = vadd.f32 %v482_v14, %v1108_v36  ;;  %v484_v16 = vpop.f32.mrb[26].mxu0 }
 0x12d   : > { %v571_v17 = vmax.f32 %v481_v13, 0.0  ;;  %v485_v18 = vadd.f32 %v484_v16, %v1106_v35  ;;  %v486_v19 = vpop.f32.mrb[27].mxu0 }
 0x12e   : > { %v572_v20 = vmax.f32 %v483_v15, 0.0  ;;  %v487_v21 = vadd.f32 %v486_v19, %v1108_v36 }
 0x12f   : > { %v573_v22 = vmax.f32 %v485_v18, 0.0 }
 0x130   : > { %v909_v23 = vpack.c.bf16 %v572_v20, %v571_v17  ;;  %v574_v24 = vmax.f32 %v487_v21, 0.0 }
 0x132   : > { %761 = vst [vmem:[%s1122_s30 + $0x60] sm:$0xff] %v909_v23  ;;  %v910_v25 = vpack.c.bf16 %v574_v24, %v573_v22 }
 0x134   : > { %762 = vst [vmem:[%s1122_s30 + $0x68] sm:$0xff] %v910_v25 }
 0x135 PF: > { %s13_s12 = sadd.s32 1, %s990_s12  }
 0x136   : > { %p10_p4 = scmp.ge.s32.totalorder %s13_s12, 4  }
 0x138   :  { %12 = sbr.rel (!%p10_p4) target bundleno = 1 (0x1), region = 62 }

// kernel: so_forward.7
= control target key start
LH: loop header
LB: loop body
LE: loop exit
PB: predicated region body
PF: predicated region fallthrough
CT: control target
= control target key end

     0   :  { %s4200_s12 = smov 0   ;;  %s5194_s0 = inlined_call_operand.vmem [shape: bf16[112,2304], index: 0, kind: input, shape index: {}]   ;;  %s5195_s1 = inlined_call_operand.vmem [shape: bf16[2304,256], index: 1, kind: input, shape index: {}]   ;;  %s5196_s2 = inlined_call_operand.vmem [shape: f32[1,256], index: 2, kind: input, shape index: {}]   ;;  %s5197_s3 = inlined_call_operand.vmem [shape: bf16[112,256], index: 3, kind: output, shape index: {}]  }
   0x1 LB: > { %s3077_s13 = sadd.s32 4294967295, %s4178_s12   ;;  %p3081_p0 = scmp.ge.s32.totalorder %s4178_s12, 1  ;;  %s4178_s12 = sphi %s4200_s12, %s13_s12  }
   0x2   : > { %p139_p1 = scmp.lt.s32.totalorder %s4178_s12, 3 }
   0x4   : > { %p140_p2 = pnand %p3081_p0, %p139_p1 }
   0x5   : > { %v3641_v0 = vld [vmem:[%s5195_s1 + $0x4] ss:$8 sps:$4 sm:$0xff] (!%p140_p2)   ;;  %v3645_v2 = vld [vmem:[%s5195_s1] ss:$8 sps:$4 sm:$0xff] (!%p140_p2)   ;;  %v3647_v4 = vld [vmem:[%s5195_s1 + $0x14] ss:$8 sps:$4 sm:$0xff] (!%p140_p2)  }
   0x6   : > { %143 = sbr.rel (%p140_p2) target bundleno = 557 (0x22d), region = 32  ;;  %v3643_v1 = vld [vmem:[%s5195_s1 + $0x404] ss:$8 sps:$4 sm:$0xff] (!%p140_p2)   ;;  %2315 = vmatprep.subr.bf16.mxu1 (!%p140_p2), %v3641_v0  ;;  %v3646_v3 = vld [vmem:[%s5195_s1 + $0x400] ss:$8 sps:$4 sm:$0xff] (!%p140_p2)  }
   0x7   : > { %2599 = vmatprep.subr.bf16.mxu0 (!%p140_p2), %v3643_v1  ;;  %2316 = vmatpush1.bf16.msra.mxu1 (!%p140_p2), %v3645_v2  ;;  %v3649_v5 = vld [vmem:[%s5195_s1 + $0x414] ss:$8 sps:$4 sm:$0xff] (!%p140_p2)   ;;  %v3651_v6 = vld [vmem:[%s5195_s1 + $0x10] ss:$8 sps:$4 sm:$0xff] (!%p140_p2)   ;;  %v3653_v8 = vld [vmem:[%s5195_s1 + $0x24] ss:$8 sps:$4 sm:$0xff] (!%p140_p2)  }
   0x8   : > { %2600 = vmatpush1.bf16.msra.mxu0 (!%p140_p2), %v3646_v3  ;;  %2317 = vmatprep.subr.bf16.mxu1 (!%p140_p2), %v3647_v4  ;;  %v3652_v7 = vld [vmem:[%s5195_s1 + $0x410] ss:$8 sps:$4 sm:$0xff] (!%p140_p2)   ;;  %v3655_v9 = vld [vmem:[%s5195_s1 + $0x424] ss:$8 sps:$4 sm:$0xff] (!%p140_p2)   ;;  %v3657_v10 = vld [vmem:[%s5195_s1 + $0x20] ss:$8 sps:$4 sm:$0xff] (!%p140_p2)  }
   0x9   : > { %2601 = vmatprep.subr.bf16.mxu0 (!%p140_p2), %v3649_v5  ;;  %v3658_v11 = vld [vmem:[%s5195_s1 + $0x420] ss:$8 sps:$4 sm:$0xff] (!%p140_p2)   ;;  %v3659_v12 = vld [vmem:[%s5195_s1 + $0x34] ss:$8 sps:$4 sm:$0xff] (!%p140_p2)   ;;  %v3663_v14 = vld [vmem:[%s5195_s1 + $0x30] ss:$8 sps:$4 sm:$0xff] (!%p140_p2)  }
   0xa   : > { %v3661_v13 = vld [vmem:[%s5195_s1 + $0x434] ss:$8 sps:$4 sm:$0xff] (!%p140_p2)   ;;  %v3664_v15 = vld [vmem:[%s5195_s1 + $0x430] ss:$8 sps:$4 sm:$0xff] (!%p140_p2)   ;;  %v3665_v16 = vld [vmem:[%s5195_s1 + $0x44] ss:$8 sps:$4 sm:$0xff] (!%p140_p2)  }
   0xb   : > { %2318 = vmatpush1.bf16.msra.mxu1 (!%p140_p2), %v3651_v6  ;;  %v3667_v17 = vld [vmem:[%s5195_s1 + $0x444] ss:$8 sps:$4 sm:$0xff] (!%p140_p2)   ;;  %v3669_v18 = vld [vmem:[%s5195_s1 + $0x40] ss:$8 sps:$4 sm:$0xff] (!%p140_p2)   ;;  %v3671_v20 = vld [vmem:[%s5195_s1 + $0x54] ss:$8 sps:$4 sm:$0xff] (!%p140_p2)  }
   0xc   : > { %2602 = vmatpush1.bf16.msra.mxu0 (!%p140_p2), %v3652_v7  ;;  %2319 = vmatprep.subr.bf16.mxu1 (!%p140_p2), %v3653_v8  ;;  %v3670_v19 = vld [vmem:[%s5195_s1 + $0x440] ss:$8 sps:$4 sm:$0xff] (!%p140_p2)   ;;  %v3673_v21 = vld [vmem:[%s5195_s1 + $0x454] ss:$8 sps:$4 sm:$0xff] (!%p140_p2)   ;;  %v3675_v22 = vld [vmem:[%s5195_s1 + $0x50] ss:$8 sps:$4 sm:$0xff] (!%p140_p2)  }
   0xd   : > { %2603 = vmatprep.subr.bf16.mxu0 %v3655_v9  ;;  %v3676_v23 = vld [vmem:[%s5195_s1 + $0x450] ss:$8 sps:$4 sm:$0xff]   ;;  %v3677_v24 = vld [vmem:[%s5195_s1 + $0x64] ss:$8 sps:$4 sm:$0xff]   ;;  %v3681_v26 = vld [vmem:[%s5195_s1 + $0x60] ss:$8 sps:$4 sm:$0xff]  }
   0xe   : > { %v3679_v25 = vld [vmem:[%s5195_s1 + $0x464] ss:$8 sps:$4 sm:$0xff]   ;;  %v3682_v27 = vld [vmem:[%s5195_s1 + $0x460] ss:$8 sps:$4 sm:$0xff]   ;;  %v3683_v28 = vld [vmem:[%s5195_s1 + $0x74] ss:$8 sps:$4 sm:$0xff]  }
   0xf   : > { %2320 = vmatpush1.bf16.msra.mxu1 %v3657_v10  ;;  %s165_s22 = smul.u32 7, %s3077_s13  ;;  %v3685_v29 = vld [vmem:[%s5195_s1 + $0x474] ss:$8 sps:$4 sm:$0xff]   ;;  %v3687_v30 = vld [vmem:[%s5195_s1 + $0x70] ss:$8 sps:$4 sm:$0xff]  }
  0x10   : > { %2604 = vmatpush1.bf16.msra.mxu0 %v3658_v11  ;;  %2321 = vmatprep.subr.bf16.mxu1 %v3659_v12  ;;  %v3688_v31 = vld [vmem:[%s5195_s1 + $0x470] ss:$8 sps:$4 sm:$0xff]   ;;  %v3689_v32 = vld [vmem:[%s5195_s1 + $0x84] ss:$8 sps:$4 sm:$0xff]   ;;  %v3693_v34 = vld [vmem:[%s5195_s1 + $0x80] ss:$8 sps:$4 sm:$0xff]  }
  0x11   : > { %2605 = vmatprep.subr.bf16.mxu0 %v3661_v13  ;;  %p166_p3 = scmp.lt.s32.totalorder %s165_s22, 13  ;;  %v3691_v33 = vld [vmem:[%s5195_s1 + $0x484] ss:$8 sps:$4 sm:$0xff]   ;;  %v3694_v35 = vld [vmem:[%s5195_s1 + $0x480] ss:$8 sps:$4 sm:$0xff]  }
  0x12   : > { %v3695_v36 = vld [vmem:[%s5195_s1 + $0x94] ss:$8 sps:$4 sm:$0xff]   ;;  %v3699_v38 = vld [vmem:[%s5195_s1 + $0x90] ss:$8 sps:$4 sm:$0xff]   ;;  %v3701_v40 = vld [vmem:[%s5195_s1 + $0xa4] ss:$8 sps:$4 sm:$0xff]  }
  0x13   : > { %2322 = vmatpush1.bf16.msra.mxu1 %v3663_v14  ;;  %s5199_s22 = smov (!%p166_p3, %s165_s22), 13  ;;  %v3697_v37 = vld [vmem:[%s5195_s1 + $0x494] ss:$8 sps:$4 sm:$0xff]   ;;  %v3700_v39 = vld [vmem:[%s5195_s1 + $0x490] ss:$8 sps:$4 sm:$0xff]  }
  0x14   : > { %2606 = vmatpush1.bf16.msra.mxu0 %v3664_v15  ;;  %2323 = vmatprep.subr.bf16.mxu1 %v3665_v16  ;;  %s3632_s21 = smul.u32 72, %s5199_s22  ;;  %v3703_v41 = vld [vmem:[%s5195_s1 + $0x4a4] ss:$8 sps:$4 sm:$0xff]   ;;  %v3705_v42 = vld [vmem:[%s5195_s1 + $0xa0] ss:$8 sps:$4 sm:$0xff]   ;;  %s3454_s15 = sshll.u32 %s5199_s22, 3 }
  0x15   : > { %2607 = vmatprep.subr.bf16.mxu0 %v3667_v17  ;;  %v3706_v43 = vld [vmem:[%s5195_s1 + $0x4a0] ss:$8 sps:$4 sm:$0xff]   ;;  %v3707_v44 = vld [vmem:[%s5195_s1 + $0xb4] ss:$8 sps:$4 sm:$0xff]   ;;  %v3711_v46 = vld [vmem:[%s5195_s1 + $0xb0] ss:$8 sps:$4 sm:$0xff]   ;;  %s5174_s18 = scalar_lea.vmem %s5197_s3, %s3454_s15 }
  0x16   : > { %s4351_s5 = scalar_lea.vmem %s5194_s0, %s3632_s21  ;;  %v3709_v45 = vld [vmem:[%s5195_s1 + $0x4b4] ss:$8 sps:$4 sm:$0xff]   ;;  %v3712_v47 = vld [vmem:[%s5195_s1 + $0x4b0] ss:$8 sps:$4 sm:$0xff]   ;;  %v3713_v49 = vld [vmem:[%s5195_s1 + $0xc4] ss:$8 sps:$4 sm:$0xff]  }
  0x17   : > { %2324 = vmatpush1.bf16.msra.mxu1 %v3669_v18  ;;  %v3739_v48 = vld [vmem:[%s4351_s5 + $0x4] ss:$72 sps:$4 sm:$0xff]   ;;  %v3717_v52 = vld [vmem:[%s5195_s1 + $0xc0] ss:$8 sps:$4 sm:$0xff]   ;;  %v3719_v54 = vld [vmem:[%s5195_s1 + $0xd4] ss:$8 sps:$4 sm:$0xff]  }
  0x18   : > { %2608 = vmatpush1.bf16.msra.mxu0 %v3670_v19  ;;  %2325 = vmatprep.subr.bf16.mxu1 %v3671_v20  ;;  %v3715_v50 = vld [vmem:[%s5195_s1 + $0x4c4] ss:$8 sps:$4 sm:$0xff]   ;;  %v3718_v53 = vld [vmem:[%s5195_s1 + $0x4c0] ss:$8 sps:$4 sm:$0xff]   ;;  %v3721_v55 = vld [vmem:[%s5195_s1 + $0x4d4] ss:$8 sps:$4 sm:$0xff]  }
  0x19   : > { %2609 = vmatprep.subr.bf16.mxu0 %v3673_v21  ;;  %2347 = vmatprep.mubr.bf16.mxu1 %v3739_v48  ;;  %v3745_v51 = vld [vmem:[%s4351_s5 + $0x24] ss:$72 sps:$4 sm:$0xff]   ;;  %v3723_v56 = vld [vmem:[%s5195_s1 + $0xd0] ss:$8 sps:$4 sm:$0xff]   ;;  %v3729_v60 = vld [vmem:[%s5195_s1 + $0xe0] ss:$8 sps:$4 sm:$0xff]  }
  0x1a   : > { %2631 = vmatprep.mubr.bf16.mxu0 %v3745_v51  ;;  %v3724_v57 = vld [vmem:[%s5195_s1 + $0x4d0] ss:$8 sps:$4 sm:$0xff]   ;;  %v3725_v58 = vld [vmem:[%s5195_s1 + $0xe4] ss:$8 sps:$4 sm:$0xff]   ;;  %v3730_v61 = vld [vmem:[%s5195_s1 + $0x4e0] ss:$8 sps:$4 sm:$0xff]  }
  0x1b   : > { %2326 = vmatpush1.bf16.msra.mxu1 %v3675_v22  ;;  %v3727_v59 = vld [vmem:[%s5195_s1 + $0x4e4] ss:$8 sps:$4 sm:$0xff]   ;;  %v3731_v62 = vld [vmem:[%s5195_s1 + $0xf4] ss:$8 sps:$4 sm:$0xff]   ;;  %v3735_v0 = vld [vmem:[%s5195_s1 + $0xf0] ss:$8 sps:$4 sm:$0xff]  }
  0x1c   : > { %2610 = vmatpush1.bf16.msra.mxu0 %v3676_v23  ;;  %2327 = vmatprep.subr.bf16.mxu1 %v3677_v24  ;;  %v3733_v63 = vld [vmem:[%s5195_s1 + $0x4f4] ss:$8 sps:$4 sm:$0xff]   ;;  %v3736_v1 = vld [vmem:[%s5195_s1 + $0x4f0] ss:$8 sps:$4 sm:$0xff]   ;;  %v3742_v2 = vld [vmem:[%s5195_s1 + $0x104] ss:$8 sps:$4 sm:$0xff]  }
  0x1d   : > { %2611 = vmatprep.subr.bf16.mxu0 %v3679_v25  ;;  %v3748_v3 = vld [vmem:[%s5195_s1 + $0x504] ss:$8 sps:$4 sm:$0xff]   ;;  %v3737_v4 = vld [vmem:[%s4351_s5] ss:$72 sps:$4 sm:$0xff]   ;;  %v3751_v8 = vld [vmem:[%s5195_s1 + $0x114] ss:$8 sps:$4 sm:$0xff]  }
  0x1e   : > { %v3740_v5 = vld [vmem:[%s5195_s1 + $0x100] ss:$8 sps:$4 sm:$0xff]   ;;  %v3754_v9 = vld [vmem:[%s5195_s1 + $0x514] ss:$8 sps:$4 sm:$0xff]   ;;  %v3749_v10 = vld [vmem:[%s5195_s1 + $0x110] ss:$8 sps:$4 sm:$0xff]  }
  0x1f   : > { %2328 = vmatpush1.bf16.msra.mxu1 %v3681_v26  ;;  %v3743_v6 = vld [vmem:[%s4351_s5 + $0x20] ss:$72 sps:$4 sm:$0xff]   ;;  %v3752_v11 = vld [vmem:[%s5195_s1 + $0x510] ss:$8 sps:$4 sm:$0xff]   ;;  %v3757_v12 = vld [vmem:[%s5195_s1 + $0x124] ss:$8 sps:$4 sm:$0xff]  }
  0x20   : > { %2612 = vmatpush1.bf16.msra.mxu0 %v3682_v27  ;;  %2329 = vmatprep.subr.bf16.mxu1 %v3683_v28  ;;  %v3746_v7 = vld [vmem:[%s5195_s1 + $0x500] ss:$8 sps:$4 sm:$0xff]   ;;  %v3760_v13 = vld [vmem:[%s5195_s1 + $0x524] ss:$8 sps:$4 sm:$0xff]   ;;  %v3763_v16 = vld [vmem:[%s5195_s1 + $0x134] ss:$8 sps:$4 sm:$0xff]  }
  0x21   : > { %2613 = vmatprep.subr.bf16.mxu0 %v3685_v29  ;;  %v3755_v14 = vld [vmem:[%s5195_s1 + $0x120] ss:$8 sps:$4 sm:$0xff]   ;;  %v3803_v17 = vld [vmem:[%s4351_s5 + $0x94] ss:$72 sps:$4 sm:$0xff]   ;;  %v3761_v19 = vld [vmem:[%s5195_s1 + $0x130] ss:$8 sps:$4 sm:$0xff]  }
  0x22   : > { %v3758_v15 = vld [vmem:[%s5195_s1 + $0x520] ss:$8 sps:$4 sm:$0xff]   ;;  %v3766_v18 = vld [vmem:[%s5195_s1 + $0x534] ss:$8 sps:$4 sm:$0xff]   ;;  %v3764_v20 = vld [vmem:[%s5195_s1 + $0x530] ss:$8 sps:$4 sm:$0xff]  }
  0x23   : > { %2330 = vmatpush1.bf16.msra.mxu1 %v3687_v30  ;;  %v3808_v21 = vld [vmem:[%s4351_s5 + $0xb4] ss:$72 sps:$4 sm:$0xff]   ;;  %v3769_v22 = vld [vmem:[%s5195_s1 + $0x144] ss:$8 sps:$4 sm:$0xff]   ;;  %v3813_v24 = vld [vmem:[%s4351_s5 + $0x90] ss:$72 sps:$4 sm:$0xff]  }
  0x24   : > { %2614 = vmatpush1.bf16.msra.mxu0 %v3688_v31  ;;  %2331 = vmatprep.subr.bf16.mxu1 %v3689_v32  ;;  %v3772_v23 = vld [vmem:[%s5195_s1 + $0x544] ss:$8 sps:$4 sm:$0xff]   ;;  %v3814_v25 = vld [vmem:[%s4351_s5 + $0xb0] ss:$72 sps:$4 sm:$0xff]   ;;  %v3767_v26 = vld [vmem:[%s5195_s1 + $0x140] ss:$8 sps:$4 sm:$0xff]  }
  0x25   : > { %2615 = vmatprep.subr.bf16.mxu0 %v3691_v33  ;;  %v3770_v27 = vld [vmem:[%s5195_s1 + $0x540] ss:$8 sps:$4 sm:$0xff]   ;;  %v3775_v28 = vld [vmem:[%s5195_s1 + $0x154] ss:$8 sps:$4 sm:$0xff]   ;;  %v3821_v29 = vld [vmem:[%s4351_s5 + $0x124] ss:$72 sps:$4 sm:$0xff]  }
  0x26   : > { %v3778_v30 = vld [vmem:[%s5195_s1 + $0x554] ss:$8 sps:$4 sm:$0xff]   ;;  %v3773_v31 = vld [vmem:[%s5195_s1 + $0x150] ss:$8 sps:$4 sm:$0xff]   ;;  %v3826_v33 = vld [vmem:[%s4351_s5 + $0x144] ss:$72 sps:$4 sm:$0xff]  }
  0x27   : > { %2332 = vmatpush1.bf16.msra.mxu1 %v3693_v34  ;;  %v3776_v32 = vld [vmem:[%s5195_s1 + $0x550] ss:$8 sps:$4 sm:$0xff]   ;;  %v3781_v34 = vld [vmem:[%s5195_s1 + $0x164] ss:$8 sps:$4 sm:$0xff]  }
  0x28   : > { %2616 = vmatpush1.bf16.msra.mxu0 %v3694_v35  ;;  %2333 = vmatprep.subr.bf16.mxu1 %v3695_v36  ;;  %v3784_v35 = vld [vmem:[%s5195_s1 + $0x564] ss:$8 sps:$4 sm:$0xff]   ;;  %v3831_v36 = vld [vmem:[%s4351_s5 + $0x120] ss:$72 sps:$4 sm:$0xff]   ;;  %v3785_v48 = vld [vmem:[%s5195_s1 + $0x170] ss:$8 sps:$4 sm:$0xff]  }
  0x29   : > { %2617 = vmatprep.subr.bf16.mxu0 %v3697_v37  ;;  %v3832_v37 = vld [vmem:[%s4351_s5 + $0x140] ss:$72 sps:$4 sm:$0xff]   ;;  %v3796_v51 = vld [vmem:[%s5195_s1 + $0x584] ss:$8 sps:$4 sm:$0xff]  }
  0x2b   : > { %2334 = vmatpush1.bf16.msra.mxu1 %v3699_v38  ;;  %v3779_v38 = vld [vmem:[%s5195_s1 + $0x160] ss:$8 sps:$4 sm:$0xff]  }
  0x2c   : > { %2618 = vmatpush1.bf16.msra.mxu0 %v3700_v39  ;;  %2335 = vmatprep.subr.bf16.mxu1 %v3701_v40  ;;  %v3782_v39 = vld [vmem:[%s5195_s1 + $0x560] ss:$8 sps:$4 sm:$0xff]   ;;  %v233_v40 = vld [vmem:[%s4351_s5 + $0x1b0] sm:$0xff] }
  0x2d   : > { %2619 = vmatprep.subr.bf16.mxu0 %v3703_v41  ;;  %v3787_v41 = vld [vmem:[%s5195_s1 + $0x174] ss:$8 sps:$4 sm:$0xff]  }
  0x2f   : > { %2336 = vmatpush1.bf16.msra.mxu1 %v3705_v42  ;;  %v3790_v42 = vld [vmem:[%s5195_s1 + $0x574] ss:$8 sps:$4 sm:$0xff]  }
  0x30   : > { %2620 = vmatpush1.bf16.msra.mxu0 %v3706_v43  ;;  %2337 = vmatprep.subr.bf16.mxu1 %v3707_v44  ;;  %v3140_v43 = vcombine.high %v233_v40, %v233_v40  ;;  %v237_v44 = vld [vmem:[%s4351_s5 + $0x1d0] sm:$0xff] }
  0x31   : > { %2621 = vmatprep.subr.bf16.mxu0 %v3709_v45  ;;  %v3148_v45 = vcombine.high %v237_v44, %v237_v44 }
  0x33   : > { %2338 = vmatpush1.bf16.msra.mxu1 %v3711_v46  ;;  %v3139_v46 = vcombine.low %v233_v40, %v233_v40  ;;  %v3939_v40 = vld [vmem:[%s4351_s5 + $0x12c] ss:$72 sps:$4 sm:$0xff]  }
  0x34   : > { %2622 = vmatpush1.bf16.msra.mxu0 %v3712_v47  ;;  %2339 = vmatprep.subr.bf16.mxu1 %v3713_v49  ;;  %v3147_v47 = vcombine.low %v237_v44, %v237_v44  ;;  %v3788_v49 = vld [vmem:[%s5195_s1 + $0x570] ss:$8 sps:$4 sm:$0xff]   ;;  %v3887_v44 = vld [vmem:[%s5195_s1 + $0x244] ss:$8 sps:$4 sm:$0xff]  }
  0x35   : > { %2623 = vmatprep.subr.bf16.mxu0 %v3715_v50  ;;  %v3793_v50 = vld [vmem:[%s5195_s1 + $0x184] ss:$8 sps:$4 sm:$0xff]  }
  0x37   : > { %2340 = vmatpush1.bf16.msra.mxu1 %v3717_v52  ;;  %v3791_v52 = vld [vmem:[%s5195_s1 + $0x180] ss:$8 sps:$4 sm:$0xff]  }
  0x38   : > { %2624 = vmatpush1.bf16.msra.mxu0 %v3718_v53  ;;  %2341 = vmatprep.subr.bf16.mxu1 %v3719_v54  ;;  %v3857_v53 = vld [vmem:[%s4351_s5 + $0xc] ss:$72 sps:$4 sm:$0xff]   ;;  %v3794_v54 = vld [vmem:[%s5195_s1 + $0x580] ss:$8 sps:$4 sm:$0xff]  }
  0x39   : > { %2625 = vmatprep.subr.bf16.mxu0 %v3721_v55  ;;  %v3799_v55 = vld [vmem:[%s5195_s1 + $0x194] ss:$8 sps:$4 sm:$0xff]  }
  0x3b   : > { %2342 = vmatpush1.bf16.msra.mxu1 %v3723_v56  ;;  %v3802_v56 = vld [vmem:[%s5195_s1 + $0x594] ss:$8 sps:$4 sm:$0xff]  }
  0x3c   : > { %2626 = vmatpush1.bf16.msra.mxu0 %v3724_v57  ;;  %2343 = vmatprep.subr.bf16.mxu1 %v3725_v58  ;;  %v3863_v57 = vld [vmem:[%s4351_s5 + $0x2c] ss:$72 sps:$4 sm:$0xff]   ;;  %v3797_v58 = vld [vmem:[%s5195_s1 + $0x190] ss:$8 sps:$4 sm:$0xff]  }
  0x3d   : > { %2627 = vmatprep.subr.bf16.mxu0 %v3727_v59  ;;  %v3800_v59 = vld [vmem:[%s5195_s1 + $0x590] ss:$8 sps:$4 sm:$0xff]  }
  0x3f   : > { %2344 = vmatpush1.bf16.msra.mxu1 %v3729_v60  ;;  %v3807_v60 = vld [vmem:[%s5195_s1 + $0x1a4] ss:$8 sps:$4 sm:$0xff]  }
  0x40   : > { %2628 = vmatpush1.bf16.msra.mxu0 %v3730_v61  ;;  %2345 = vmatprep.subr.bf16.mxu1 %v3731_v62  ;;  %v3812_v61 = vld [vmem:[%s5195_s1 + $0x5a4] ss:$8 sps:$4 sm:$0xff]   ;;  %v3805_v62 = vld [vmem:[%s5195_s1 + $0x1a0] ss:$8 sps:$4 sm:$0xff]  }
  0x41   : > { %2629 = vmatprep.subr.bf16.mxu0 %v3733_v63  ;;  %v3810_v63 = vld [vmem:[%s5195_s1 + $0x5a0] ss:$8 sps:$4 sm:$0xff]  }
  0x43   : > { %2346 = vmatpush1.bf16.msra.mxu1 %v3735_v0  ;;  %v3817_v0 = vld [vmem:[%s5195_s1 + $0x1b4] ss:$8 sps:$4 sm:$0xff]  }
  0x44   : > { %2630 = vmatpush1.bf16.msra.mxu0 %v3736_v1  ;;  %2386 = vmatprep.subr.bf16.mxu1 %v3742_v2  ;;  %v3820_v1 = vld [vmem:[%s5195_s1 + $0x5b4] ss:$8 sps:$4 sm:$0xff]   ;;  %v3815_v2 = vld [vmem:[%s5195_s1 + $0x1b0] ss:$8 sps:$4 sm:$0xff]  }
  0x45   : > { %2670 = vmatprep.subr.bf16.mxu0 %v3748_v3  ;;  %v3818_v3 = vld [vmem:[%s5195_s1 + $0x5b0] ss:$8 sps:$4 sm:$0xff]  }
  0x46   : > { %2348 = vmatmul.mubr.bf16.vlgmr.msra.gmra.mrb[0].mxu1 %v3737_v4  ;;  %v3825_v4 = vld [vmem:[%s5195_s1 + $0x1c4] ss:$8 sps:$4 sm:$0xff]  }
  0x47   : > { %2632 = vmatmul.mubr.bf16.vlgmr.msra.gmra.mrb[0].mxu0 %v3743_v6  ;;  %2387 = vmatpush1.bf16.msra.mxu1 %v3740_v5  ;;  %v3830_v5 = vld [vmem:[%s5195_s1 + $0x5c4] ss:$8 sps:$4 sm:$0xff]   ;;  %v3823_v6 = vld [vmem:[%s5195_s1 + $0x1c0] ss:$8 sps:$4 sm:$0xff]  }
  0x48   : > { %2671 = vmatpush1.bf16.msra.mxu0 %v3746_v7  ;;  %2388 = vmatprep.subr.bf16.mxu1 %v3751_v8  ;;  %v3828_v7 = vld [vmem:[%s5195_s1 + $0x5c0] ss:$8 sps:$4 sm:$0xff]   ;;  %v3835_v8 = vld [vmem:[%s5195_s1 + $0x1d4] ss:$8 sps:$4 sm:$0xff]  }
  0x49   : > { %2672 = vmatprep.subr.bf16.mxu0 %v3754_v9  ;;  %2357 = vmatprep.mubr.bf16.mxu1 %v3803_v17  ;;  %v3838_v9 = vld [vmem:[%s5195_s1 + $0x5d4] ss:$8 sps:$4 sm:$0xff]  }
  0x4a   : > { %2641 = vmatprep.mubr.bf16.mxu0 %v3808_v21  ;;  %v3854_v17 = vld [vmem:[%s5195_s1 + $0x5f4] ss:$8 sps:$4 sm:$0xff]   ;;  %v3866_v21 = vld [vmem:[%s5195_s1 + $0x604] ss:$8 sps:$4 sm:$0xff]  }
  0x4b   : > { %2389 = vmatpush1.bf16.msra.mxu1 %v3749_v10  ;;  %v3833_v10 = vld [vmem:[%s5195_s1 + $0x1d0] ss:$8 sps:$4 sm:$0xff]  }
  0x4c   : > { %2673 = vmatpush1.bf16.msra.mxu0 %v3752_v11  ;;  %2390 = vmatprep.subr.bf16.mxu1 %v3757_v12  ;;  %v3836_v11 = vld [vmem:[%s5195_s1 + $0x5d0] ss:$8 sps:$4 sm:$0xff]   ;;  %v3842_v12 = vld [vmem:[%s5195_s1 + $0x1e4] ss:$8 sps:$4 sm:$0xff]  }
  0x4d   : > { %2674 = vmatprep.subr.bf16.mxu0 %v3760_v13  ;;  %v3846_v13 = vld [vmem:[%s5195_s1 + $0x5e4] ss:$8 sps:$4 sm:$0xff]  }
  0x4e   : > { %2358 = vmatmul.mubr.bf16.gmra.mrb[4].mxu1 %v3813_v24  ;;  %v3861_v24 = vld [vmem:[%s4351_s5 + $0x28] ss:$72 sps:$4 sm:$0xff]  }
  0x4f   : > { %2391 = vmatpush1.bf16.msra.mxu1 %v3755_v14  ;;  %2642 = vmatmul.mubr.bf16.gmra.mrb[4].mxu0 %v3814_v25  ;;  %v3840_v14 = vld [vmem:[%s5195_s1 + $0x1e0] ss:$8 sps:$4 sm:$0xff]  }
  0x50   : > { %2675 = vmatpush1.bf16.msra.mxu0 %v3758_v15  ;;  %2392 = vmatprep.subr.bf16.mxu1 %v3763_v16  ;;  %v3844_v15 = vld [vmem:[%s5195_s1 + $0x5e0] ss:$8 sps:$4 sm:$0xff]   ;;  %v3851_v16 = vld [vmem:[%s5195_s1 + $0x1f4] ss:$8 sps:$4 sm:$0xff]  }
  0x51   : > { %2676 = vmatprep.subr.bf16.mxu0 %v3766_v18  ;;  %2367 = vmatprep.mubr.bf16.mxu1 %v3821_v29  ;;  %v3849_v18 = vld [vmem:[%s5195_s1 + $0x1f0] ss:$8 sps:$4 sm:$0xff]   ;;  %v3864_v25 = vld [vmem:[%s5195_s1 + $0x600] ss:$8 sps:$4 sm:$0xff]   ;;  %v3926_v29 = vld [vmem:[%s4351_s5 + $0xbc] ss:$72 sps:$4 sm:$0xff]  }
  0x52   : > { %2651 = vmatprep.mubr.bf16.mxu0 %v3826_v33  ;;  %v3878_v33 = vld [vmem:[%s5195_s1 + $0x624] ss:$8 sps:$4 sm:$0xff]  }
  0x53   : > { %2393 = vmatpush1.bf16.msra.mxu1 %v3761_v19  ;;  %v3852_v19 = vld [vmem:[%s5195_s1 + $0x5f0] ss:$8 sps:$4 sm:$0xff]  }
  0x54   : > { %2677 = vmatpush1.bf16.msra.mxu0 %v3764_v20  ;;  %2394 = vmatprep.subr.bf16.mxu1 %v3769_v22  ;;  %v3860_v20 = vld [vmem:[%s5195_s1 + $0x204] ss:$8 sps:$4 sm:$0xff]   ;;  %v3855_v22 = vld [vmem:[%s4351_s5 + $0x8] ss:$72 sps:$4 sm:$0xff]  }
  0x55   : > { %2678 = vmatprep.subr.bf16.mxu0 %v3772_v23  ;;  %v3858_v23 = vld [vmem:[%s5195_s1 + $0x200] ss:$8 sps:$4 sm:$0xff]  }
  0x56   : > { %2368 = vmatmul.mubr.bf16.gmra.mrb[8].mxu1 %v3831_v36  ;;  %v3932_v36 = vld [vmem:[%s4351_s5 + $0xb8] ss:$72 sps:$4 sm:$0xff]  }
  0x57   : > { %2395 = vmatpush1.bf16.msra.mxu1 %v3767_v26  ;;  %2652 = vmatmul.mubr.bf16.gmra.mrb[8].mxu0 %v3832_v37  ;;  %v3869_v26 = vld [vmem:[%s5195_s1 + $0x214] ss:$8 sps:$4 sm:$0xff]   ;;  %v3876_v37 = vld [vmem:[%s5195_s1 + $0x620] ss:$8 sps:$4 sm:$0xff]  }
  0x58   : > { %2679 = vmatpush1.bf16.msra.mxu0 %v3770_v27  ;;  %2396 = vmatprep.subr.bf16.mxu1 %v3775_v28  ;;  %v3872_v27 = vld [vmem:[%s5195_s1 + $0x614] ss:$8 sps:$4 sm:$0xff]  }
  0x59   : > { %2680 = vmatprep.subr.bf16.mxu0 %v3778_v30  ;;  %2377 = vmatprep.mubr.bf16.mxu1 %v3140_v43  ;;  %v3921_v28 = vld [vmem:[%s4351_s5 + $0x9c] ss:$72 sps:$4 sm:$0xff]   ;;  %v3867_v30 = vld [vmem:[%s5195_s1 + $0x210] ss:$8 sps:$4 sm:$0xff]  }
  0x5a   : > { %2661 = vmatprep.mubr.bf16.mxu0 %v3148_v45  ;;  %v3882_v43 = vld [vmem:[%s5195_s1 + $0x630] ss:$8 sps:$4 sm:$0xff]   ;;  %v3890_v45 = vld [vmem:[%s5195_s1 + $0x644] ss:$8 sps:$4 sm:$0xff]  }
  0x5b   : > { %2397 = vmatpush1.bf16.msra.mxu1 %v3773_v31  ;;  %v3870_v31 = vld [vmem:[%s5195_s1 + $0x610] ss:$8 sps:$4 sm:$0xff]  }
  0x5c   : > { %2681 = vmatpush1.bf16.msra.mxu0 %v3776_v32  ;;  %2398 = vmatprep.subr.bf16.mxu1 %v3781_v34  ;;  %v3875_v32 = vld [vmem:[%s5195_s1 + $0x224] ss:$8 sps:$4 sm:$0xff]   ;;  %v3873_v34 = vld [vmem:[%s5195_s1 + $0x220] ss:$8 sps:$4 sm:$0xff]  }
  0x5d   : > { %2682 = vmatprep.subr.bf16.mxu0 %v3784_v35  ;;  %v3931_v35 = vld [vmem:[%s4351_s5 + $0x98] ss:$72 sps:$4 sm:$0xff]  }
  0x5e   : > { %2378 = vmatmul.mubr.bf16.gmra.mrb[12].mxu1 %v3139_v46  ;;  %v3885_v46 = vld [vmem:[%s5195_s1 + $0x240] ss:$8 sps:$4 sm:$0xff]  }
  0x5f   : > { %2399 = vmatpush1.bf16.msra.mxu1 %v3779_v38  ;;  %2662 = vmatmul.mubr.bf16.gmra.mrb[12].mxu0 %v3147_v47  ;;  %v3881_v38 = vld [vmem:[%s5195_s1 + $0x234] ss:$8 sps:$4 sm:$0xff]   ;;  %v3888_v47 = vld [vmem:[%s5195_s1 + $0x640] ss:$8 sps:$4 sm:$0xff]  }
  0x60   : > { %2683 = vmatpush1.bf16.msra.mxu0 %v3782_v39  ;;  %2400 = vmatprep.subr.bf16.mxu1 %v3787_v41  ;;  %v3884_v39 = vld [vmem:[%s5195_s1 + $0x634] ss:$8 sps:$4 sm:$0xff]  }
  0x61   : > { %2684 = vmatprep.subr.bf16.mxu0 %v3790_v42  ;;  %2418 = vmatprep.mubr.bf16.mxu1 %v3857_v53  ;;  %v3944_v41 = vld [vmem:[%s4351_s5 + $0x14c] ss:$72 sps:$4 sm:$0xff]   ;;  %v3879_v42 = vld [vmem:[%s5195_s1 + $0x230] ss:$8 sps:$4 sm:$0xff]  }
  0x62   : > { %2702 = vmatprep.mubr.bf16.mxu0 %v3863_v57  ;;  %v3896_v53 = vld [vmem:[%s5195_s1 + $0x654] ss:$8 sps:$4 sm:$0xff]   ;;  %v3894_v57 = vld [vmem:[%s5195_s1 + $0x650] ss:$8 sps:$4 sm:$0xff]  }
  0x63   : > { %2401 = vmatpush1.bf16.msra.mxu1 %v3785_v48  ;;  %v3949_v48 = vld [vmem:[%s4351_s5 + $0x128] ss:$72 sps:$4 sm:$0xff]  }
  0x64   : > { %2685 = vmatpush1.bf16.msra.mxu0 %v3788_v49  ;;  %2402 = vmatprep.subr.bf16.mxu1 %v3793_v50  ;;  %v3950_v49 = vld [vmem:[%s4351_s5 + $0x148] ss:$72 sps:$4 sm:$0xff]   ;;  %v234_v50 = vld [vmem:[%s4351_s5 + $0x1b8] sm:$0xff] }
  0x65   : > { %2686 = vmatprep.subr.bf16.mxu0 %v3796_v51  ;;  %v238_v51 = vld [vmem:[%s4351_s5 + $0x1d8] sm:$0xff] }
  0x67   : > { %2403 = vmatpush1.bf16.msra.mxu1 %v3791_v52  ;;  %v3893_v52 = vld [vmem:[%s5195_s1 + $0x254] ss:$8 sps:$4 sm:$0xff]  }
  0x68   : > { %2687 = vmatpush1.bf16.msra.mxu0 %v3794_v54  ;;  %2404 = vmatprep.subr.bf16.mxu1 %v3799_v55  ;;  %v3142_v54 = vcombine.high %v234_v50, %v234_v50  ;;  %v3150_v55 = vcombine.high %v238_v51, %v238_v51 }
  0x69   : > { %2688 = vmatprep.subr.bf16.mxu0 %v3802_v56  ;;  %v3891_v56 = vld [vmem:[%s5195_s1 + $0x250] ss:$8 sps:$4 sm:$0xff]  }
  0x6b   : > { %2405 = vmatpush1.bf16.msra.mxu1 %v3797_v58  ;;  %v3899_v58 = vld [vmem:[%s5195_s1 + $0x264] ss:$8 sps:$4 sm:$0xff]  }
  0x6c   : > { %2689 = vmatpush1.bf16.msra.mxu0 %v3800_v59  ;;  %2406 = vmatprep.subr.bf16.mxu1 %v3807_v60  ;;  %v3902_v59 = vld [vmem:[%s5195_s1 + $0x664] ss:$8 sps:$4 sm:$0xff]   ;;  %v3897_v60 = vld [vmem:[%s5195_s1 + $0x260] ss:$8 sps:$4 sm:$0xff]  }
  0x6d   : > { %2690 = vmatprep.subr.bf16.mxu0 %v3812_v61  ;;  %v3900_v61 = vld [vmem:[%s5195_s1 + $0x660] ss:$8 sps:$4 sm:$0xff]  }
  0x6f   : > { %2407 = vmatpush1.bf16.msra.mxu1 %v3805_v62  ;;  %v3141_v62 = vcombine.low %v234_v50, %v234_v50  ;;  %v3993_v50 = vld [vmem:[%s5195_s1 + $0x324] ss:$8 sps:$4 sm:$0xff]  }
  0x70   : > { %2691 = vmatpush1.bf16.msra.mxu0 %v3810_v63  ;;  %2408 = vmatprep.subr.bf16.mxu1 %v3817_v0  ;;  %v3149_v63 = vcombine.low %v238_v51, %v238_v51  ;;  %v3905_v0 = vld [vmem:[%s5195_s1 + $0x274] ss:$8 sps:$4 sm:$0xff]   ;;  %v3996_v51 = vld [vmem:[%s5195_s1 + $0x724] ss:$8 sps:$4 sm:$0xff]  }
  0x71   : > { %2692 = vmatprep.subr.bf16.mxu0 %v3820_v1  ;;  %v3908_v1 = vld [vmem:[%s5195_s1 + $0x674] ss:$8 sps:$4 sm:$0xff]  }
  0x73   : > { %2409 = vmatpush1.bf16.msra.mxu1 %v3815_v2  ;;  %v3975_v2 = vld [vmem:[%s4351_s5 + $0x14] ss:$72 sps:$4 sm:$0xff]  }
  0x74   : > { %2693 = vmatpush1.bf16.msra.mxu0 %v3818_v3  ;;  %2410 = vmatprep.subr.bf16.mxu1 %v3825_v4  ;;  %v3981_v3 = vld [vmem:[%s4351_s5 + $0x34] ss:$72 sps:$4 sm:$0xff]   ;;  %v3903_v4 = vld [vmem:[%s5195_s1 + $0x270] ss:$8 sps:$4 sm:$0xff]  }
  0x75   : > { %2694 = vmatprep.subr.bf16.mxu0 %v3830_v5  ;;  %v3906_v5 = vld [vmem:[%s5195_s1 + $0x670] ss:$8 sps:$4 sm:$0xff]  }
  0x77   : > { %2411 = vmatpush1.bf16.msra.mxu1 %v3823_v6  ;;  %v3911_v6 = vld [vmem:[%s5195_s1 + $0x284] ss:$8 sps:$4 sm:$0xff]  }
  0x78   : > { %2695 = vmatpush1.bf16.msra.mxu0 %v3828_v7  ;;  %2412 = vmatprep.subr.bf16.mxu1 %v3835_v8  ;;  %v3914_v7 = vld [vmem:[%s5195_s1 + $0x684] ss:$8 sps:$4 sm:$0xff]   ;;  %v3909_v8 = vld [vmem:[%s5195_s1 + $0x280] ss:$8 sps:$4 sm:$0xff]  }
  0x79   : > { %2696 = vmatprep.subr.bf16.mxu0 %v3838_v9  ;;  %v3912_v9 = vld [vmem:[%s5195_s1 + $0x680] ss:$8 sps:$4 sm:$0xff]  }
  0x7b   : > { %2413 = vmatpush1.bf16.msra.mxu1 %v3833_v10  ;;  %v3917_v10 = vld [vmem:[%s5195_s1 + $0x294] ss:$8 sps:$4 sm:$0xff]  }
  0x7c   : > { %2697 = vmatpush1.bf16.msra.mxu0 %v3836_v11  ;;  %2414 = vmatprep.subr.bf16.mxu1 %v3842_v12  ;;  %v3920_v11 = vld [vmem:[%s5195_s1 + $0x694] ss:$8 sps:$4 sm:$0xff]   ;;  %v3915_v12 = vld [vmem:[%s5195_s1 + $0x290] ss:$8 sps:$4 sm:$0xff]  }
  0x7d   : > { %2698 = vmatprep.subr.bf16.mxu0 %v3846_v13  ;;  %v3918_v13 = vld [vmem:[%s5195_s1 + $0x690] ss:$8 sps:$4 sm:$0xff]  }
  0x7f   : > { %2415 = vmatpush1.bf16.msra.mxu1 %v3840_v14  ;;  %v3925_v14 = vld [vmem:[%s5195_s1 + $0x2a4] ss:$8 sps:$4 sm:$0xff]  }
  0x80   : > { %2699 = vmatpush1.bf16.msra.mxu0 %v3844_v15  ;;  %2416 = vmatprep.subr.bf16.mxu1 %v3851_v16  ;;  %v3930_v15 = vld [vmem:[%s5195_s1 + $0x6a4] ss:$8 sps:$4 sm:$0xff]   ;;  %v3923_v16 = vld [vmem:[%s5195_s1 + $0x2a0] ss:$8 sps:$4 sm:$0xff]  }
  0x81   : > { %2700 = vmatprep.subr.bf16.mxu0 %v3854_v17  ;;  %v3928_v17 = vld [vmem:[%s5195_s1 + $0x6a0] ss:$8 sps:$4 sm:$0xff]  }
  0x83   : > { %2417 = vmatpush1.bf16.msra.mxu1 %v3849_v18  ;;  %v3935_v18 = vld [vmem:[%s5195_s1 + $0x2b4] ss:$8 sps:$4 sm:$0xff]  }
  0x84   : > { %2701 = vmatpush1.bf16.msra.mxu0 %v3852_v19  ;;  %2457 = vmatprep.subr.bf16.mxu1 %v3860_v20  ;;  %v3938_v19 = vld [vmem:[%s5195_s1 + $0x6b4] ss:$8 sps:$4 sm:$0xff]   ;;  %v3933_v20 = vld [vmem:[%s5195_s1 + $0x2b0] ss:$8 sps:$4 sm:$0xff]  }
  0x85   : > { %2741 = vmatprep.subr.bf16.mxu0 %v3866_v21  ;;  %v3936_v21 = vld [vmem:[%s5195_s1 + $0x6b0] ss:$8 sps:$4 sm:$0xff]  }
  0x86   : > { %2419 = vmatmul.mubr.bf16.vlgmr.msra.gmra.mrb[0].mxu1 %v3855_v22  ;;  %v3943_v22 = vld [vmem:[%s5195_s1 + $0x2c4] ss:$8 sps:$4 sm:$0xff]  }
  0x87   : > { %2703 = vmatmul.mubr.bf16.vlgmr.msra.gmra.mrb[0].mxu0 %v3861_v24  ;;  %2458 = vmatpush1.bf16.msra.mxu1 %v3858_v23  ;;  %v3948_v23 = vld [vmem:[%s5195_s1 + $0x6c4] ss:$8 sps:$4 sm:$0xff]   ;;  %v3941_v24 = vld [vmem:[%s5195_s1 + $0x2c0] ss:$8 sps:$4 sm:$0xff]  }
  0x88   : > { %2742 = vmatpush1.bf16.msra.mxu0 %v3864_v25  ;;  %2459 = vmatprep.subr.bf16.mxu1 %v3869_v26  ;;  %v3946_v25 = vld [vmem:[%s5195_s1 + $0x6c0] ss:$8 sps:$4 sm:$0xff]   ;;  %v3953_v26 = vld [vmem:[%s5195_s1 + $0x2d4] ss:$8 sps:$4 sm:$0xff]  }
  0x89   : > { %2743 = vmatprep.subr.bf16.mxu0 %v3872_v27  ;;  %2428 = vmatprep.mubr.bf16.mxu1 %v3921_v28  ;;  %v3956_v27 = vld [vmem:[%s5195_s1 + $0x6d4] ss:$8 sps:$4 sm:$0xff]   ;;  %v3951_v28 = vld [vmem:[%s5195_s1 + $0x2d0] ss:$8 sps:$4 sm:$0xff]  }
  0x8a   : > { %2712 = vmatprep.mubr.bf16.mxu0 %v3926_v29  ;;  %v3954_v29 = vld [vmem:[%s5195_s1 + $0x6d0] ss:$8 sps:$4 sm:$0xff]  }
  0x8b   : > { %2460 = vmatpush1.bf16.msra.mxu1 %v3867_v30  ;;  %v3960_v30 = vld [vmem:[%s5195_s1 + $0x2e4] ss:$8 sps:$4 sm:$0xff]  }
  0x8c   : > { %2744 = vmatpush1.bf16.msra.mxu0 %v3870_v31  ;;  %2461 = vmatprep.subr.bf16.mxu1 %v3875_v32  ;;  %v3964_v31 = vld [vmem:[%s5195_s1 + $0x6e4] ss:$8 sps:$4 sm:$0xff]   ;;  %v3958_v32 = vld [vmem:[%s5195_s1 + $0x2e0] ss:$8 sps:$4 sm:$0xff]  }
  0x8d   : > { %2745 = vmatprep.subr.bf16.mxu0 %v3878_v33  ;;  %v3962_v33 = vld [vmem:[%s5195_s1 + $0x6e0] ss:$8 sps:$4 sm:$0xff]  }
  0x8e   : > { %2429 = vmatmul.mubr.bf16.gmra.mrb[4].mxu1 %v3931_v35  ;;  %v3972_v35 = vld [vmem:[%s5195_s1 + $0x6f4] ss:$8 sps:$4 sm:$0xff]  }
  0x8f   : > { %2713 = vmatmul.mubr.bf16.gmra.mrb[4].mxu0 %v3932_v36  ;;  %2462 = vmatpush1.bf16.msra.mxu1 %v3873_v34  ;;  %v3969_v34 = vld [vmem:[%s5195_s1 + $0x2f4] ss:$8 sps:$4 sm:$0xff]   ;;  %v3967_v36 = vld [vmem:[%s5195_s1 + $0x2f0] ss:$8 sps:$4 sm:$0xff]  }
  0x90   : > { %2746 = vmatpush1.bf16.msra.mxu0 %v3876_v37  ;;  %2463 = vmatprep.subr.bf16.mxu1 %v3881_v38  ;;  %v3970_v37 = vld [vmem:[%s5195_s1 + $0x6f0] ss:$8 sps:$4 sm:$0xff]   ;;  %v3978_v38 = vld [vmem:[%s5195_s1 + $0x304] ss:$8 sps:$4 sm:$0xff]  }
  0x91   : > { %2747 = vmatprep.subr.bf16.mxu0 %v3884_v39  ;;  %2438 = vmatprep.mubr.bf16.mxu1 %v3939_v40  ;;  %v3984_v39 = vld [vmem:[%s5195_s1 + $0x704] ss:$8 sps:$4 sm:$0xff]   ;;  %v3973_v40 = vld [vmem:[%s4351_s5 + $0x10] ss:$72 sps:$4 sm:$0xff]  }
  0x92   : > { %2722 = vmatprep.mubr.bf16.mxu0 %v3944_v41  ;;  %v3976_v41 = vld [vmem:[%s5195_s1 + $0x300] ss:$8 sps:$4 sm:$0xff]  }
  0x93   : > { %2464 = vmatpush1.bf16.msra.mxu1 %v3879_v42  ;;  %v3979_v42 = vld [vmem:[%s4351_s5 + $0x30] ss:$72 sps:$4 sm:$0xff]  }
  0x94   : > { %2748 = vmatpush1.bf16.msra.mxu0 %v3882_v43  ;;  %2465 = vmatprep.subr.bf16.mxu1 %v3887_v44  ;;  %v3982_v43 = vld [vmem:[%s5195_s1 + $0x700] ss:$8 sps:$4 sm:$0xff]   ;;  %v3987_v44 = vld [vmem:[%s5195_s1 + $0x314] ss:$8 sps:$4 sm:$0xff]  }
  0x95   : > { %2749 = vmatprep.subr.bf16.mxu0 %v3890_v45  ;;  %v3990_v45 = vld [vmem:[%s5195_s1 + $0x714] ss:$8 sps:$4 sm:$0xff]  }
  0x96   : > { %2439 = vmatmul.mubr.bf16.gmra.mrb[8].mxu1 %v3949_v48  ;;  %v3985_v48 = vld [vmem:[%s5195_s1 + $0x310] ss:$8 sps:$4 sm:$0xff]  }
  0x97   : > { %2723 = vmatmul.mubr.bf16.gmra.mrb[8].mxu0 %v3950_v49  ;;  %2466 = vmatpush1.bf16.msra.mxu1 %v3885_v46  ;;  %v4039_v46 = vld [vmem:[%s4351_s5 + $0xa4] ss:$72 sps:$4 sm:$0xff]   ;;  %v3988_v49 = vld [vmem:[%s5195_s1 + $0x710] ss:$8 sps:$4 sm:$0xff]  }
  0x98   : > { %2750 = vmatpush1.bf16.msra.mxu0 %v3888_v47  ;;  %2467 = vmatprep.subr.bf16.mxu1 %v3893_v52  ;;  %v4041_v47 = vld [vmem:[%s4351_s5 + $0xc4] ss:$72 sps:$4 sm:$0xff]   ;;  %v3991_v52 = vld [vmem:[%s5195_s1 + $0x320] ss:$8 sps:$4 sm:$0xff]  }
  0x99   : > { %2751 = vmatprep.subr.bf16.mxu0 %v3896_v53  ;;  %2448 = vmatprep.mubr.bf16.mxu1 %v3142_v54  ;;  %v4043_v53 = vld [vmem:[%s4351_s5 + $0xa0] ss:$72 sps:$4 sm:$0xff]  }
  0x9a   : > { %2732 = vmatprep.mubr.bf16.mxu0 %v3150_v55  ;;  %v4047_v54 = vld [vmem:[%s4351_s5 + $0xc0] ss:$72 sps:$4 sm:$0xff]  }
  0x9b   : > { %2468 = vmatpush1.bf16.msra.mxu1 %v3891_v56  ;;  %v3994_v55 = vld [vmem:[%s5195_s1 + $0x720] ss:$8 sps:$4 sm:$0xff]   ;;  %v3999_v56 = vld [vmem:[%s5195_s1 + $0x334] ss:$8 sps:$4 sm:$0xff]  }
  0x9c   : > { %2752 = vmatpush1.bf16.msra.mxu0 %v3894_v57  ;;  %2469 = vmatprep.subr.bf16.mxu1 %v3899_v58  ;;  %v4002_v57 = vld [vmem:[%s5195_s1 + $0x734] ss:$8 sps:$4 sm:$0xff]  }
  0x9d   : > { %2753 = vmatprep.subr.bf16.mxu0 %v3902_v59  ;;  %v4057_v58 = vld [vmem:[%s4351_s5 + $0x134] ss:$72 sps:$4 sm:$0xff]   ;;  %v3997_v59 = vld [vmem:[%s5195_s1 + $0x330] ss:$8 sps:$4 sm:$0xff]  }
  0x9e   : > { %2449 = vmatmul.mubr.bf16.gmra.mrb[12].mxu1 %v3141_v62  ;;  %v4005_v62 = vld [vmem:[%s5195_s1 + $0x344] ss:$8 sps:$4 sm:$0xff]  }
  0x9f   : > { %2733 = vmatmul.mubr.bf16.gmra.mrb[12].mxu0 %v3149_v63  ;;  %2470 = vmatpush1.bf16.msra.mxu1 %v3897_v60  ;;  %v4059_v60 = vld [vmem:[%s4351_s5 + $0x154] ss:$72 sps:$4 sm:$0xff]   ;;  %v4008_v63 = vld [vmem:[%s5195_s1 + $0x744] ss:$8 sps:$4 sm:$0xff]  }
  0xa0   : > { %2754 = vmatpush1.bf16.msra.mxu0 %v3900_v61  ;;  %2471 = vmatprep.subr.bf16.mxu1 %v3905_v0  ;;  %v4000_v61 = vld [vmem:[%s5195_s1 + $0x730] ss:$8 sps:$4 sm:$0xff]  }
  0xa1   : > { %2755 = vmatprep.subr.bf16.mxu0 %v3908_v1  ;;  %2489 = vmatprep.mubr.bf16.mxu1 %v3975_v2  ;;  %v4061_v0 = vld [vmem:[%s4351_s5 + $0x130] ss:$72 sps:$4 sm:$0xff]   ;;  %v4003_v2 = vld [vmem:[%s5195_s1 + $0x340] ss:$8 sps:$4 sm:$0xff]  }
  0xa2   : > { %2773 = vmatprep.mubr.bf16.mxu0 %v3981_v3  ;;  %v4065_v1 = vld [vmem:[%s4351_s5 + $0x150] ss:$72 sps:$4 sm:$0xff]   ;;  %v235_v3 = vld [vmem:[%s4351_s5 + $0x1c0] sm:$0xff] }
  0xa3   : > { %2472 = vmatpush1.bf16.msra.mxu1 %v3903_v4  ;;  %v239_v4 = vld [vmem:[%s4351_s5 + $0x1e0] sm:$0xff] }
  0xa4   : > { %2756 = vmatpush1.bf16.msra.mxu0 %v3906_v5  ;;  %2473 = vmatprep.subr.bf16.mxu1 %v3911_v6  ;;  %v4006_v5 = vld [vmem:[%s5195_s1 + $0x740] ss:$8 sps:$4 sm:$0xff]   ;;  %v4011_v6 = vld [vmem:[%s5195_s1 + $0x354] ss:$8 sps:$4 sm:$0xff]  }
  0xa5   : > { %2757 = vmatprep.subr.bf16.mxu0 %v3914_v7  ;;  %v4014_v7 = vld [vmem:[%s5195_s1 + $0x754] ss:$8 sps:$4 sm:$0xff]  }
  0xa7   : > { %2474 = vmatpush1.bf16.msra.mxu1 %v3909_v8  ;;  %v3144_v8 = vcombine.high %v235_v3, %v235_v3 }
  0xa8   : > { %2758 = vmatpush1.bf16.msra.mxu0 %v3912_v9  ;;  %2475 = vmatprep.subr.bf16.mxu1 %v3917_v10  ;;  %v3152_v9 = vcombine.high %v239_v4, %v239_v4  ;;  %v4009_v10 = vld [vmem:[%s5195_s1 + $0x350] ss:$8 sps:$4 sm:$0xff]  }
  0xa9   : > { %2759 = vmatprep.subr.bf16.mxu0 %v3920_v11  ;;  %v4012_v11 = vld [vmem:[%s5195_s1 + $0x750] ss:$8 sps:$4 sm:$0xff]  }
  0xab   : > { %2476 = vmatpush1.bf16.msra.mxu1 %v3915_v12  ;;  %v4017_v12 = vld [vmem:[%s5195_s1 + $0x364] ss:$8 sps:$4 sm:$0xff]  }
  0xac   : > { %2760 = vmatpush1.bf16.msra.mxu0 %v3918_v13  ;;  %2477 = vmatprep.subr.bf16.mxu1 %v3925_v14  ;;  %v4020_v13 = vld [vmem:[%s5195_s1 + $0x764] ss:$8 sps:$4 sm:$0xff]   ;;  %v4015_v14 = vld [vmem:[%s5195_s1 + $0x360] ss:$8 sps:$4 sm:$0xff]  }
  0xad   : > { %2761 = vmatprep.subr.bf16.mxu0 %v3930_v15  ;;  %v4018_v15 = vld [vmem:[%s5195_s1 + $0x760] ss:$8 sps:$4 sm:$0xff]  }
  0xaf   : > { %2478 = vmatpush1.bf16.msra.mxu1 %v3923_v16  ;;  %v3143_v16 = vcombine.low %v235_v3, %v235_v3  ;;  %v4109_v3 = vld [vmem:[%s5195_s1 + $0x820] ss:$8 sps:$4 sm:$0xff]  }
  0xb0   : > { %2762 = vmatpush1.bf16.msra.mxu0 %v3928_v17  ;;  %2479 = vmatprep.subr.bf16.mxu1 %v3935_v18  ;;  %v3151_v17 = vcombine.low %v239_v4, %v239_v4  ;;  %v4023_v18 = vld [vmem:[%s5195_s1 + $0x374] ss:$8 sps:$4 sm:$0xff]  }
  0xb1   : > { %2763 = vmatprep.subr.bf16.mxu0 %v3938_v19  ;;  %v4026_v19 = vld [vmem:[%s5195_s1 + $0x774] ss:$8 sps:$4 sm:$0xff]  }
  0xb2   : > { %v4114_v4 = vld [vmem:[%s5195_s1 + $0x834] ss:$8 sps:$4 sm:$0xff]  }
  0xb3   : > { %2480 = vmatpush1.bf16.msra.mxu1 %v3933_v20  ;;  %v4093_v20 = vld [vmem:[%s4351_s5 + $0x1c] ss:$72 sps:$4 sm:$0xff]  }
  0xb4   : > { %2764 = vmatpush1.bf16.msra.mxu0 %v3936_v21  ;;  %2481 = vmatprep.subr.bf16.mxu1 %v3943_v22  ;;  %v4096_v21 = vld [vmem:[%s4351_s5 + $0x3c] ss:$72 sps:$4 sm:$0xff]   ;;  %v4021_v22 = vld [vmem:[%s5195_s1 + $0x370] ss:$8 sps:$4 sm:$0xff]  }
  0xb5   : > { %2765 = vmatprep.subr.bf16.mxu0 %v3948_v23  ;;  %v4024_v23 = vld [vmem:[%s5195_s1 + $0x770] ss:$8 sps:$4 sm:$0xff]  }
  0xb7   : > { %2482 = vmatpush1.bf16.msra.mxu1 %v3941_v24  ;;  %v4029_v24 = vld [vmem:[%s5195_s1 + $0x384] ss:$8 sps:$4 sm:$0xff]  }
  0xb8   : > { %2766 = vmatpush1.bf16.msra.mxu0 %v3946_v25  ;;  %2483 = vmatprep.subr.bf16.mxu1 %v3953_v26  ;;  %v4032_v25 = vld [vmem:[%s5195_s1 + $0x784] ss:$8 sps:$4 sm:$0xff]   ;;  %v4027_v26 = vld [vmem:[%s5195_s1 + $0x380] ss:$8 sps:$4 sm:$0xff]  }
  0xb9   : > { %2767 = vmatprep.subr.bf16.mxu0 %v3956_v27  ;;  %v4030_v27 = vld [vmem:[%s5195_s1 + $0x780] ss:$8 sps:$4 sm:$0xff]  }
  0xbb   : > { %2484 = vmatpush1.bf16.msra.mxu1 %v3951_v28  ;;  %v4035_v28 = vld [vmem:[%s5195_s1 + $0x394] ss:$8 sps:$4 sm:$0xff]  }
  0xbc   : > { %2768 = vmatpush1.bf16.msra.mxu0 %v3954_v29  ;;  %2485 = vmatprep.subr.bf16.mxu1 %v3960_v30  ;;  %v4038_v29 = vld [vmem:[%s5195_s1 + $0x794] ss:$8 sps:$4 sm:$0xff]   ;;  %v4033_v30 = vld [vmem:[%s5195_s1 + $0x390] ss:$8 sps:$4 sm:$0xff]  }
  0xbd   : > { %2769 = vmatprep.subr.bf16.mxu0 %v3964_v31  ;;  %v4036_v31 = vld [vmem:[%s5195_s1 + $0x790] ss:$8 sps:$4 sm:$0xff]  }
  0xbf   : > { %2486 = vmatpush1.bf16.msra.mxu1 %v3958_v32  ;;  %v4046_v32 = vld [vmem:[%s5195_s1 + $0x3a4] ss:$8 sps:$4 sm:$0xff]  }
  0xc0   : > { %2770 = vmatpush1.bf16.msra.mxu0 %v3962_v33  ;;  %2487 = vmatprep.subr.bf16.mxu1 %v3969_v34  ;;  %v4050_v33 = vld [vmem:[%s5195_s1 + $0x7a4] ss:$8 sps:$4 sm:$0xff]   ;;  %v4044_v34 = vld [vmem:[%s5195_s1 + $0x3a0] ss:$8 sps:$4 sm:$0xff]  }
  0xc1   : > { %2771 = vmatprep.subr.bf16.mxu0 %v3972_v35  ;;  %v4048_v35 = vld [vmem:[%s5195_s1 + $0x7a0] ss:$8 sps:$4 sm:$0xff]  }
  0xc3   : > { %2488 = vmatpush1.bf16.msra.mxu1 %v3967_v36  ;;  %v4053_v36 = vld [vmem:[%s5195_s1 + $0x3b4] ss:$8 sps:$4 sm:$0xff]  }
  0xc4   : > { %2772 = vmatpush1.bf16.msra.mxu0 %v3970_v37  ;;  %2528 = vmatprep.subr.bf16.mxu1 %v3978_v38  ;;  %v4056_v37 = vld [vmem:[%s5195_s1 + $0x7b4] ss:$8 sps:$4 sm:$0xff]   ;;  %v4051_v38 = vld [vmem:[%s5195_s1 + $0x3b0] ss:$8 sps:$4 sm:$0xff]  }
  0xc5   : > { %2812 = vmatprep.subr.bf16.mxu0 %v3984_v39  ;;  %v4054_v39 = vld [vmem:[%s5195_s1 + $0x7b0] ss:$8 sps:$4 sm:$0xff]  }
  0xc6   : > { %2490 = vmatmul.mubr.bf16.vlgmr.msra.gmra.mrb[0].mxu1 %v3973_v40  ;;  %v4064_v40 = vld [vmem:[%s5195_s1 + $0x3c4] ss:$8 sps:$4 sm:$0xff]  }
  0xc7   : > { %2774 = vmatmul.mubr.bf16.vlgmr.msra.gmra.mrb[0].mxu0 %v3979_v42  ;;  %2529 = vmatpush1.bf16.msra.mxu1 %v3976_v41  ;;  %v4068_v41 = vld [vmem:[%s5195_s1 + $0x7c4] ss:$8 sps:$4 sm:$0xff]   ;;  %v4062_v42 = vld [vmem:[%s5195_s1 + $0x3c0] ss:$8 sps:$4 sm:$0xff]  }
  0xc8   : > { %2813 = vmatpush1.bf16.msra.mxu0 %v3982_v43  ;;  %2530 = vmatprep.subr.bf16.mxu1 %v3987_v44  ;;  %v4066_v43 = vld [vmem:[%s5195_s1 + $0x7c0] ss:$8 sps:$4 sm:$0xff]   ;;  %v4071_v44 = vld [vmem:[%s5195_s1 + $0x3d4] ss:$8 sps:$4 sm:$0xff]  }
  0xc9   : > { %2814 = vmatprep.subr.bf16.mxu0 %v3990_v45  ;;  %2499 = vmatprep.mubr.bf16.mxu1 %v4039_v46  ;;  %v4074_v45 = vld [vmem:[%s5195_s1 + $0x7d4] ss:$8 sps:$4 sm:$0xff]   ;;  %v4069_v46 = vld [vmem:[%s5195_s1 + $0x3d0] ss:$8 sps:$4 sm:$0xff]  }
  0xca   : > { %2783 = vmatprep.mubr.bf16.mxu0 %v4041_v47  ;;  %v4072_v47 = vld [vmem:[%s5195_s1 + $0x7d0] ss:$8 sps:$4 sm:$0xff]  }
  0xcb   : > { %2531 = vmatpush1.bf16.msra.mxu1 %v3985_v48  ;;  %v4080_v48 = vld [vmem:[%s5195_s1 + $0x3e4] ss:$8 sps:$4 sm:$0xff]  }
  0xcc   : > { %2815 = vmatpush1.bf16.msra.mxu0 %v3988_v49  ;;  %2532 = vmatprep.subr.bf16.mxu1 %v3993_v50  ;;  %v4084_v49 = vld [vmem:[%s5195_s1 + $0x7e4] ss:$8 sps:$4 sm:$0xff]   ;;  %v4078_v50 = vld [vmem:[%s5195_s1 + $0x3e0] ss:$8 sps:$4 sm:$0xff]  }
  0xcd   : > { %2816 = vmatprep.subr.bf16.mxu0 %v3996_v51  ;;  %v4082_v51 = vld [vmem:[%s5195_s1 + $0x7e0] ss:$8 sps:$4 sm:$0xff]  }
  0xce   : > { %2500 = vmatmul.mubr.bf16.gmra.mrb[4].mxu1 %v4043_v53  ;;  %v4090_v53 = vld [vmem:[%s5195_s1 + $0x7f4] ss:$8 sps:$4 sm:$0xff]  }
  0xcf   : > { %2784 = vmatmul.mubr.bf16.gmra.mrb[4].mxu0 %v4047_v54  ;;  %2533 = vmatpush1.bf16.msra.mxu1 %v3991_v52  ;;  %v4087_v52 = vld [vmem:[%s5195_s1 + $0x3f4] ss:$8 sps:$4 sm:$0xff]   ;;  %v4085_v54 = vld [vmem:[%s5195_s1 + $0x3f0] ss:$8 sps:$4 sm:$0xff]  }
  0xd0   : > { %2817 = vmatpush1.bf16.msra.mxu0 %v3994_v55  ;;  %2534 = vmatprep.subr.bf16.mxu1 %v3999_v56  ;;  %v4088_v55 = vld [vmem:[%s5195_s1 + $0x7f0] ss:$8 sps:$4 sm:$0xff]   ;;  %v4099_v56 = vld [vmem:[%s5195_s1 + $0x804] ss:$8 sps:$4 sm:$0xff]  }
  0xd1   : > { %2818 = vmatprep.subr.bf16.mxu0 %v4002_v57  ;;  %2509 = vmatprep.mubr.bf16.mxu1 %v4057_v58  ;;  %v4091_v57 = vld [vmem:[%s4351_s5 + $0x18] ss:$72 sps:$4 sm:$0xff]  }
  0xd2   : > { %2793 = vmatprep.mubr.bf16.mxu0 %v4059_v60  ;;  %v4094_v58 = vld [vmem:[%s4351_s5 + $0x38] ss:$72 sps:$4 sm:$0xff]   ;;  %v4102_v60 = vld [vmem:[%s5195_s1 + $0x814] ss:$8 sps:$4 sm:$0xff]  }
  0xd3   : > { %2535 = vmatpush1.bf16.msra.mxu1 %v3997_v59  ;;  %v4097_v59 = vld [vmem:[%s5195_s1 + $0x800] ss:$8 sps:$4 sm:$0xff]  }
  0xd4   : > { %2819 = vmatpush1.bf16.msra.mxu0 %v4000_v61  ;;  %2536 = vmatprep.subr.bf16.mxu1 %v4005_v62  ;;  %v4103_v61 = vld [vmem:[%s4351_s5 + $0xac] ss:$72 sps:$4 sm:$0xff]  }
  0xd5   : > { %2820 = vmatprep.subr.bf16.mxu0 %v4008_v63  ;;  %v4105_v62 = vld [vmem:[%s4351_s5 + $0xcc] ss:$72 sps:$4 sm:$0xff]   ;;  %v4100_v63 = vld [vmem:[%s5195_s1 + $0x810] ss:$8 sps:$4 sm:$0xff]  }
  0xd6   : > { %2510 = vmatmul.mubr.bf16.gmra.mrb[8].mxu1 %v4061_v0  ;;  %v4111_v0 = vld [vmem:[%s5195_s1 + $0x824] ss:$8 sps:$4 sm:$0xff]  }
  0xd7   : > { %2794 = vmatmul.mubr.bf16.gmra.mrb[8].mxu0 %v4065_v1  ;;  %2537 = vmatpush1.bf16.msra.mxu1 %v4003_v2  ;;  %v4107_v1 = vld [vmem:[%s4351_s5 + $0xa8] ss:$72 sps:$4 sm:$0xff]  }
  0xd8   : > { %2821 = vmatpush1.bf16.msra.mxu0 %v4006_v5  ;;  %2538 = vmatprep.subr.bf16.mxu1 %v4011_v6  ;;  %v4108_v2 = vld [vmem:[%s4351_s5 + $0xc8] ss:$72 sps:$4 sm:$0xff]   ;;  %v4115_v5 = vld [vmem:[%s4351_s5 + $0x13c] ss:$72 sps:$4 sm:$0xff]  }
  0xd9   : > { %2822 = vmatprep.subr.bf16.mxu0 %v4014_v7  ;;  %2519 = vmatprep.mubr.bf16.mxu1 %v3144_v8  ;;  %v4117_v6 = vld [vmem:[%s4351_s5 + $0x15c] ss:$72 sps:$4 sm:$0xff]   ;;  %v4112_v7 = vld [vmem:[%s5195_s1 + $0x830] ss:$8 sps:$4 sm:$0xff]  }
  0xda   : > { %2803 = vmatprep.mubr.bf16.mxu0 %v3152_v9  ;;  %v4123_v8 = vld [vmem:[%s5195_s1 + $0x844] ss:$8 sps:$4 sm:$0xff]   ;;  %v4119_v9 = vld [vmem:[%s4351_s5 + $0x138] ss:$72 sps:$4 sm:$0xff]  }
  0xdb   : > { %2539 = vmatpush1.bf16.msra.mxu1 %v4009_v10  ;;  %v4120_v10 = vld [vmem:[%s4351_s5 + $0x158] ss:$72 sps:$4 sm:$0xff]  }
  0xdc   : > { %2823 = vmatpush1.bf16.msra.mxu0 %v4012_v11  ;;  %2540 = vmatprep.subr.bf16.mxu1 %v4017_v12  ;;  %v236_v11 = vld [vmem:[%s4351_s5 + $0x1c8] sm:$0xff] }
  0xdd   : > { %2824 = vmatprep.subr.bf16.mxu0 %v4020_v13  ;;  %v240_v12 = vld [vmem:[%s4351_s5 + $0x1e8] sm:$0xff] }
  0xde   : > { %2520 = vmatmul.mubr.bf16.gmra.mrb[12].mxu1 %v3143_v16  ;;  %v4121_v13 = vld [vmem:[%s5195_s1 + $0x840] ss:$8 sps:$4 sm:$0xff]   ;;  %v3154_v16 = vcombine.high %v240_v12, %v240_v12 }
  0xdf   : > { %2804 = vmatmul.mubr.bf16.gmra.mrb[12].mxu0 %v3151_v17  ;;  %2541 = vmatpush1.bf16.msra.mxu1 %v4015_v14  ;;  %v4126_v14 = vld [vmem:[%s5195_s1 + $0x854] ss:$8 sps:$4 sm:$0xff]   ;;  %v4124_v17 = vld [vmem:[%s5195_s1 + $0x850] ss:$8 sps:$4 sm:$0xff]  }
  0xe0   : > { %2825 = vmatpush1.bf16.msra.mxu0 %v4018_v15  ;;  %2542 = vmatprep.subr.bf16.mxu1 %v4023_v18  ;;  %v3146_v15 = vcombine.high %v236_v11, %v236_v11  ;;  %v4133_v18 = vld [vmem:[%s5195_s1 + $0x864] ss:$8 sps:$4 sm:$0xff]  }
  0xe1   : > { %2826 = vmatprep.subr.bf16.mxu0 %v4026_v19  ;;  %2560 = vmatprep.mubr.bf16.mxu1 %v4093_v20  ;;  %v3145_v19 = vcombine.low %v236_v11, %v236_v11  ;;  %v3153_v20 = vcombine.low %v240_v12, %v240_v12 }
  0xe2   : > { %2844 = vmatprep.mubr.bf16.mxu0 %v4096_v21  ;;  %v4131_v21 = vld [vmem:[%s5195_s1 + $0x860] ss:$8 sps:$4 sm:$0xff]  }
  0xe3   : > { %2543 = vmatpush1.bf16.msra.mxu1 %v4021_v22  ;;  %v4136_v22 = vld [vmem:[%s5195_s1 + $0x874] ss:$8 sps:$4 sm:$0xff]  }
  0xe4   : > { %2827 = vmatpush1.bf16.msra.mxu0 %v4024_v23  ;;  %2544 = vmatprep.subr.bf16.mxu1 %v4029_v24  ;;  %v4163_v23 = vld [vmem:[%s4351_s5 + $0x44] ss:$72 sps:$4 sm:$0xff]  }
  0xe5   : > { %2828 = vmatprep.subr.bf16.mxu0 %v4032_v25  ;;  %v4166_v24 = vld [vmem:[%s4351_s5 + $0x164] ss:$72 sps:$4 sm:$0xff]   ;;  %v4134_v25 = vld [vmem:[%s5195_s1 + $0x870] ss:$8 sps:$4 sm:$0xff]  }
  0xe7   : > { %2545 = vmatpush1.bf16.msra.mxu1 %v4027_v26  ;;  %v4139_v26 = vld [vmem:[%s5195_s1 + $0x884] ss:$8 sps:$4 sm:$0xff]  }
  0xe8   : > { %2829 = vmatpush1.bf16.msra.mxu0 %v4030_v27  ;;  %2546 = vmatprep.subr.bf16.mxu1 %v4035_v28  ;;  %v4137_v27 = vld [vmem:[%s5195_s1 + $0x880] ss:$8 sps:$4 sm:$0xff]   ;;  %v4142_v28 = vld [vmem:[%s5195_s1 + $0x894] ss:$8 sps:$4 sm:$0xff]  }
  0xe9   : > { %2830 = vmatprep.subr.bf16.mxu0 %v4038_v29  ;;  %v4140_v29 = vld [vmem:[%s5195_s1 + $0x890] ss:$8 sps:$4 sm:$0xff]  }
  0xeb   : > { %2547 = vmatpush1.bf16.msra.mxu1 %v4033_v30  ;;  %v4145_v30 = vld [vmem:[%s5195_s1 + $0x8a4] ss:$8 sps:$4 sm:$0xff]  }
  0xec   : > { %2831 = vmatpush1.bf16.msra.mxu0 %v4036_v31  ;;  %2548 = vmatprep.subr.bf16.mxu1 %v4046_v32  ;;  %v4143_v31 = vld [vmem:[%s5195_s1 + $0x8a0] ss:$8 sps:$4 sm:$0xff]   ;;  %v4148_v32 = vld [vmem:[%s5195_s1 + $0x8b4] ss:$8 sps:$4 sm:$0xff]  }
  0xed   : > { %2832 = vmatprep.subr.bf16.mxu0 %v4050_v33  ;;  %v4146_v33 = vld [vmem:[%s5195_s1 + $0x8b0] ss:$8 sps:$4 sm:$0xff]  }
  0xef   : > { %2549 = vmatpush1.bf16.msra.mxu1 %v4044_v34  ;;  %v4151_v34 = vld [vmem:[%s5195_s1 + $0x8c4] ss:$8 sps:$4 sm:$0xff]  }
  0xf0   : > { %2833 = vmatpush1.bf16.msra.mxu0 %v4048_v35  ;;  %2550 = vmatprep.subr.bf16.mxu1 %v4053_v36  ;;  %v4149_v35 = vld [vmem:[%s5195_s1 + $0x8c0] ss:$8 sps:$4 sm:$0xff]   ;;  %v4154_v36 = vld [vmem:[%s5195_s1 + $0x8d4] ss:$8 sps:$4 sm:$0xff]  }
  0xf1   : > { %2834 = vmatprep.subr.bf16.mxu0 %v4056_v37  ;;  %v4152_v37 = vld [vmem:[%s5195_s1 + $0x8d0] ss:$8 sps:$4 sm:$0xff]  }
  0xf3   : > { %2551 = vmatpush1.bf16.msra.mxu1 %v4051_v38  ;;  %v4157_v38 = vld [vmem:[%s5195_s1 + $0x8e4] ss:$8 sps:$4 sm:$0xff]  }
  0xf4   : > { %2835 = vmatpush1.bf16.msra.mxu0 %v4054_v39  ;;  %2552 = vmatprep.subr.bf16.mxu1 %v4064_v40  ;;  %v4155_v39 = vld [vmem:[%s5195_s1 + $0x8e0] ss:$8 sps:$4 sm:$0xff]   ;;  %v4160_v40 = vld [vmem:[%s5195_s1 + $0x8f4] ss:$8 sps:$4 sm:$0xff]  }
  0xf5   : > { %2836 = vmatprep.subr.bf16.mxu0 %v4068_v41  ;;  %v4158_v41 = vld [vmem:[%s5195_s1 + $0x8f0] ss:$8 sps:$4 sm:$0xff]  }
  0xf7   : > { %2553 = vmatpush1.bf16.msra.mxu1 %v4062_v42  ;;  %v241_v42 = vld [vmem:[%s4351_s5 + $0x1f0] sm:$0xff] }
  0xf8   : > { %2837 = vmatpush1.bf16.msra.mxu0 %v4066_v43  ;;  %2554 = vmatprep.subr.bf16.mxu1 %v4071_v44  ;;  %v4161_v43 = vld [vmem:[%s4351_s5 + $0x40] ss:$72 sps:$4 sm:$0xff]  }
  0xf9   : > { %2838 = vmatprep.subr.bf16.mxu0 %v4074_v45  ;;  %v4164_v44 = vld [vmem:[%s4351_s5 + $0x160] ss:$72 sps:$4 sm:$0xff]   ;;  %v4167_v45 = vld [vmem:[%s4351_s5 + $0xd4] ss:$72 sps:$4 sm:$0xff]  }
  0xfb   : > { %2555 = vmatpush1.bf16.msra.mxu1 %v4069_v46  ;;  %v3156_v46 = vcombine.high %v241_v42, %v241_v42 }
  0xfc   : > { %2839 = vmatpush1.bf16.msra.mxu0 %v4072_v47  ;;  %2556 = vmatprep.subr.bf16.mxu1 %v4080_v48  ;;  %v4170_v47 = vld [vmem:[%s4351_s5 + $0xd0] ss:$72 sps:$4 sm:$0xff]   ;;  %v3155_v48 = vcombine.low %v241_v42, %v241_v42 }
  0xfd   : > { %2840 = vmatprep.subr.bf16.mxu0 %v4084_v49 }
  0xff   : > { %2557 = vmatpush1.bf16.msra.mxu1 %v4078_v50 }
 0x100   : > { %2841 = vmatpush1.bf16.msra.mxu0 %v4082_v51  ;;  %2558 = vmatprep.subr.bf16.mxu1 %v4087_v52  ;;  %v532_v52 = vlaneseq }
 0x101   : > { %2842 = vmatprep.subr.bf16.mxu0 %v4090_v53 }
 0x103   : > { %2559 = vmatpush1.bf16.msra.mxu1 %v4085_v54  ;;  %v533_v54 = vshrl.u32 %v532_v52, 7 }
 0x104   : > { %2843 = vmatpush1.bf16.msra.mxu0 %v4088_v55  ;;  %3462 = vmatprep.subr.bf16.mxu1 %v4099_v56 }
 0x105   : > { %2883 = vmatprep.subr.bf16.mxu0 %v4099_v56 }
 0x106   : > { %2561 = vmatmul.mubr.bf16.vlgmr.msra.gmra.mrb[0].mxu1 %v4091_v57 }
 0x107   : > { %2845 = vmatmul.mubr.bf16.vlgmr.msra.gmra.mrb[0].mxu0 %v4094_v58  ;;  %3478 = vmatpush1.bf16.msra.mxu1 %v4097_v59  ;;  %v534_v58 = vsub.s32 0, %v533_v54 }
 0x108   : > { %2884 = vmatpush1.bf16.msra.mxu0 %v4097_v59  ;;  %3463 = vmatprep.subr.bf16.mxu1 %v4102_v60 }
 0x109   : > { %2885 = vmatprep.subr.bf16.mxu0 %v4102_v60  ;;  %2570 = vmatprep.mubr.bf16.mxu1 %v4103_v61  ;;  %v530_v60 = vld [vmem:[%s5196_s2] sm:$0x3]  ;;  %v538_v61 = vsub.s32 1, %v533_v54 }
 0x10a   : > { %2854 = vmatprep.mubr.bf16.mxu0 %v4105_v62  ;;  %v5156_v62 = vrot.slane %v530_v60, %v534_v58 }
 0x10b   : > { %3479 = vmatpush1.bf16.msra.mxu1 %v4100_v63 }
 0x10c   : > { %2886 = vmatpush1.bf16.msra.mxu0 %v4100_v63  ;;  %3464 = vmatprep.subr.bf16.mxu1 %v4111_v0  ;;  %v5158_v63 = vrot.slane %v530_v60, %v538_v61 }
 0x10d   : > { %2887 = vmatprep.subr.bf16.mxu0 %v4111_v0 }
 0x10e   : > { %2571 = vmatmul.mubr.bf16.gmra.mrb[4].mxu1 %v4107_v1 }
 0x10f   : > { %2855 = vmatmul.mubr.bf16.gmra.mrb[4].mxu0 %v4108_v2  ;;  %3480 = vmatpush1.bf16.msra.mxu1 %v4109_v3 }
 0x110   : > { %2888 = vmatpush1.bf16.msra.mxu0 %v4109_v3  ;;  %3465 = vmatprep.subr.bf16.mxu1 %v4114_v4 }
 0x111   : > { %2889 = vmatprep.subr.bf16.mxu0 %v4114_v4  ;;  %2580 = vmatprep.mubr.bf16.mxu1 %v4115_v5 }
 0x112   : > { %2864 = vmatprep.mubr.bf16.mxu0 %v4117_v6 }
 0x113   : > { %3481 = vmatpush1.bf16.msra.mxu1 %v4112_v7 }
 0x114   : > { %2890 = vmatpush1.bf16.msra.mxu0 %v4112_v7  ;;  %3466 = vmatprep.subr.bf16.mxu1 %v4123_v8 }
 0x115   : > { %2891 = vmatprep.subr.bf16.mxu0 %v4123_v8 }
 0x116   : > { %2581 = vmatmul.mubr.bf16.gmra.mrb[8].mxu1 %v4119_v9 }
 0x117   : > { %2865 = vmatmul.mubr.bf16.gmra.mrb[8].mxu0 %v4120_v10  ;;  %3482 = vmatpush1.bf16.msra.mxu1 %v4121_v13 }
 0x118   : > { %2892 = vmatpush1.bf16.msra.mxu0 %v4121_v13  ;;  %3467 = vmatprep.subr.bf16.mxu1 %v4126_v14 }
 0x119   : > { %2893 = vmatprep.subr.bf16.mxu0 %v4126_v14  ;;  %2590 = vmatprep.mubr.bf16.mxu1 %v3146_v15 }
 0x11a   : > { %2874 = vmatprep.mubr.bf16.mxu0 %v3154_v16 }
 0x11b   : > { %3483 = vmatpush1.bf16.msra.mxu1 %v4124_v17 }
 0x11c   : > { %2894 = vmatpush1.bf16.msra.mxu0 %v4124_v17  ;;  %3468 = vmatprep.subr.bf16.mxu1 %v4133_v18 }
 0x11d   : > { %2895 = vmatprep.subr.bf16.mxu0 %v4133_v18 }
 0x11e   : > { %2591 = vmatmul.mubr.bf16.gmra.mrb[12].mxu1 %v3145_v19 }
 0x11f   : > { %2875 = vmatmul.mubr.bf16.gmra.mrb[12].mxu0 %v3153_v20  ;;  %3484 = vmatpush1.bf16.msra.mxu1 %v4131_v21 }
 0x120   : > { %2896 = vmatpush1.bf16.msra.mxu0 %v4131_v21  ;;  %3469 = vmatprep.subr.bf16.mxu1 %v4136_v22 }
 0x121   : > { %2897 = vmatprep.subr.bf16.mxu0 %v4136_v22  ;;  %2915 = vmatprep.mubr.bf16.mxu0 %v4163_v23 }
 0x122   : > { %2935 = vmatprep.mubr.bf16.mxu1 %v4166_v24 }
 0x123   : > { %3485 = vmatpush1.bf16.msra.mxu1 %v4134_v25 }
 0x124   : > { %2898 = vmatpush1.bf16.msra.mxu0 %v4134_v25  ;;  %3470 = vmatprep.subr.bf16.mxu1 %v4139_v26 }
 0x125   : > { %2899 = vmatprep.subr.bf16.mxu0 %v4139_v26 }
 0x127   : > { %3486 = vmatpush1.bf16.msra.mxu1 %v4137_v27 }
 0x128   : > { %2900 = vmatpush1.bf16.msra.mxu0 %v4137_v27  ;;  %3471 = vmatprep.subr.bf16.mxu1 %v4142_v28 }
 0x129   : > { %2901 = vmatprep.subr.bf16.mxu0 %v4142_v28 }
 0x12b   : > { %3487 = vmatpush1.bf16.msra.mxu1 %v4140_v29 }
 0x12c   : > { %2902 = vmatpush1.bf16.msra.mxu0 %v4140_v29  ;;  %3472 = vmatprep.subr.bf16.mxu1 %v4145_v30 }
 0x12d   : > { %2903 = vmatprep.subr.bf16.mxu0 %v4145_v30 }
 0x12f   : > { %3488 = vmatpush1.bf16.msra.mxu1 %v4143_v31 }
 0x130   : > { %2904 = vmatpush1.bf16.msra.mxu0 %v4143_v31  ;;  %3473 = vmatprep.subr.bf16.mxu1 %v4148_v32 }
 0x131   : > { %2905 = vmatprep.subr.bf16.mxu0 %v4148_v32 }
 0x133   : > { %3489 = vmatpush1.bf16.msra.mxu1 %v4146_v33 }
 0x134   : > { %2906 = vmatpush1.bf16.msra.mxu0 %v4146_v33  ;;  %3474 = vmatprep.subr.bf16.mxu1 %v4151_v34 }
 0x135   : > { %2907 = vmatprep.subr.bf16.mxu0 %v4151_v34 }
 0x137   : > { %3490 = vmatpush1.bf16.msra.mxu1 %v4149_v35 }
 0x138   : > { %2908 = vmatpush1.bf16.msra.mxu0 %v4149_v35  ;;  %3475 = vmatprep.subr.bf16.mxu1 %v4154_v36 }
 0x139   : > { %2909 = vmatprep.subr.bf16.mxu0 %v4154_v36 }
 0x13b   : > { %3491 = vmatpush1.bf16.msra.mxu1 %v4152_v37 }
 0x13c   : > { %2910 = vmatpush1.bf16.msra.mxu0 %v4152_v37  ;;  %3476 = vmatprep.subr.bf16.mxu1 %v4157_v38 }
 0x13d   : > { %2911 = vmatprep.subr.bf16.mxu0 %v4157_v38 }
 0x13f   : > { %3492 = vmatpush1.bf16.msra.mxu1 %v4155_v39 }
 0x140   : > { %2912 = vmatpush1.bf16.msra.mxu0 %v4155_v39  ;;  %3477 = vmatprep.subr.bf16.mxu1 %v4160_v40 }
 0x141   : > { %2913 = vmatprep.subr.bf16.mxu0 %v4160_v40 }
 0x143   : > { %3493 = vmatpush1.bf16.msra.mxu1 %v4158_v41 }
 0x144   : > { %2914 = vmatpush1.bf16.msra.mxu0 %v4158_v41 }
 0x146   : > { %2936 = vmatmul.mubr.bf16.vlgmr.msra.gmra.mrb[16].mxu1 %v4164_v44 }
 0x147   : > { %2916 = vmatmul.mubr.bf16.vlgmr.msra.gmra.mrb[0].mxu0 %v4161_v43  ;;  %2945 = vmatprep.mubr.bf16.mxu1 %v3156_v46 }
 0x148   : > { %2925 = vmatprep.mubr.bf16.mxu0 %v4167_v45 }
 0x14e   : > { %2946 = vmatmul.mubr.bf16.gmra.mrb[20].mxu1 %v3155_v48 }
 0x14f   : > { %2926 = vmatmul.mubr.bf16.gmra.mrb[4].mxu0 %v4170_v47 }
 0x1d9   : > { %v2562_v49 = vpop.f32.mrb[0].mxu1 }
 0x1da   : > { %v2564_v50 = vpop.f32.mrb[1].mxu1  ;;  %v3494_v28 = vadd.f32 %v2562_v49, %v5156_v62 }
 0x1db   : > { %v2566_v51 = vpop.f32.mrb[2].mxu1  ;;  %v3496_v29 = vadd.f32 %v2564_v50, %v5158_v63 }
 0x1dc   : > { %v2568_v53 = vpop.f32.mrb[3].mxu1  ;;  %v3498_v32 = vadd.f32 %v2566_v51, %v5156_v62 }
 0x1dd   : > { %v3500_v37 = vadd.f32 %v2568_v53, %v5158_v63 }
 0x1e1   : > { %v5145_v55 = vpop.f32.mrb[4].mxu1 }
 0x1e2   : > { %v5147_v56 = vpop.f32.mrb[5].mxu1 }
 0x1e3   : > { %v5149_v57 = vpop.f32.mrb[6].mxu1 }
 0x1e4   : > { %v5151_v59 = vpop.f32.mrb[7].mxu1 }
 0x1e9   : > { %v2582_v0 = vpop.f32.mrb[8].mxu1 }
 0x1ea   : > { %v2866_v1 = vpop.f32.mrb[8].mxu0  ;;  %v3510_v2 = vadd.f32 %v2582_v0, %v5156_v62  ;;  %v2584_v3 = vpop.f32.mrb[9].mxu1  ;;  %v3502_v0 = vadd.f32 %v5145_v55, %v5156_v62 }
 0x1eb   : > { %v2868_v4 = vpop.f32.mrb[9].mxu0  ;;  %v3513_v5 = vadd.f32 %v2584_v3, %v5158_v63  ;;  %v2586_v6 = vpop.f32.mrb[10].mxu1 }
 0x1ec   : > { %v2870_v7 = vpop.f32.mrb[10].mxu0  ;;  %v3511_v8 = vadd.f32 %v3510_v2, %v2866_v1  ;;  %v3516_v9 = vadd.f32 %v2586_v6, %v5156_v62  ;;  %v2588_v10 = vpop.f32.mrb[11].mxu1  ;;  %v3504_v1 = vadd.f32 %v5147_v56, %v5158_v63  ;;  %v3506_v6 = vadd.f32 %v5149_v57, %v5156_v62 }
 0x1ed   : > { %v2872_v11 = vpop.f32.mrb[11].mxu0  ;;  %v3514_v12 = vadd.f32 %v3513_v5, %v2868_v4  ;;  %v3519_v13 = vadd.f32 %v2588_v10, %v5158_v63 }
 0x1ee   : > { %v3517_v14 = vadd.f32 %v3516_v9, %v2870_v7 }
 0x1ef   : > { %v3520_v15 = vadd.f32 %v3519_v13, %v2872_v11  ;;  %v3508_v11 = vadd.f32 %v5151_v59, %v5158_v63 }
 0x1f1   : > { %v2592_v16 = vpop.f32.mrb[12].mxu1 }
 0x1f2   : > { %v2876_v17 = vpop.f32.mrb[12].mxu0  ;;  %v3522_v18 = vadd.f32 %v2592_v16, %v5156_v62  ;;  %v2594_v19 = vpop.f32.mrb[13].mxu1 }
 0x1f3   : > { %v2878_v20 = vpop.f32.mrb[13].mxu0  ;;  %v3525_v21 = vadd.f32 %v2594_v19, %v5158_v63  ;;  %v2596_v22 = vpop.f32.mrb[14].mxu1 }
 0x1f4   : > { %v2880_v23 = vpop.f32.mrb[14].mxu0  ;;  %v3523_v24 = vadd.f32 %v3522_v18, %v2876_v17  ;;  %v2597_v25 = vpop.f32.mrb[15].mxu1 }
 0x1f5   : > { %v2881_v26 = vpop.f32.mrb[15].mxu0  ;;  %v3526_v27 = vadd.f32 %v3525_v21, %v2878_v20 }
 0x219   : > { %v2937_v31 = vpop.f32.mrb[16].mxu1 }
 0x21a   : > { %v2917_v30 = vpop.f32.mrb[0].mxu0  ;;  %v3512_v34 = vadd.f32 %v3511_v8, %v2937_v31  ;;  %v2939_v36 = vpop.f32.mrb[17].mxu1 }
 0x21b   : > { %v3495_v33 = vadd.f32 %v3494_v28, %v2917_v30  ;;  %v2919_v35 = vpop.f32.mrb[1].mxu0  ;;  %v3515_v39 = vadd.f32 %v3514_v12, %v2939_v36  ;;  %v2941_v41 = vpop.f32.mrb[18].mxu1 }
 0x21c   : > { %v3497_v38 = vadd.f32 %v3496_v29, %v2919_v35  ;;  %v2921_v40 = vpop.f32.mrb[2].mxu0  ;;  %v2962_v43 = vmax.f32 %v3512_v34, 0.0  ;;  %v3518_v45 = vadd.f32 %v3517_v14, %v2941_v41  ;;  %v2943_v47 = vpop.f32.mrb[19].mxu1 }
 0x21d   : > { %v2954_v42 = vmax.f32 %v3495_v33, 0.0  ;;  %v3499_v44 = vadd.f32 %v3498_v32, %v2921_v40  ;;  %v2923_v46 = vpop.f32.mrb[3].mxu0  ;;  %v2963_v49 = vmax.f32 %v3515_v39, 0.0  ;;  %v3521_v51 = vadd.f32 %v3520_v15, %v2943_v47 }
 0x21e   : > { %v2955_v48 = vmax.f32 %v3497_v38, 0.0  ;;  %v3501_v50 = vadd.f32 %v3500_v37, %v2923_v46  ;;  %v2964_v53 = vmax.f32 %v3518_v45, 0.0 }
 0x21f   : > { %v2956_v52 = vmax.f32 %v3499_v44, 0.0  ;;  %v3459_v58 = vpack.c.bf16 %v2963_v49, %v2962_v43  ;;  %v2965_v61 = vmax.f32 %v3521_v51, 0.0 }
 0x220   : > { %v3455_v54 = vpack.c.bf16 %v2955_v48, %v2954_v42  ;;  %v2957_v60 = vmax.f32 %v3501_v50, 0.0 }
 0x221   : > { %3016 = vst [vmem:[%s5174_s18 + $0x20] sm:$0xff] %v3459_v58  ;;  %v3460_v3 = vpack.c.bf16 %v2965_v61, %v2964_v53  ;;  %v2947_v5 = vpop.f32.mrb[20].mxu1 }
 0x222   : > { %3012 = vst [vmem:[%s5174_s18] sm:$0xff] %v3455_v54  ;;  %v3456_v2 = vpack.c.bf16 %v2957_v60, %v2956_v52  ;;  %v2927_v4 = vpop.f32.mrb[4].mxu0  ;;  %v3524_v8 = vadd.f32 %v3523_v24, %v2947_v5  ;;  %v2949_v10 = vpop.f32.mrb[21].mxu1 }
 0x223   : > { %v3503_v7 = vadd.f32 %v3502_v0, %v2927_v4  ;;  %v2929_v9 = vpop.f32.mrb[5].mxu0  ;;  %3017 = vst [vmem:[%s5174_s18 + $0x28] sm:$0xff] %v3460_v3  ;;  %v3527_v56 = vadd.f32 %v3526_v27, %v2949_v10  ;;  %v2951_v13 = vpop.f32.mrb[22].mxu1 }
 0x224   : > { %3013 = vst [vmem:[%s5174_s18 + $0x8] sm:$0xff] %v3456_v2  ;;  %v3505_v55 = vadd.f32 %v3504_v1, %v2929_v9  ;;  %v2931_v12 = vpop.f32.mrb[6].mxu0  ;;  %v2966_v15 = vmax.f32 %v3524_v8, 0.0  ;;  %v2952_v62 = vpop.f32.mrb[23].mxu1 }
 0x225   : > { %v2958_v14 = vmax.f32 %v3503_v7, 0.0  ;;  %v3507_v16 = vadd.f32 %v3506_v6, %v2931_v12  ;;  %v2933_v57 = vpop.f32.mrb[7].mxu0  ;;  %v2967_v18 = vmax.f32 %v3527_v56, 0.0 }
 0x226   : > { %v2959_v17 = vmax.f32 %v3505_v55, 0.0  ;;  %v3509_v19 = vadd.f32 %v3508_v11, %v2933_v57 }
 0x227   : > { %v2960_v20 = vmax.f32 %v3507_v16, 0.0  ;;  %v3461_v59 = vpack.c.bf16 %v2967_v18, %v2966_v15 }
 0x228   : > { %v3457_v21 = vpack.c.bf16 %v2959_v17, %v2958_v14  ;;  %v2961_v63 = vmax.f32 %v3509_v19, 0.0 }
 0x229   : > { %3018 = vst [vmem:[%s5174_s18 + $0x30] sm:$0xff] %v3461_v59 }
 0x22a   : > { %3014 = vst [vmem:[%s5174_s18 + $0x10] sm:$0xff] %v3457_v21  ;;  %v3458_v22 = vpack.c.bf16 %v2961_v63, %v2960_v20 }
 0x22c   : > { %3015 = vst [vmem:[%s5174_s18 + $0x18] sm:$0xff] %v3458_v22 }
 0x22d PF: > { %s13_s12 = sadd.s32 1, %s4178_s12  }
 0x22e   : > { %p10_p4 = scmp.ge.s32.totalorder %s13_s12, 4  }
 0x230   :  { %12 = sbr.rel (!%p10_p4) target bundleno = 1 (0x1), region = 62 }

// kernel: so_forward.8
= control target key start
LH: loop header
LB: loop body
LE: loop exit
PB: predicated region body
PF: predicated region fallthrough
CT: control target
= control target key end

     0   :  { %s3345_s12 = smov 0   ;;  %s4255_s0 = inlined_call_operand.vmem [shape: bf16[32,2304], index: 0, kind: input, shape index: {}]   ;;  %s4256_s1 = inlined_call_operand.vmem [shape: bf16[2304,256], index: 1, kind: input, shape index: {}]   ;;  %s4257_s2 = inlined_call_operand.vmem [shape: f32[1,256], index: 2, kind: input, shape index: {}]   ;;  %s4258_s3 = inlined_call_operand.vmem [shape: bf16[32,256], index: 3, kind: output, shape index: {}]  }
   0x1 LB: > { %s2490_s13 = sadd.s32 4294967295, %s3323_s12   ;;  %p2494_p0 = scmp.ge.s32.totalorder %s3323_s12, 1  ;;  %s3323_s12 = sphi %s3345_s12, %s13_s12  }
   0x2   : > { %p139_p1 = scmp.lt.s32.totalorder %s3323_s12, 3 }
   0x4   : > { %p140_p2 = pnand %p2494_p0, %p139_p1 }
   0x5   : > { %v2858_v0 = vld [vmem:[%s4256_s1 + $0x4] ss:$8 sps:$4 sm:$0xff] (!%p140_p2)   ;;  %v2862_v2 = vld [vmem:[%s4256_s1] ss:$8 sps:$4 sm:$0xff] (!%p140_p2)   ;;  %v2864_v4 = vld [vmem:[%s4256_s1 + $0x14] ss:$8 sps:$4 sm:$0xff] (!%p140_p2)  }
   0x6   : > { %143 = sbr.rel (%p140_p2) target bundleno = 549 (0x225), region = 32  ;;  %v2860_v1 = vld [vmem:[%s4256_s1 + $0x404] ss:$8 sps:$4 sm:$0xff] (!%p140_p2)   ;;  %2027 = vmatprep.subr.bf16.mxu1 (!%p140_p2), %v2858_v0  ;;  %v2863_v3 = vld [vmem:[%s4256_s1 + $0x400] ss:$8 sps:$4 sm:$0xff] (!%p140_p2)   ;;  %s2495_s24 = sshll.u32 (!%p140_p2), %s2490_s13, 1 }
   0x7   : > { %2199 = vmatprep.subr.bf16.mxu0 (!%p140_p2), %v2860_v1  ;;  %2028 = vmatpush1.bf16.msra.mxu1 (!%p140_p2), %v2862_v2  ;;  %v2866_v5 = vld [vmem:[%s4256_s1 + $0x414] ss:$8 sps:$4 sm:$0xff] (!%p140_p2)   ;;  %v2868_v6 = vld [vmem:[%s4256_s1 + $0x10] ss:$8 sps:$4 sm:$0xff] (!%p140_p2)   ;;  %v2870_v8 = vld [vmem:[%s4256_s1 + $0x24] ss:$8 sps:$4 sm:$0xff] (!%p140_p2)  }
   0x8   : > { %2200 = vmatpush1.bf16.msra.mxu0 (!%p140_p2), %v2863_v3  ;;  %2029 = vmatprep.subr.bf16.mxu1 (!%p140_p2), %v2864_v4  ;;  %v2869_v7 = vld [vmem:[%s4256_s1 + $0x410] ss:$8 sps:$4 sm:$0xff] (!%p140_p2)   ;;  %v2872_v9 = vld [vmem:[%s4256_s1 + $0x424] ss:$8 sps:$4 sm:$0xff] (!%p140_p2)   ;;  %v2874_v10 = vld [vmem:[%s4256_s1 + $0x20] ss:$8 sps:$4 sm:$0xff] (!%p140_p2)  }
   0x9   : > { %2201 = vmatprep.subr.bf16.mxu0 (!%p140_p2), %v2866_v5  ;;  %v2875_v11 = vld [vmem:[%s4256_s1 + $0x420] ss:$8 sps:$4 sm:$0xff] (!%p140_p2)   ;;  %v2876_v12 = vld [vmem:[%s4256_s1 + $0x34] ss:$8 sps:$4 sm:$0xff] (!%p140_p2)   ;;  %v2880_v14 = vld [vmem:[%s4256_s1 + $0x30] ss:$8 sps:$4 sm:$0xff] (!%p140_p2)  }
   0xa   : > { %v2878_v13 = vld [vmem:[%s4256_s1 + $0x434] ss:$8 sps:$4 sm:$0xff] (!%p140_p2)   ;;  %v2881_v15 = vld [vmem:[%s4256_s1 + $0x430] ss:$8 sps:$4 sm:$0xff] (!%p140_p2)   ;;  %v2882_v16 = vld [vmem:[%s4256_s1 + $0x44] ss:$8 sps:$4 sm:$0xff] (!%p140_p2)  }
   0xb   : > { %2030 = vmatpush1.bf16.msra.mxu1 (!%p140_p2), %v2868_v6  ;;  %v2884_v17 = vld [vmem:[%s4256_s1 + $0x444] ss:$8 sps:$4 sm:$0xff] (!%p140_p2)   ;;  %v2886_v18 = vld [vmem:[%s4256_s1 + $0x40] ss:$8 sps:$4 sm:$0xff] (!%p140_p2)   ;;  %v2888_v20 = vld [vmem:[%s4256_s1 + $0x54] ss:$8 sps:$4 sm:$0xff] (!%p140_p2)  }
   0xc   : > { %2202 = vmatpush1.bf16.msra.mxu0 (!%p140_p2), %v2869_v7  ;;  %2031 = vmatprep.subr.bf16.mxu1 (!%p140_p2), %v2870_v8  ;;  %v2887_v19 = vld [vmem:[%s4256_s1 + $0x440] ss:$8 sps:$4 sm:$0xff] (!%p140_p2)   ;;  %v2890_v21 = vld [vmem:[%s4256_s1 + $0x454] ss:$8 sps:$4 sm:$0xff] (!%p140_p2)   ;;  %v2892_v22 = vld [vmem:[%s4256_s1 + $0x50] ss:$8 sps:$4 sm:$0xff] (!%p140_p2)  }
   0xd   : > { %2203 = vmatprep.subr.bf16.mxu0 %v2872_v9  ;;  %v2893_v23 = vld [vmem:[%s4256_s1 + $0x450] ss:$8 sps:$4 sm:$0xff]   ;;  %v2894_v24 = vld [vmem:[%s4256_s1 + $0x64] ss:$8 sps:$4 sm:$0xff]   ;;  %v2898_v26 = vld [vmem:[%s4256_s1 + $0x60] ss:$8 sps:$4 sm:$0xff]  }
   0xe   : > { %v2896_v25 = vld [vmem:[%s4256_s1 + $0x464] ss:$8 sps:$4 sm:$0xff]   ;;  %v2899_v27 = vld [vmem:[%s4256_s1 + $0x460] ss:$8 sps:$4 sm:$0xff]   ;;  %v2900_v28 = vld [vmem:[%s4256_s1 + $0x74] ss:$8 sps:$4 sm:$0xff]  }
   0xf   : > { %2032 = vmatpush1.bf16.msra.mxu1 %v2874_v10  ;;  %v2902_v29 = vld [vmem:[%s4256_s1 + $0x474] ss:$8 sps:$4 sm:$0xff]   ;;  %v2904_v30 = vld [vmem:[%s4256_s1 + $0x70] ss:$8 sps:$4 sm:$0xff]   ;;  %v2906_v32 = vld [vmem:[%s4256_s1 + $0x84] ss:$8 sps:$4 sm:$0xff]  }
  0x10   : > { %2204 = vmatpush1.bf16.msra.mxu0 %v2875_v11  ;;  %2033 = vmatprep.subr.bf16.mxu1 %v2876_v12  ;;  %v2905_v31 = vld [vmem:[%s4256_s1 + $0x470] ss:$8 sps:$4 sm:$0xff]   ;;  %p166_p3 = scmp.lt.s32.totalorder %s2495_s24, 3  ;;  %v2908_v33 = vld [vmem:[%s4256_s1 + $0x484] ss:$8 sps:$4 sm:$0xff]  }
  0x11   : > { %2205 = vmatprep.subr.bf16.mxu0 %v2878_v13  ;;  %v2910_v34 = vld [vmem:[%s4256_s1 + $0x80] ss:$8 sps:$4 sm:$0xff]   ;;  %v2912_v36 = vld [vmem:[%s4256_s1 + $0x94] ss:$8 sps:$4 sm:$0xff]   ;;  %v2916_v38 = vld [vmem:[%s4256_s1 + $0x90] ss:$8 sps:$4 sm:$0xff]  }
  0x12   : > { %v2911_v35 = vld [vmem:[%s4256_s1 + $0x480] ss:$8 sps:$4 sm:$0xff]   ;;  %s4260_s24 = smov (!%p166_p3, %s2495_s24), 3  ;;  %v2914_v37 = vld [vmem:[%s4256_s1 + $0x494] ss:$8 sps:$4 sm:$0xff]  }
  0x13   : > { %2034 = vmatpush1.bf16.msra.mxu1 %v2880_v14  ;;  %v2917_v39 = vld [vmem:[%s4256_s1 + $0x490] ss:$8 sps:$4 sm:$0xff]   ;;  %v2918_v40 = vld [vmem:[%s4256_s1 + $0xa4] ss:$8 sps:$4 sm:$0xff]   ;;  %s2849_s21 = smul.u32 72, %s4260_s24 }
  0x14   : > { %2206 = vmatpush1.bf16.msra.mxu0 %v2881_v15  ;;  %2035 = vmatprep.subr.bf16.mxu1 %v2882_v16  ;;  %v2920_v41 = vld [vmem:[%s4256_s1 + $0x4a4] ss:$8 sps:$4 sm:$0xff]   ;;  %v2922_v42 = vld [vmem:[%s4256_s1 + $0xa0] ss:$8 sps:$4 sm:$0xff]   ;;  %v2924_v44 = vld [vmem:[%s4256_s1 + $0xb4] ss:$8 sps:$4 sm:$0xff]  }
  0x15   : > { %2207 = vmatprep.subr.bf16.mxu0 %v2884_v17  ;;  %v2923_v43 = vld [vmem:[%s4256_s1 + $0x4a0] ss:$8 sps:$4 sm:$0xff]   ;;  %s3496_s13 = scalar_lea.vmem %s4255_s0, %s2849_s21  ;;  %v2926_v45 = vld [vmem:[%s4256_s1 + $0x4b4] ss:$8 sps:$4 sm:$0xff]   ;;  %v2928_v46 = vld [vmem:[%s4256_s1 + $0xb0] ss:$8 sps:$4 sm:$0xff]  }
  0x16   : > { %v2929_v47 = vld [vmem:[%s4256_s1 + $0x4b0] ss:$8 sps:$4 sm:$0xff]   ;;  %v2956_v48 = vld [vmem:[%s3496_s13 + $0x4] ss:$72 sps:$4 sm:$0xff]   ;;  %v2934_v52 = vld [vmem:[%s4256_s1 + $0xc0] ss:$8 sps:$4 sm:$0xff]  }
  0x17   : > { %2036 = vmatpush1.bf16.msra.mxu1 %v2886_v18  ;;  %v2930_v49 = vld [vmem:[%s4256_s1 + $0xc4] ss:$8 sps:$4 sm:$0xff]   ;;  %2059 = vmatprep.mubr.bf16.mxu1 %v2956_v48  ;;  %v2935_v53 = vld [vmem:[%s4256_s1 + $0x4c0] ss:$8 sps:$4 sm:$0xff]   ;;  %v2936_v54 = vld [vmem:[%s4256_s1 + $0xd4] ss:$8 sps:$4 sm:$0xff]  }
  0x18   : > { %2208 = vmatpush1.bf16.msra.mxu0 %v2887_v19  ;;  %2037 = vmatprep.subr.bf16.mxu1 %v2888_v20  ;;  %v2932_v50 = vld [vmem:[%s4256_s1 + $0x4c4] ss:$8 sps:$4 sm:$0xff]   ;;  %v2938_v55 = vld [vmem:[%s4256_s1 + $0x4d4] ss:$8 sps:$4 sm:$0xff]   ;;  %v2940_v56 = vld [vmem:[%s4256_s1 + $0xd0] ss:$8 sps:$4 sm:$0xff]  }
  0x19   : > { %2209 = vmatprep.subr.bf16.mxu0 %v2890_v21  ;;  %v2962_v51 = vld [vmem:[%s3496_s13 + $0x24] ss:$72 sps:$4 sm:$0xff]   ;;  %v2941_v57 = vld [vmem:[%s4256_s1 + $0x4d0] ss:$8 sps:$4 sm:$0xff]   ;;  %v2946_v60 = vld [vmem:[%s4256_s1 + $0xe0] ss:$8 sps:$4 sm:$0xff]  }
  0x1a   : > { %2231 = vmatprep.mubr.bf16.mxu0 %v2962_v51  ;;  %v2942_v58 = vld [vmem:[%s4256_s1 + $0xe4] ss:$8 sps:$4 sm:$0xff]   ;;  %v2947_v61 = vld [vmem:[%s4256_s1 + $0x4e0] ss:$8 sps:$4 sm:$0xff]   ;;  %v2948_v62 = vld [vmem:[%s4256_s1 + $0xf4] ss:$8 sps:$4 sm:$0xff]  }
  0x1b   : > { %2038 = vmatpush1.bf16.msra.mxu1 %v2892_v22  ;;  %v2944_v59 = vld [vmem:[%s4256_s1 + $0x4e4] ss:$8 sps:$4 sm:$0xff]   ;;  %v2950_v63 = vld [vmem:[%s4256_s1 + $0x4f4] ss:$8 sps:$4 sm:$0xff]   ;;  %v2952_v0 = vld [vmem:[%s4256_s1 + $0xf0] ss:$8 sps:$4 sm:$0xff]  }
  0x1c   : > { %2210 = vmatpush1.bf16.msra.mxu0 %v2893_v23  ;;  %2039 = vmatprep.subr.bf16.mxu1 %v2894_v24  ;;  %v2953_v1 = vld [vmem:[%s4256_s1 + $0x4f0] ss:$8 sps:$4 sm:$0xff]   ;;  %v2959_v2 = vld [vmem:[%s4256_s1 + $0x104] ss:$8 sps:$4 sm:$0xff]   ;;  %v2954_v4 = vld [vmem:[%s3496_s13] ss:$72 sps:$4 sm:$0xff]  }
  0x1d   : > { %2211 = vmatprep.subr.bf16.mxu0 %v2896_v25  ;;  %v2965_v3 = vld [vmem:[%s4256_s1 + $0x504] ss:$8 sps:$4 sm:$0xff]   ;;  %v2957_v5 = vld [vmem:[%s4256_s1 + $0x100] ss:$8 sps:$4 sm:$0xff]   ;;  %v2968_v8 = vld [vmem:[%s4256_s1 + $0x114] ss:$8 sps:$4 sm:$0xff]  }
  0x1e   : > { %v2960_v6 = vld [vmem:[%s3496_s13 + $0x20] ss:$72 sps:$4 sm:$0xff]   ;;  %v2971_v9 = vld [vmem:[%s4256_s1 + $0x514] ss:$8 sps:$4 sm:$0xff]   ;;  %v2966_v10 = vld [vmem:[%s4256_s1 + $0x110] ss:$8 sps:$4 sm:$0xff]  }
  0x1f   : > { %2040 = vmatpush1.bf16.msra.mxu1 %v2898_v26  ;;  %v2963_v7 = vld [vmem:[%s4256_s1 + $0x500] ss:$8 sps:$4 sm:$0xff]   ;;  %v2969_v11 = vld [vmem:[%s4256_s1 + $0x510] ss:$8 sps:$4 sm:$0xff]   ;;  %v2974_v12 = vld [vmem:[%s4256_s1 + $0x124] ss:$8 sps:$4 sm:$0xff]  }
  0x20   : > { %2212 = vmatpush1.bf16.msra.mxu0 %v2899_v27  ;;  %2041 = vmatprep.subr.bf16.mxu1 %v2900_v28  ;;  %v2977_v13 = vld [vmem:[%s4256_s1 + $0x524] ss:$8 sps:$4 sm:$0xff]   ;;  %v2972_v14 = vld [vmem:[%s4256_s1 + $0x120] ss:$8 sps:$4 sm:$0xff]   ;;  %v2980_v16 = vld [vmem:[%s4256_s1 + $0x134] ss:$8 sps:$4 sm:$0xff]  }
  0x21   : > { %2213 = vmatprep.subr.bf16.mxu0 %v2902_v29  ;;  %v2975_v15 = vld [vmem:[%s4256_s1 + $0x520] ss:$8 sps:$4 sm:$0xff]   ;;  %v2983_v17 = vld [vmem:[%s4256_s1 + $0x534] ss:$8 sps:$4 sm:$0xff]   ;;  %v2978_v18 = vld [vmem:[%s4256_s1 + $0x130] ss:$8 sps:$4 sm:$0xff]  }
  0x22   : > { %v2981_v19 = vld [vmem:[%s4256_s1 + $0x530] ss:$8 sps:$4 sm:$0xff]   ;;  %v2986_v20 = vld [vmem:[%s4256_s1 + $0x144] ss:$8 sps:$4 sm:$0xff]   ;;  %v2984_v22 = vld [vmem:[%s4256_s1 + $0x140] ss:$8 sps:$4 sm:$0xff]  }
  0x23   : > { %2042 = vmatpush1.bf16.msra.mxu1 %v2904_v30  ;;  %v2989_v21 = vld [vmem:[%s4256_s1 + $0x544] ss:$8 sps:$4 sm:$0xff]   ;;  %v2987_v23 = vld [vmem:[%s4256_s1 + $0x540] ss:$8 sps:$4 sm:$0xff]   ;;  %v2992_v24 = vld [vmem:[%s4256_s1 + $0x154] ss:$8 sps:$4 sm:$0xff]  }
  0x24   : > { %2214 = vmatpush1.bf16.msra.mxu0 %v2905_v31  ;;  %2043 = vmatprep.subr.bf16.mxu1 %v2906_v32  ;;  %v2995_v25 = vld [vmem:[%s4256_s1 + $0x554] ss:$8 sps:$4 sm:$0xff]   ;;  %v2990_v26 = vld [vmem:[%s4256_s1 + $0x150] ss:$8 sps:$4 sm:$0xff]   ;;  %v2998_v28 = vld [vmem:[%s4256_s1 + $0x164] ss:$8 sps:$4 sm:$0xff]  }
  0x25   : > { %2215 = vmatprep.subr.bf16.mxu0 %v2908_v33  ;;  %v2993_v27 = vld [vmem:[%s4256_s1 + $0x550] ss:$8 sps:$4 sm:$0xff]   ;;  %v3001_v29 = vld [vmem:[%s4256_s1 + $0x564] ss:$8 sps:$4 sm:$0xff]   ;;  %v2996_v30 = vld [vmem:[%s4256_s1 + $0x160] ss:$8 sps:$4 sm:$0xff]  }
  0x26   : > { %v2999_v31 = vld [vmem:[%s4256_s1 + $0x560] ss:$8 sps:$4 sm:$0xff]   ;;  %v3004_v32 = vld [vmem:[%s4256_s1 + $0x174] ss:$8 sps:$4 sm:$0xff]  }
  0x27   : > { %2044 = vmatpush1.bf16.msra.mxu1 %v2910_v34  ;;  %v3007_v33 = vld [vmem:[%s4256_s1 + $0x574] ss:$8 sps:$4 sm:$0xff]   ;;  %v3020_v48 = vld [vmem:[%s4256_s1 + $0x1a0] ss:$8 sps:$4 sm:$0xff]  }
  0x28   : > { %2216 = vmatpush1.bf16.msra.mxu0 %v2911_v35  ;;  %2045 = vmatprep.subr.bf16.mxu1 %v2912_v36  ;;  %v3058_v34 = vld [vmem:[%s3496_s13 + $0xc] ss:$72 sps:$4 sm:$0xff]   ;;  %v3002_v35 = vld [vmem:[%s4256_s1 + $0x170] ss:$8 sps:$4 sm:$0xff]  }
  0x29   : > { %2217 = vmatprep.subr.bf16.mxu0 %v2914_v37  ;;  %v3005_v36 = vld [vmem:[%s4256_s1 + $0x570] ss:$8 sps:$4 sm:$0xff]   ;;  %v3064_v37 = vld [vmem:[%s3496_s13 + $0x2c] ss:$72 sps:$4 sm:$0xff]  }
  0x2a   : > { %v3031_v51 = vld [vmem:[%s4256_s1 + $0x5b4] ss:$8 sps:$4 sm:$0xff]  }
  0x2b   : > { %2046 = vmatpush1.bf16.msra.mxu1 %v2916_v38  ;;  %v3010_v38 = vld [vmem:[%s4256_s1 + $0x184] ss:$8 sps:$4 sm:$0xff]  }
  0x2c   : > { %2218 = vmatpush1.bf16.msra.mxu0 %v2917_v39  ;;  %2047 = vmatprep.subr.bf16.mxu1 %v2918_v40  ;;  %v3013_v39 = vld [vmem:[%s4256_s1 + $0x584] ss:$8 sps:$4 sm:$0xff]   ;;  %v3008_v40 = vld [vmem:[%s4256_s1 + $0x180] ss:$8 sps:$4 sm:$0xff]  }
  0x2d   : > { %2219 = vmatprep.subr.bf16.mxu0 %v2920_v41  ;;  %v3011_v41 = vld [vmem:[%s4256_s1 + $0x580] ss:$8 sps:$4 sm:$0xff]  }
  0x2f   : > { %2048 = vmatpush1.bf16.msra.mxu1 %v2922_v42  ;;  %v3016_v42 = vld [vmem:[%s4256_s1 + $0x194] ss:$8 sps:$4 sm:$0xff]  }
  0x30   : > { %2220 = vmatpush1.bf16.msra.mxu0 %v2923_v43  ;;  %2049 = vmatprep.subr.bf16.mxu1 %v2924_v44  ;;  %v3019_v43 = vld [vmem:[%s4256_s1 + $0x594] ss:$8 sps:$4 sm:$0xff]   ;;  %v3014_v44 = vld [vmem:[%s4256_s1 + $0x190] ss:$8 sps:$4 sm:$0xff]  }
  0x31   : > { %2221 = vmatprep.subr.bf16.mxu0 %v2926_v45  ;;  %v3017_v45 = vld [vmem:[%s4256_s1 + $0x590] ss:$8 sps:$4 sm:$0xff]  }
  0x33   : > { %2050 = vmatpush1.bf16.msra.mxu1 %v2928_v46  ;;  %v3022_v46 = vld [vmem:[%s4256_s1 + $0x1a4] ss:$8 sps:$4 sm:$0xff]  }
  0x34   : > { %2222 = vmatpush1.bf16.msra.mxu0 %v2929_v47  ;;  %2051 = vmatprep.subr.bf16.mxu1 %v2930_v49  ;;  %v3025_v47 = vld [vmem:[%s4256_s1 + $0x5a4] ss:$8 sps:$4 sm:$0xff]   ;;  %v3023_v49 = vld [vmem:[%s4256_s1 + $0x5a0] ss:$8 sps:$4 sm:$0xff]  }
  0x35   : > { %2223 = vmatprep.subr.bf16.mxu0 %v2932_v50  ;;  %v3028_v50 = vld [vmem:[%s4256_s1 + $0x1b4] ss:$8 sps:$4 sm:$0xff]  }
  0x37   : > { %2052 = vmatpush1.bf16.msra.mxu1 %v2934_v52  ;;  %v3026_v52 = vld [vmem:[%s4256_s1 + $0x1b0] ss:$8 sps:$4 sm:$0xff]  }
  0x38   : > { %2224 = vmatpush1.bf16.msra.mxu0 %v2935_v53  ;;  %2053 = vmatprep.subr.bf16.mxu1 %v2936_v54  ;;  %v3029_v53 = vld [vmem:[%s4256_s1 + $0x5b0] ss:$8 sps:$4 sm:$0xff]   ;;  %v3034_v54 = vld [vmem:[%s4256_s1 + $0x1c4] ss:$8 sps:$4 sm:$0xff]  }
  0x39   : > { %2225 = vmatprep.subr.bf16.mxu0 %v2938_v55  ;;  %v3037_v55 = vld [vmem:[%s4256_s1 + $0x5c4] ss:$8 sps:$4 sm:$0xff]  }
  0x3b   : > { %2054 = vmatpush1.bf16.msra.mxu1 %v2940_v56  ;;  %v3032_v56 = vld [vmem:[%s4256_s1 + $0x1c0] ss:$8 sps:$4 sm:$0xff]  }
  0x3c   : > { %2226 = vmatpush1.bf16.msra.mxu0 %v2941_v57  ;;  %2055 = vmatprep.subr.bf16.mxu1 %v2942_v58  ;;  %v3035_v57 = vld [vmem:[%s4256_s1 + $0x5c0] ss:$8 sps:$4 sm:$0xff]   ;;  %v3040_v58 = vld [vmem:[%s4256_s1 + $0x1d4] ss:$8 sps:$4 sm:$0xff]  }
  0x3d   : > { %2227 = vmatprep.subr.bf16.mxu0 %v2944_v59  ;;  %v3043_v59 = vld [vmem:[%s4256_s1 + $0x5d4] ss:$8 sps:$4 sm:$0xff]  }
  0x3f   : > { %2056 = vmatpush1.bf16.msra.mxu1 %v2946_v60  ;;  %v3038_v60 = vld [vmem:[%s4256_s1 + $0x1d0] ss:$8 sps:$4 sm:$0xff]  }
  0x40   : > { %2228 = vmatpush1.bf16.msra.mxu0 %v2947_v61  ;;  %2057 = vmatprep.subr.bf16.mxu1 %v2948_v62  ;;  %v3041_v61 = vld [vmem:[%s4256_s1 + $0x5d0] ss:$8 sps:$4 sm:$0xff]   ;;  %v3046_v62 = vld [vmem:[%s4256_s1 + $0x1e4] ss:$8 sps:$4 sm:$0xff]  }
  0x41   : > { %2229 = vmatprep.subr.bf16.mxu0 %v2950_v63  ;;  %v3049_v63 = vld [vmem:[%s4256_s1 + $0x5e4] ss:$8 sps:$4 sm:$0xff]  }
  0x43   : > { %2058 = vmatpush1.bf16.msra.mxu1 %v2952_v0  ;;  %v3044_v0 = vld [vmem:[%s4256_s1 + $0x1e0] ss:$8 sps:$4 sm:$0xff]  }
  0x44   : > { %2230 = vmatpush1.bf16.msra.mxu0 %v2953_v1  ;;  %2070 = vmatprep.subr.bf16.mxu1 %v2959_v2  ;;  %v3047_v1 = vld [vmem:[%s4256_s1 + $0x5e0] ss:$8 sps:$4 sm:$0xff]   ;;  %v3052_v2 = vld [vmem:[%s4256_s1 + $0x1f4] ss:$8 sps:$4 sm:$0xff]  }
  0x45   : > { %2242 = vmatprep.subr.bf16.mxu0 %v2965_v3  ;;  %v3055_v3 = vld [vmem:[%s4256_s1 + $0x5f4] ss:$8 sps:$4 sm:$0xff]  }
  0x46   : > { %2060 = vmatmul.mubr.bf16.vlgmr.msra.gmra.mrb[0].mxu1 %v2954_v4  ;;  %v3050_v4 = vld [vmem:[%s4256_s1 + $0x1f0] ss:$8 sps:$4 sm:$0xff]  }
  0x47   : > { %2232 = vmatmul.mubr.bf16.vlgmr.msra.gmra.mrb[0].mxu0 %v2960_v6  ;;  %2071 = vmatpush1.bf16.msra.mxu1 %v2957_v5  ;;  %v3053_v5 = vld [vmem:[%s4256_s1 + $0x5f0] ss:$8 sps:$4 sm:$0xff]   ;;  %v3061_v6 = vld [vmem:[%s4256_s1 + $0x204] ss:$8 sps:$4 sm:$0xff]  }
  0x48   : > { %2243 = vmatpush1.bf16.msra.mxu0 %v2963_v7  ;;  %2072 = vmatprep.subr.bf16.mxu1 %v2968_v8  ;;  %v3067_v7 = vld [vmem:[%s4256_s1 + $0x604] ss:$8 sps:$4 sm:$0xff]   ;;  %v3056_v8 = vld [vmem:[%s3496_s13 + $0x8] ss:$72 sps:$4 sm:$0xff]  }
  0x49   : > { %2244 = vmatprep.subr.bf16.mxu0 %v2971_v9  ;;  %2102 = vmatprep.mubr.bf16.mxu1 %v3058_v34  ;;  %v3059_v9 = vld [vmem:[%s4256_s1 + $0x200] ss:$8 sps:$4 sm:$0xff]   ;;  %v3100_v34 = vld [vmem:[%s4256_s1 + $0x264] ss:$8 sps:$4 sm:$0xff]  }
  0x4a   : > { %2274 = vmatprep.mubr.bf16.mxu0 %v3064_v37  ;;  %v3101_v37 = vld [vmem:[%s4256_s1 + $0x660] ss:$8 sps:$4 sm:$0xff]  }
  0x4b   : > { %2073 = vmatpush1.bf16.msra.mxu1 %v2966_v10  ;;  %v3062_v10 = vld [vmem:[%s3496_s13 + $0x28] ss:$72 sps:$4 sm:$0xff]  }
  0x4c   : > { %2245 = vmatpush1.bf16.msra.mxu0 %v2969_v11  ;;  %2074 = vmatprep.subr.bf16.mxu1 %v2974_v12  ;;  %v3065_v11 = vld [vmem:[%s4256_s1 + $0x600] ss:$8 sps:$4 sm:$0xff]   ;;  %v3070_v12 = vld [vmem:[%s4256_s1 + $0x214] ss:$8 sps:$4 sm:$0xff]  }
  0x4d   : > { %2246 = vmatprep.subr.bf16.mxu0 %v2977_v13  ;;  %v3073_v13 = vld [vmem:[%s4256_s1 + $0x614] ss:$8 sps:$4 sm:$0xff]  }
  0x4f   : > { %2075 = vmatpush1.bf16.msra.mxu1 %v2972_v14  ;;  %v3068_v14 = vld [vmem:[%s4256_s1 + $0x210] ss:$8 sps:$4 sm:$0xff]  }
  0x50   : > { %2247 = vmatpush1.bf16.msra.mxu0 %v2975_v15  ;;  %2076 = vmatprep.subr.bf16.mxu1 %v2980_v16  ;;  %v3071_v15 = vld [vmem:[%s4256_s1 + $0x610] ss:$8 sps:$4 sm:$0xff]   ;;  %v3076_v16 = vld [vmem:[%s4256_s1 + $0x224] ss:$8 sps:$4 sm:$0xff]  }
  0x51   : > { %2248 = vmatprep.subr.bf16.mxu0 %v2983_v17  ;;  %v3079_v17 = vld [vmem:[%s4256_s1 + $0x624] ss:$8 sps:$4 sm:$0xff]  }
  0x53   : > { %2077 = vmatpush1.bf16.msra.mxu1 %v2978_v18  ;;  %v3074_v18 = vld [vmem:[%s4256_s1 + $0x220] ss:$8 sps:$4 sm:$0xff]  }
  0x54   : > { %2249 = vmatpush1.bf16.msra.mxu0 %v2981_v19  ;;  %2078 = vmatprep.subr.bf16.mxu1 %v2986_v20  ;;  %v3160_v19 = vld [vmem:[%s3496_s13 + $0x14] ss:$72 sps:$4 sm:$0xff]   ;;  %v3077_v20 = vld [vmem:[%s4256_s1 + $0x620] ss:$8 sps:$4 sm:$0xff]  }
  0x55   : > { %2250 = vmatprep.subr.bf16.mxu0 %v2989_v21  ;;  %v3082_v21 = vld [vmem:[%s4256_s1 + $0x234] ss:$8 sps:$4 sm:$0xff]  }
  0x57   : > { %2079 = vmatpush1.bf16.msra.mxu1 %v2984_v22  ;;  %v3085_v22 = vld [vmem:[%s4256_s1 + $0x634] ss:$8 sps:$4 sm:$0xff]  }
  0x58   : > { %2251 = vmatpush1.bf16.msra.mxu0 %v2987_v23  ;;  %2080 = vmatprep.subr.bf16.mxu1 %v2992_v24  ;;  %v3166_v23 = vld [vmem:[%s3496_s13 + $0x34] ss:$72 sps:$4 sm:$0xff]   ;;  %v3080_v24 = vld [vmem:[%s4256_s1 + $0x230] ss:$8 sps:$4 sm:$0xff]  }
  0x59   : > { %2252 = vmatprep.subr.bf16.mxu0 %v2995_v25  ;;  %v3083_v25 = vld [vmem:[%s4256_s1 + $0x630] ss:$8 sps:$4 sm:$0xff]  }
  0x5b   : > { %2081 = vmatpush1.bf16.msra.mxu1 %v2990_v26  ;;  %v3088_v26 = vld [vmem:[%s4256_s1 + $0x244] ss:$8 sps:$4 sm:$0xff]  }
  0x5c   : > { %2253 = vmatpush1.bf16.msra.mxu0 %v2993_v27  ;;  %2082 = vmatprep.subr.bf16.mxu1 %v2998_v28  ;;  %v3091_v27 = vld [vmem:[%s4256_s1 + $0x644] ss:$8 sps:$4 sm:$0xff]   ;;  %v3086_v28 = vld [vmem:[%s4256_s1 + $0x240] ss:$8 sps:$4 sm:$0xff]  }
  0x5d   : > { %2254 = vmatprep.subr.bf16.mxu0 %v3001_v29  ;;  %v3089_v29 = vld [vmem:[%s4256_s1 + $0x640] ss:$8 sps:$4 sm:$0xff]  }
  0x5f   : > { %2083 = vmatpush1.bf16.msra.mxu1 %v2996_v30  ;;  %v3094_v30 = vld [vmem:[%s4256_s1 + $0x254] ss:$8 sps:$4 sm:$0xff]  }
  0x60   : > { %2255 = vmatpush1.bf16.msra.mxu0 %v2999_v31  ;;  %2084 = vmatprep.subr.bf16.mxu1 %v3004_v32  ;;  %v3097_v31 = vld [vmem:[%s4256_s1 + $0x654] ss:$8 sps:$4 sm:$0xff]   ;;  %v3092_v32 = vld [vmem:[%s4256_s1 + $0x250] ss:$8 sps:$4 sm:$0xff]  }
  0x61   : > { %2256 = vmatprep.subr.bf16.mxu0 %v3007_v33  ;;  %v3095_v33 = vld [vmem:[%s4256_s1 + $0x650] ss:$8 sps:$4 sm:$0xff]  }
  0x63   : > { %2085 = vmatpush1.bf16.msra.mxu1 %v3002_v35  ;;  %v3103_v35 = vld [vmem:[%s4256_s1 + $0x664] ss:$8 sps:$4 sm:$0xff]  }
  0x64   : > { %2257 = vmatpush1.bf16.msra.mxu0 %v3005_v36  ;;  %2086 = vmatprep.subr.bf16.mxu1 %v3010_v38  ;;  %v3098_v36 = vld [vmem:[%s4256_s1 + $0x260] ss:$8 sps:$4 sm:$0xff]   ;;  %v3106_v38 = vld [vmem:[%s4256_s1 + $0x274] ss:$8 sps:$4 sm:$0xff]  }
  0x65   : > { %2258 = vmatprep.subr.bf16.mxu0 %v3013_v39  ;;  %v3109_v39 = vld [vmem:[%s4256_s1 + $0x674] ss:$8 sps:$4 sm:$0xff]  }
  0x67   : > { %2087 = vmatpush1.bf16.msra.mxu1 %v3008_v40  ;;  %v3104_v40 = vld [vmem:[%s4256_s1 + $0x270] ss:$8 sps:$4 sm:$0xff]  }
  0x68   : > { %2259 = vmatpush1.bf16.msra.mxu0 %v3011_v41  ;;  %2088 = vmatprep.subr.bf16.mxu1 %v3016_v42  ;;  %v3107_v41 = vld [vmem:[%s4256_s1 + $0x670] ss:$8 sps:$4 sm:$0xff]   ;;  %v3112_v42 = vld [vmem:[%s4256_s1 + $0x284] ss:$8 sps:$4 sm:$0xff]  }
  0x69   : > { %2260 = vmatprep.subr.bf16.mxu0 %v3019_v43  ;;  %v3115_v43 = vld [vmem:[%s4256_s1 + $0x684] ss:$8 sps:$4 sm:$0xff]  }
  0x6b   : > { %2089 = vmatpush1.bf16.msra.mxu1 %v3014_v44  ;;  %v3110_v44 = vld [vmem:[%s4256_s1 + $0x280] ss:$8 sps:$4 sm:$0xff]  }
  0x6c   : > { %2261 = vmatpush1.bf16.msra.mxu0 %v3017_v45  ;;  %2090 = vmatprep.subr.bf16.mxu1 %v3022_v46  ;;  %v3113_v45 = vld [vmem:[%s4256_s1 + $0x680] ss:$8 sps:$4 sm:$0xff]   ;;  %v3118_v46 = vld [vmem:[%s4256_s1 + $0x294] ss:$8 sps:$4 sm:$0xff]  }
  0x6d   : > { %2262 = vmatprep.subr.bf16.mxu0 %v3025_v47  ;;  %v3121_v47 = vld [vmem:[%s4256_s1 + $0x694] ss:$8 sps:$4 sm:$0xff]  }
  0x6f   : > { %2091 = vmatpush1.bf16.msra.mxu1 %v3020_v48  ;;  %v3116_v48 = vld [vmem:[%s4256_s1 + $0x290] ss:$8 sps:$4 sm:$0xff]  }
  0x70   : > { %2263 = vmatpush1.bf16.msra.mxu0 %v3023_v49  ;;  %2092 = vmatprep.subr.bf16.mxu1 %v3028_v50  ;;  %v3119_v49 = vld [vmem:[%s4256_s1 + $0x690] ss:$8 sps:$4 sm:$0xff]   ;;  %v3124_v50 = vld [vmem:[%s4256_s1 + $0x2a4] ss:$8 sps:$4 sm:$0xff]  }
  0x71   : > { %2264 = vmatprep.subr.bf16.mxu0 %v3031_v51  ;;  %v3127_v51 = vld [vmem:[%s4256_s1 + $0x6a4] ss:$8 sps:$4 sm:$0xff]  }
  0x73   : > { %2093 = vmatpush1.bf16.msra.mxu1 %v3026_v52  ;;  %v3122_v52 = vld [vmem:[%s4256_s1 + $0x2a0] ss:$8 sps:$4 sm:$0xff]  }
  0x74   : > { %2265 = vmatpush1.bf16.msra.mxu0 %v3029_v53  ;;  %2094 = vmatprep.subr.bf16.mxu1 %v3034_v54  ;;  %v3125_v53 = vld [vmem:[%s4256_s1 + $0x6a0] ss:$8 sps:$4 sm:$0xff]   ;;  %v3130_v54 = vld [vmem:[%s4256_s1 + $0x2b4] ss:$8 sps:$4 sm:$0xff]  }
  0x75   : > { %2266 = vmatprep.subr.bf16.mxu0 %v3037_v55  ;;  %v3133_v55 = vld [vmem:[%s4256_s1 + $0x6b4] ss:$8 sps:$4 sm:$0xff]  }
  0x77   : > { %2095 = vmatpush1.bf16.msra.mxu1 %v3032_v56  ;;  %v3128_v56 = vld [vmem:[%s4256_s1 + $0x2b0] ss:$8 sps:$4 sm:$0xff]  }
  0x78   : > { %2267 = vmatpush1.bf16.msra.mxu0 %v3035_v57  ;;  %2096 = vmatprep.subr.bf16.mxu1 %v3040_v58  ;;  %v3131_v57 = vld [vmem:[%s4256_s1 + $0x6b0] ss:$8 sps:$4 sm:$0xff]   ;;  %v3136_v58 = vld [vmem:[%s4256_s1 + $0x2c4] ss:$8 sps:$4 sm:$0xff]  }
  0x79   : > { %2268 = vmatprep.subr.bf16.mxu0 %v3043_v59  ;;  %v3139_v59 = vld [vmem:[%s4256_s1 + $0x6c4] ss:$8 sps:$4 sm:$0xff]  }
  0x7b   : > { %2097 = vmatpush1.bf16.msra.mxu1 %v3038_v60  ;;  %v3134_v60 = vld [vmem:[%s4256_s1 + $0x2c0] ss:$8 sps:$4 sm:$0xff]  }
  0x7c   : > { %2269 = vmatpush1.bf16.msra.mxu0 %v3041_v61  ;;  %2098 = vmatprep.subr.bf16.mxu1 %v3046_v62  ;;  %v3137_v61 = vld [vmem:[%s4256_s1 + $0x6c0] ss:$8 sps:$4 sm:$0xff]   ;;  %v3142_v62 = vld [vmem:[%s4256_s1 + $0x2d4] ss:$8 sps:$4 sm:$0xff]  }
  0x7d   : > { %2270 = vmatprep.subr.bf16.mxu0 %v3049_v63  ;;  %v3145_v63 = vld [vmem:[%s4256_s1 + $0x6d4] ss:$8 sps:$4 sm:$0xff]  }
  0x7f   : > { %2099 = vmatpush1.bf16.msra.mxu1 %v3044_v0  ;;  %v3140_v0 = vld [vmem:[%s4256_s1 + $0x2d0] ss:$8 sps:$4 sm:$0xff]  }
  0x80   : > { %2271 = vmatpush1.bf16.msra.mxu0 %v3047_v1  ;;  %2100 = vmatprep.subr.bf16.mxu1 %v3052_v2  ;;  %v3143_v1 = vld [vmem:[%s4256_s1 + $0x6d0] ss:$8 sps:$4 sm:$0xff]   ;;  %v3148_v2 = vld [vmem:[%s4256_s1 + $0x2e4] ss:$8 sps:$4 sm:$0xff]  }
  0x81   : > { %2272 = vmatprep.subr.bf16.mxu0 %v3055_v3  ;;  %v3151_v3 = vld [vmem:[%s4256_s1 + $0x6e4] ss:$8 sps:$4 sm:$0xff]  }
  0x83   : > { %2101 = vmatpush1.bf16.msra.mxu1 %v3050_v4  ;;  %v3146_v4 = vld [vmem:[%s4256_s1 + $0x2e0] ss:$8 sps:$4 sm:$0xff]  }
  0x84   : > { %2273 = vmatpush1.bf16.msra.mxu0 %v3053_v5  ;;  %2113 = vmatprep.subr.bf16.mxu1 %v3061_v6  ;;  %v3149_v5 = vld [vmem:[%s4256_s1 + $0x6e0] ss:$8 sps:$4 sm:$0xff]   ;;  %v3154_v6 = vld [vmem:[%s4256_s1 + $0x2f4] ss:$8 sps:$4 sm:$0xff]  }
  0x85   : > { %2285 = vmatprep.subr.bf16.mxu0 %v3067_v7  ;;  %v3157_v7 = vld [vmem:[%s4256_s1 + $0x6f4] ss:$8 sps:$4 sm:$0xff]  }
  0x86   : > { %2103 = vmatmul.mubr.bf16.vlgmr.msra.gmra.mrb[0].mxu1 %v3056_v8  ;;  %v3152_v8 = vld [vmem:[%s4256_s1 + $0x2f0] ss:$8 sps:$4 sm:$0xff]  }
  0x87   : > { %2275 = vmatmul.mubr.bf16.vlgmr.msra.gmra.mrb[0].mxu0 %v3062_v10  ;;  %2114 = vmatpush1.bf16.msra.mxu1 %v3059_v9  ;;  %v3155_v9 = vld [vmem:[%s4256_s1 + $0x6f0] ss:$8 sps:$4 sm:$0xff]   ;;  %v3163_v10 = vld [vmem:[%s4256_s1 + $0x304] ss:$8 sps:$4 sm:$0xff]  }
  0x88   : > { %2286 = vmatpush1.bf16.msra.mxu0 %v3065_v11  ;;  %2115 = vmatprep.subr.bf16.mxu1 %v3070_v12  ;;  %v3169_v11 = vld [vmem:[%s4256_s1 + $0x704] ss:$8 sps:$4 sm:$0xff]   ;;  %v3158_v12 = vld [vmem:[%s3496_s13 + $0x10] ss:$72 sps:$4 sm:$0xff]  }
  0x89   : > { %2287 = vmatprep.subr.bf16.mxu0 %v3073_v13  ;;  %2145 = vmatprep.mubr.bf16.mxu1 %v3160_v19  ;;  %v3161_v13 = vld [vmem:[%s4256_s1 + $0x300] ss:$8 sps:$4 sm:$0xff]   ;;  %v3265_v19 = vld [vmem:[%s3496_s13 + $0x3c] ss:$72 sps:$4 sm:$0xff]  }
  0x8a   : > { %2317 = vmatprep.mubr.bf16.mxu0 %v3166_v23  ;;  %v3181_v23 = vld [vmem:[%s4256_s1 + $0x724] ss:$8 sps:$4 sm:$0xff]  }
  0x8b   : > { %2116 = vmatpush1.bf16.msra.mxu1 %v3068_v14  ;;  %v3164_v14 = vld [vmem:[%s3496_s13 + $0x30] ss:$72 sps:$4 sm:$0xff]  }
  0x8c   : > { %2288 = vmatpush1.bf16.msra.mxu0 %v3071_v15  ;;  %2117 = vmatprep.subr.bf16.mxu1 %v3076_v16  ;;  %v3167_v15 = vld [vmem:[%s4256_s1 + $0x700] ss:$8 sps:$4 sm:$0xff]   ;;  %v3172_v16 = vld [vmem:[%s4256_s1 + $0x314] ss:$8 sps:$4 sm:$0xff]  }
  0x8d   : > { %2289 = vmatprep.subr.bf16.mxu0 %v3079_v17  ;;  %v3175_v17 = vld [vmem:[%s4256_s1 + $0x714] ss:$8 sps:$4 sm:$0xff]  }
  0x8f   : > { %2118 = vmatpush1.bf16.msra.mxu1 %v3074_v18  ;;  %v3262_v18 = vld [vmem:[%s3496_s13 + $0x1c] ss:$72 sps:$4 sm:$0xff]  }
  0x90   : > { %2290 = vmatpush1.bf16.msra.mxu0 %v3077_v20  ;;  %2119 = vmatprep.subr.bf16.mxu1 %v3082_v21  ;;  %v3170_v20 = vld [vmem:[%s4256_s1 + $0x310] ss:$8 sps:$4 sm:$0xff]  }
  0x91   : > { %2291 = vmatprep.subr.bf16.mxu0 %v3085_v22  ;;  %v3173_v21 = vld [vmem:[%s4256_s1 + $0x710] ss:$8 sps:$4 sm:$0xff]   ;;  %v3178_v22 = vld [vmem:[%s4256_s1 + $0x324] ss:$8 sps:$4 sm:$0xff]  }
  0x93   : > { %2120 = vmatpush1.bf16.msra.mxu1 %v3080_v24  ;;  %v3176_v24 = vld [vmem:[%s4256_s1 + $0x320] ss:$8 sps:$4 sm:$0xff]  }
  0x94   : > { %2292 = vmatpush1.bf16.msra.mxu0 %v3083_v25  ;;  %2121 = vmatprep.subr.bf16.mxu1 %v3088_v26  ;;  %v3179_v25 = vld [vmem:[%s4256_s1 + $0x720] ss:$8 sps:$4 sm:$0xff]   ;;  %v3184_v26 = vld [vmem:[%s4256_s1 + $0x334] ss:$8 sps:$4 sm:$0xff]  }
  0x95   : > { %2293 = vmatprep.subr.bf16.mxu0 %v3091_v27  ;;  %v3187_v27 = vld [vmem:[%s4256_s1 + $0x734] ss:$8 sps:$4 sm:$0xff]  }
  0x97   : > { %2122 = vmatpush1.bf16.msra.mxu1 %v3086_v28  ;;  %v3182_v28 = vld [vmem:[%s4256_s1 + $0x330] ss:$8 sps:$4 sm:$0xff]  }
  0x98   : > { %2294 = vmatpush1.bf16.msra.mxu0 %v3089_v29  ;;  %2123 = vmatprep.subr.bf16.mxu1 %v3094_v30  ;;  %v3185_v29 = vld [vmem:[%s4256_s1 + $0x730] ss:$8 sps:$4 sm:$0xff]   ;;  %v3190_v30 = vld [vmem:[%s4256_s1 + $0x344] ss:$8 sps:$4 sm:$0xff]  }
  0x99   : > { %2295 = vmatprep.subr.bf16.mxu0 %v3097_v31  ;;  %v3193_v31 = vld [vmem:[%s4256_s1 + $0x744] ss:$8 sps:$4 sm:$0xff]  }
  0x9b   : > { %2124 = vmatpush1.bf16.msra.mxu1 %v3092_v32  ;;  %v3188_v32 = vld [vmem:[%s4256_s1 + $0x340] ss:$8 sps:$4 sm:$0xff]  }
  0x9c   : > { %2296 = vmatpush1.bf16.msra.mxu0 %v3095_v33  ;;  %2125 = vmatprep.subr.bf16.mxu1 %v3100_v34  ;;  %v3191_v33 = vld [vmem:[%s4256_s1 + $0x740] ss:$8 sps:$4 sm:$0xff]   ;;  %v3196_v34 = vld [vmem:[%s4256_s1 + $0x354] ss:$8 sps:$4 sm:$0xff]  }
  0x9d   : > { %2297 = vmatprep.subr.bf16.mxu0 %v3103_v35  ;;  %v3199_v35 = vld [vmem:[%s4256_s1 + $0x754] ss:$8 sps:$4 sm:$0xff]  }
  0x9f   : > { %2126 = vmatpush1.bf16.msra.mxu1 %v3098_v36  ;;  %v3194_v36 = vld [vmem:[%s4256_s1 + $0x350] ss:$8 sps:$4 sm:$0xff]  }
  0xa0   : > { %2298 = vmatpush1.bf16.msra.mxu0 %v3101_v37  ;;  %2127 = vmatprep.subr.bf16.mxu1 %v3106_v38  ;;  %v3197_v37 = vld [vmem:[%s4256_s1 + $0x750] ss:$8 sps:$4 sm:$0xff]   ;;  %v3202_v38 = vld [vmem:[%s4256_s1 + $0x364] ss:$8 sps:$4 sm:$0xff]  }
  0xa1   : > { %2299 = vmatprep.subr.bf16.mxu0 %v3109_v39  ;;  %v3205_v39 = vld [vmem:[%s4256_s1 + $0x764] ss:$8 sps:$4 sm:$0xff]  }
  0xa3   : > { %2128 = vmatpush1.bf16.msra.mxu1 %v3104_v40  ;;  %v3200_v40 = vld [vmem:[%s4256_s1 + $0x360] ss:$8 sps:$4 sm:$0xff]  }
  0xa4   : > { %2300 = vmatpush1.bf16.msra.mxu0 %v3107_v41  ;;  %2129 = vmatprep.subr.bf16.mxu1 %v3112_v42  ;;  %v3203_v41 = vld [vmem:[%s4256_s1 + $0x760] ss:$8 sps:$4 sm:$0xff]   ;;  %v3208_v42 = vld [vmem:[%s4256_s1 + $0x374] ss:$8 sps:$4 sm:$0xff]  }
  0xa5   : > { %2301 = vmatprep.subr.bf16.mxu0 %v3115_v43  ;;  %v3211_v43 = vld [vmem:[%s4256_s1 + $0x774] ss:$8 sps:$4 sm:$0xff]  }
  0xa7   : > { %2130 = vmatpush1.bf16.msra.mxu1 %v3110_v44  ;;  %v3206_v44 = vld [vmem:[%s4256_s1 + $0x370] ss:$8 sps:$4 sm:$0xff]  }
  0xa8   : > { %2302 = vmatpush1.bf16.msra.mxu0 %v3113_v45  ;;  %2131 = vmatprep.subr.bf16.mxu1 %v3118_v46  ;;  %v3209_v45 = vld [vmem:[%s4256_s1 + $0x770] ss:$8 sps:$4 sm:$0xff]   ;;  %v3214_v46 = vld [vmem:[%s4256_s1 + $0x384] ss:$8 sps:$4 sm:$0xff]  }
  0xa9   : > { %2303 = vmatprep.subr.bf16.mxu0 %v3121_v47  ;;  %v3217_v47 = vld [vmem:[%s4256_s1 + $0x784] ss:$8 sps:$4 sm:$0xff]  }
  0xab   : > { %2132 = vmatpush1.bf16.msra.mxu1 %v3116_v48  ;;  %v3212_v48 = vld [vmem:[%s4256_s1 + $0x380] ss:$8 sps:$4 sm:$0xff]  }
  0xac   : > { %2304 = vmatpush1.bf16.msra.mxu0 %v3119_v49  ;;  %2133 = vmatprep.subr.bf16.mxu1 %v3124_v50  ;;  %v3215_v49 = vld [vmem:[%s4256_s1 + $0x780] ss:$8 sps:$4 sm:$0xff]   ;;  %v3220_v50 = vld [vmem:[%s4256_s1 + $0x394] ss:$8 sps:$4 sm:$0xff]  }
  0xad   : > { %2305 = vmatprep.subr.bf16.mxu0 %v3127_v51  ;;  %v3223_v51 = vld [vmem:[%s4256_s1 + $0x794] ss:$8 sps:$4 sm:$0xff]  }
  0xaf   : > { %2134 = vmatpush1.bf16.msra.mxu1 %v3122_v52  ;;  %v3218_v52 = vld [vmem:[%s4256_s1 + $0x390] ss:$8 sps:$4 sm:$0xff]  }
  0xb0   : > { %2306 = vmatpush1.bf16.msra.mxu0 %v3125_v53  ;;  %2135 = vmatprep.subr.bf16.mxu1 %v3130_v54  ;;  %v3221_v53 = vld [vmem:[%s4256_s1 + $0x790] ss:$8 sps:$4 sm:$0xff]   ;;  %v3226_v54 = vld [vmem:[%s4256_s1 + $0x3a4] ss:$8 sps:$4 sm:$0xff]  }
  0xb1   : > { %2307 = vmatprep.subr.bf16.mxu0 %v3133_v55  ;;  %v3229_v55 = vld [vmem:[%s4256_s1 + $0x7a4] ss:$8 sps:$4 sm:$0xff]  }
  0xb3   : > { %2136 = vmatpush1.bf16.msra.mxu1 %v3128_v56  ;;  %v3224_v56 = vld [vmem:[%s4256_s1 + $0x3a0] ss:$8 sps:$4 sm:$0xff]  }
  0xb4   : > { %2308 = vmatpush1.bf16.msra.mxu0 %v3131_v57  ;;  %2137 = vmatprep.subr.bf16.mxu1 %v3136_v58  ;;  %v3227_v57 = vld [vmem:[%s4256_s1 + $0x7a0] ss:$8 sps:$4 sm:$0xff]   ;;  %v3232_v58 = vld [vmem:[%s4256_s1 + $0x3b4] ss:$8 sps:$4 sm:$0xff]  }
  0xb5   : > { %2309 = vmatprep.subr.bf16.mxu0 %v3139_v59  ;;  %v3235_v59 = vld [vmem:[%s4256_s1 + $0x7b4] ss:$8 sps:$4 sm:$0xff]  }
  0xb7   : > { %2138 = vmatpush1.bf16.msra.mxu1 %v3134_v60  ;;  %v3230_v60 = vld [vmem:[%s4256_s1 + $0x3b0] ss:$8 sps:$4 sm:$0xff]  }
  0xb8   : > { %2310 = vmatpush1.bf16.msra.mxu0 %v3137_v61  ;;  %2139 = vmatprep.subr.bf16.mxu1 %v3142_v62  ;;  %v3233_v61 = vld [vmem:[%s4256_s1 + $0x7b0] ss:$8 sps:$4 sm:$0xff]   ;;  %v3238_v62 = vld [vmem:[%s4256_s1 + $0x3c4] ss:$8 sps:$4 sm:$0xff]  }
  0xb9   : > { %2311 = vmatprep.subr.bf16.mxu0 %v3145_v63  ;;  %v3241_v63 = vld [vmem:[%s4256_s1 + $0x7c4] ss:$8 sps:$4 sm:$0xff]  }
  0xbb   : > { %2140 = vmatpush1.bf16.msra.mxu1 %v3140_v0  ;;  %v3236_v0 = vld [vmem:[%s4256_s1 + $0x3c0] ss:$8 sps:$4 sm:$0xff]  }
  0xbc   : > { %2312 = vmatpush1.bf16.msra.mxu0 %v3143_v1  ;;  %2141 = vmatprep.subr.bf16.mxu1 %v3148_v2  ;;  %v3239_v1 = vld [vmem:[%s4256_s1 + $0x7c0] ss:$8 sps:$4 sm:$0xff]   ;;  %v3244_v2 = vld [vmem:[%s4256_s1 + $0x3d4] ss:$8 sps:$4 sm:$0xff]  }
  0xbd   : > { %2313 = vmatprep.subr.bf16.mxu0 %v3151_v3  ;;  %v3247_v3 = vld [vmem:[%s4256_s1 + $0x7d4] ss:$8 sps:$4 sm:$0xff]  }
  0xbf   : > { %2142 = vmatpush1.bf16.msra.mxu1 %v3146_v4  ;;  %v3242_v4 = vld [vmem:[%s4256_s1 + $0x3d0] ss:$8 sps:$4 sm:$0xff]  }
  0xc0   : > { %2314 = vmatpush1.bf16.msra.mxu0 %v3149_v5  ;;  %2143 = vmatprep.subr.bf16.mxu1 %v3154_v6  ;;  %v3245_v5 = vld [vmem:[%s4256_s1 + $0x7d0] ss:$8 sps:$4 sm:$0xff]   ;;  %v3250_v6 = vld [vmem:[%s4256_s1 + $0x3e4] ss:$8 sps:$4 sm:$0xff]  }
  0xc1   : > { %2315 = vmatprep.subr.bf16.mxu0 %v3157_v7  ;;  %v3253_v7 = vld [vmem:[%s4256_s1 + $0x7e4] ss:$8 sps:$4 sm:$0xff]  }
  0xc3   : > { %2144 = vmatpush1.bf16.msra.mxu1 %v3152_v8  ;;  %v3248_v8 = vld [vmem:[%s4256_s1 + $0x3e0] ss:$8 sps:$4 sm:$0xff]  }
  0xc4   : > { %2316 = vmatpush1.bf16.msra.mxu0 %v3155_v9  ;;  %2156 = vmatprep.subr.bf16.mxu1 %v3163_v10  ;;  %v3251_v9 = vld [vmem:[%s4256_s1 + $0x7e0] ss:$8 sps:$4 sm:$0xff]   ;;  %v3256_v10 = vld [vmem:[%s4256_s1 + $0x3f4] ss:$8 sps:$4 sm:$0xff]  }
  0xc5   : > { %2328 = vmatprep.subr.bf16.mxu0 %v3169_v11  ;;  %v3259_v11 = vld [vmem:[%s4256_s1 + $0x7f4] ss:$8 sps:$4 sm:$0xff]  }
  0xc6   : > { %2146 = vmatmul.mubr.bf16.vlgmr.msra.gmra.mrb[0].mxu1 %v3158_v12  ;;  %v3254_v12 = vld [vmem:[%s4256_s1 + $0x3f0] ss:$8 sps:$4 sm:$0xff]  }
  0xc7   : > { %2318 = vmatmul.mubr.bf16.vlgmr.msra.gmra.mrb[0].mxu0 %v3164_v14  ;;  %2157 = vmatpush1.bf16.msra.mxu1 %v3161_v13  ;;  %v3257_v13 = vld [vmem:[%s4256_s1 + $0x7f0] ss:$8 sps:$4 sm:$0xff]   ;;  %v3268_v14 = vld [vmem:[%s4256_s1 + $0x804] ss:$8 sps:$4 sm:$0xff]  }
  0xc8   : > { %2329 = vmatpush1.bf16.msra.mxu0 %v3167_v15  ;;  %2158 = vmatprep.subr.bf16.mxu1 %v3172_v16  ;;  %v3260_v15 = vld [vmem:[%s3496_s13 + $0x18] ss:$72 sps:$4 sm:$0xff]  }
  0xc9   : > { %2330 = vmatprep.subr.bf16.mxu0 %v3175_v17  ;;  %2188 = vmatprep.mubr.bf16.mxu1 %v3262_v18  ;;  %v3263_v16 = vld [vmem:[%s3496_s13 + $0x38] ss:$72 sps:$4 sm:$0xff]   ;;  %v3316_v18 = vld [vmem:[%s3496_s13 + $0x44] ss:$72 sps:$4 sm:$0xff]  }
  0xca   : > { %2360 = vmatprep.mubr.bf16.mxu0 %v3265_v19  ;;  %v3266_v17 = vld [vmem:[%s4256_s1 + $0x800] ss:$8 sps:$4 sm:$0xff]   ;;  %v3271_v19 = vld [vmem:[%s4256_s1 + $0x814] ss:$8 sps:$4 sm:$0xff]  }
  0xcb   : > { %2159 = vmatpush1.bf16.msra.mxu1 %v3170_v20  ;;  %v3269_v20 = vld [vmem:[%s4256_s1 + $0x810] ss:$8 sps:$4 sm:$0xff]  }
  0xcc   : > { %2331 = vmatpush1.bf16.msra.mxu0 %v3173_v21  ;;  %2160 = vmatprep.subr.bf16.mxu1 %v3178_v22  ;;  %v3274_v21 = vld [vmem:[%s4256_s1 + $0x824] ss:$8 sps:$4 sm:$0xff]   ;;  %v3272_v22 = vld [vmem:[%s4256_s1 + $0x820] ss:$8 sps:$4 sm:$0xff]  }
  0xcd   : > { %2332 = vmatprep.subr.bf16.mxu0 %v3181_v23  ;;  %v3277_v23 = vld [vmem:[%s4256_s1 + $0x834] ss:$8 sps:$4 sm:$0xff]  }
  0xcf   : > { %2161 = vmatpush1.bf16.msra.mxu1 %v3176_v24  ;;  %v3275_v24 = vld [vmem:[%s4256_s1 + $0x830] ss:$8 sps:$4 sm:$0xff]  }
  0xd0   : > { %2333 = vmatpush1.bf16.msra.mxu0 %v3179_v25  ;;  %2162 = vmatprep.subr.bf16.mxu1 %v3184_v26  ;;  %v3280_v25 = vld [vmem:[%s4256_s1 + $0x844] ss:$8 sps:$4 sm:$0xff]   ;;  %v3278_v26 = vld [vmem:[%s4256_s1 + $0x840] ss:$8 sps:$4 sm:$0xff]  }
  0xd1   : > { %2334 = vmatprep.subr.bf16.mxu0 %v3187_v27  ;;  %v3283_v27 = vld [vmem:[%s4256_s1 + $0x854] ss:$8 sps:$4 sm:$0xff]  }
  0xd3   : > { %2163 = vmatpush1.bf16.msra.mxu1 %v3182_v28  ;;  %v3281_v28 = vld [vmem:[%s4256_s1 + $0x850] ss:$8 sps:$4 sm:$0xff]  }
  0xd4   : > { %2335 = vmatpush1.bf16.msra.mxu0 %v3185_v29  ;;  %2164 = vmatprep.subr.bf16.mxu1 %v3190_v30  ;;  %v3286_v29 = vld [vmem:[%s4256_s1 + $0x864] ss:$8 sps:$4 sm:$0xff]   ;;  %v3284_v30 = vld [vmem:[%s4256_s1 + $0x860] ss:$8 sps:$4 sm:$0xff]  }
  0xd5   : > { %2336 = vmatprep.subr.bf16.mxu0 %v3193_v31  ;;  %v3289_v31 = vld [vmem:[%s4256_s1 + $0x874] ss:$8 sps:$4 sm:$0xff]  }
  0xd7   : > { %2165 = vmatpush1.bf16.msra.mxu1 %v3188_v32  ;;  %v3287_v32 = vld [vmem:[%s4256_s1 + $0x870] ss:$8 sps:$4 sm:$0xff]  }
  0xd8   : > { %2337 = vmatpush1.bf16.msra.mxu0 %v3191_v33  ;;  %2166 = vmatprep.subr.bf16.mxu1 %v3196_v34  ;;  %v3292_v33 = vld [vmem:[%s4256_s1 + $0x884] ss:$8 sps:$4 sm:$0xff]   ;;  %v3290_v34 = vld [vmem:[%s4256_s1 + $0x880] ss:$8 sps:$4 sm:$0xff]  }
  0xd9   : > { %2338 = vmatprep.subr.bf16.mxu0 %v3199_v35  ;;  %v3295_v35 = vld [vmem:[%s4256_s1 + $0x894] ss:$8 sps:$4 sm:$0xff]  }
  0xdb   : > { %2167 = vmatpush1.bf16.msra.mxu1 %v3194_v36  ;;  %v3293_v36 = vld [vmem:[%s4256_s1 + $0x890] ss:$8 sps:$4 sm:$0xff]  }
  0xdc   : > { %2339 = vmatpush1.bf16.msra.mxu0 %v3197_v37  ;;  %2168 = vmatprep.subr.bf16.mxu1 %v3202_v38  ;;  %v3298_v37 = vld [vmem:[%s4256_s1 + $0x8a4] ss:$8 sps:$4 sm:$0xff]   ;;  %v3296_v38 = vld [vmem:[%s4256_s1 + $0x8a0] ss:$8 sps:$4 sm:$0xff]  }
  0xdd   : > { %2340 = vmatprep.subr.bf16.mxu0 %v3205_v39  ;;  %v3301_v39 = vld [vmem:[%s4256_s1 + $0x8b4] ss:$8 sps:$4 sm:$0xff]  }
  0xdf   : > { %2169 = vmatpush1.bf16.msra.mxu1 %v3200_v40  ;;  %v3299_v40 = vld [vmem:[%s4256_s1 + $0x8b0] ss:$8 sps:$4 sm:$0xff]  }
  0xe0   : > { %2341 = vmatpush1.bf16.msra.mxu0 %v3203_v41  ;;  %2170 = vmatprep.subr.bf16.mxu1 %v3208_v42  ;;  %v3304_v41 = vld [vmem:[%s4256_s1 + $0x8c4] ss:$8 sps:$4 sm:$0xff]   ;;  %v3302_v42 = vld [vmem:[%s4256_s1 + $0x8c0] ss:$8 sps:$4 sm:$0xff]  }
  0xe1   : > { %2342 = vmatprep.subr.bf16.mxu0 %v3211_v43  ;;  %v3307_v43 = vld [vmem:[%s4256_s1 + $0x8d4] ss:$8 sps:$4 sm:$0xff]  }
  0xe3   : > { %2171 = vmatpush1.bf16.msra.mxu1 %v3206_v44  ;;  %v3305_v44 = vld [vmem:[%s4256_s1 + $0x8d0] ss:$8 sps:$4 sm:$0xff]  }
  0xe4   : > { %2343 = vmatpush1.bf16.msra.mxu0 %v3209_v45  ;;  %2172 = vmatprep.subr.bf16.mxu1 %v3214_v46  ;;  %v3310_v45 = vld [vmem:[%s4256_s1 + $0x8e4] ss:$8 sps:$4 sm:$0xff]   ;;  %v3308_v46 = vld [vmem:[%s4256_s1 + $0x8e0] ss:$8 sps:$4 sm:$0xff]  }
  0xe5   : > { %2344 = vmatprep.subr.bf16.mxu0 %v3217_v47  ;;  %v3313_v47 = vld [vmem:[%s4256_s1 + $0x8f4] ss:$8 sps:$4 sm:$0xff]  }
  0xe7   : > { %2173 = vmatpush1.bf16.msra.mxu1 %v3212_v48  ;;  %v3311_v48 = vld [vmem:[%s4256_s1 + $0x8f0] ss:$8 sps:$4 sm:$0xff]  }
  0xe8   : > { %2345 = vmatpush1.bf16.msra.mxu0 %v3215_v49  ;;  %2174 = vmatprep.subr.bf16.mxu1 %v3220_v50  ;;  %v3314_v49 = vld [vmem:[%s3496_s13 + $0x40] ss:$72 sps:$4 sm:$0xff]   ;;  %s2810_s13 = sshll.u32 %s4260_s24, 3 }
  0xe9   : > { %2346 = vmatprep.subr.bf16.mxu0 %v3223_v51  ;;  %s177_s18 = scalar_lea.vmem %s4258_s3, %s2810_s13 }
  0xeb   : > { %2175 = vmatpush1.bf16.msra.mxu1 %v3218_v52 }
  0xec   : > { %2347 = vmatpush1.bf16.msra.mxu0 %v3221_v53  ;;  %2176 = vmatprep.subr.bf16.mxu1 %v3226_v54  ;;  %v487_v54 = vlaneseq }
  0xed   : > { %2348 = vmatprep.subr.bf16.mxu0 %v3229_v55 }
  0xee   : > { %v488_v55 = vshrl.u32 %v487_v54, 7 }
  0xef   : > { %2177 = vmatpush1.bf16.msra.mxu1 %v3224_v56 }
  0xf0   : > { %2349 = vmatpush1.bf16.msra.mxu0 %v3227_v57  ;;  %2178 = vmatprep.subr.bf16.mxu1 %v3232_v58  ;;  %v489_v56 = vsub.s32 0, %v488_v55  ;;  %v485_v57 = vld [vmem:[%s4257_s2] sm:$0x3]  ;;  %v493_v58 = vsub.s32 1, %v488_v55 }
  0xf1   : > { %2350 = vmatprep.subr.bf16.mxu0 %v3235_v59 }
  0xf2   : > { %v490_v59 = vrot.slane %v485_v57, %v489_v56 }
  0xf3   : > { %2179 = vmatpush1.bf16.msra.mxu1 %v3230_v60  ;;  %v494_v60 = vrot.slane %v485_v57, %v493_v58 }
  0xf4   : > { %2351 = vmatpush1.bf16.msra.mxu0 %v3233_v61  ;;  %2180 = vmatprep.subr.bf16.mxu1 %v3238_v62 }
  0xf5   : > { %2352 = vmatprep.subr.bf16.mxu0 %v3241_v63 }
  0xf7   : > { %2181 = vmatpush1.bf16.msra.mxu1 %v3236_v0 }
  0xf8   : > { %2353 = vmatpush1.bf16.msra.mxu0 %v3239_v1  ;;  %2182 = vmatprep.subr.bf16.mxu1 %v3244_v2 }
  0xf9   : > { %2354 = vmatprep.subr.bf16.mxu0 %v3247_v3 }
  0xfb   : > { %2183 = vmatpush1.bf16.msra.mxu1 %v3242_v4 }
  0xfc   : > { %2355 = vmatpush1.bf16.msra.mxu0 %v3245_v5  ;;  %2184 = vmatprep.subr.bf16.mxu1 %v3250_v6 }
  0xfd   : > { %2356 = vmatprep.subr.bf16.mxu0 %v3253_v7 }
  0xff   : > { %2185 = vmatpush1.bf16.msra.mxu1 %v3248_v8 }
 0x100   : > { %2357 = vmatpush1.bf16.msra.mxu0 %v3251_v9  ;;  %2186 = vmatprep.subr.bf16.mxu1 %v3256_v10 }
 0x101   : > { %2358 = vmatprep.subr.bf16.mxu0 %v3259_v11 }
 0x103   : > { %2187 = vmatpush1.bf16.msra.mxu1 %v3254_v12 }
 0x104   : > { %2359 = vmatpush1.bf16.msra.mxu0 %v3257_v13 }
 0x105   : > { %2371 = vmatprep.subr.bf16.mxu0 %v3268_v14 }
 0x106   : > { %2189 = vmatmul.mubr.bf16.vlgmr.msra.gmra.mrb[0].mxu1 %v3260_v15 }
 0x107   : > { %2361 = vmatmul.mubr.bf16.vlgmr.msra.gmra.mrb[0].mxu0 %v3263_v16 }
 0x108   : > { %2372 = vmatpush1.bf16.msra.mxu0 %v3266_v17  ;;  %2403 = vmatprep.mubr.bf16.mxu0 %v3316_v18 }
 0x109   : > { %2373 = vmatprep.subr.bf16.mxu0 %v3271_v19 }
 0x10c   : > { %2374 = vmatpush1.bf16.msra.mxu0 %v3269_v20 }
 0x10d   : > { %2375 = vmatprep.subr.bf16.mxu0 %v3274_v21 }
 0x110   : > { %2376 = vmatpush1.bf16.msra.mxu0 %v3272_v22 }
 0x111   : > { %2377 = vmatprep.subr.bf16.mxu0 %v3277_v23 }
 0x114   : > { %2378 = vmatpush1.bf16.msra.mxu0 %v3275_v24 }
 0x115   : > { %2379 = vmatprep.subr.bf16.mxu0 %v3280_v25 }
 0x118   : > { %2380 = vmatpush1.bf16.msra.mxu0 %v3278_v26 }
 0x119   : > { %2381 = vmatprep.subr.bf16.mxu0 %v3283_v27 }
 0x11c   : > { %2382 = vmatpush1.bf16.msra.mxu0 %v3281_v28 }
 0x11d   : > { %2383 = vmatprep.subr.bf16.mxu0 %v3286_v29 }
 0x120   : > { %2384 = vmatpush1.bf16.msra.mxu0 %v3284_v30 }
 0x121   : > { %2385 = vmatprep.subr.bf16.mxu0 %v3289_v31 }
 0x124   : > { %2386 = vmatpush1.bf16.msra.mxu0 %v3287_v32 }
 0x125   : > { %2387 = vmatprep.subr.bf16.mxu0 %v3292_v33 }
 0x128   : > { %2388 = vmatpush1.bf16.msra.mxu0 %v3290_v34 }
 0x129   : > { %2389 = vmatprep.subr.bf16.mxu0 %v3295_v35 }
 0x12c   : > { %2390 = vmatpush1.bf16.msra.mxu0 %v3293_v36 }
 0x12d   : > { %2391 = vmatprep.subr.bf16.mxu0 %v3298_v37 }
 0x130   : > { %2392 = vmatpush1.bf16.msra.mxu0 %v3296_v38 }
 0x131   : > { %2393 = vmatprep.subr.bf16.mxu0 %v3301_v39 }
 0x134   : > { %2394 = vmatpush1.bf16.msra.mxu0 %v3299_v40 }
 0x135   : > { %2395 = vmatprep.subr.bf16.mxu0 %v3304_v41 }
 0x138   : > { %2396 = vmatpush1.bf16.msra.mxu0 %v3302_v42 }
 0x139   : > { %2397 = vmatprep.subr.bf16.mxu0 %v3307_v43 }
 0x13c   : > { %2398 = vmatpush1.bf16.msra.mxu0 %v3305_v44 }
 0x13d   : > { %2399 = vmatprep.subr.bf16.mxu0 %v3310_v45 }
 0x140   : > { %2400 = vmatpush1.bf16.msra.mxu0 %v3308_v46 }
 0x141   : > { %2401 = vmatprep.subr.bf16.mxu0 %v3313_v47 }
 0x144   : > { %2402 = vmatpush1.bf16.msra.mxu0 %v3311_v48 }
 0x147   : > { %2404 = vmatmul.mubr.bf16.vlgmr.msra.gmra.mrb[0].mxu0 %v3314_v49 }
 0x1d9   : > { %v2190_v50 = vpop.f32.mrb[0].mxu1 }
 0x1da   : > { %v2192_v51 = vpop.f32.mrb[1].mxu1  ;;  %v2813_v61 = vadd.f32 %v2190_v50, %v490_v59 }
 0x1db   : > { %v2194_v52 = vpop.f32.mrb[2].mxu1  ;;  %v2815_v62 = vadd.f32 %v2192_v51, %v494_v60 }
 0x1dc   : > { %v2196_v53 = vpop.f32.mrb[3].mxu1  ;;  %v2817_v0 = vadd.f32 %v2194_v52, %v490_v59 }
 0x1dd   : > { %v2819_v3 = vadd.f32 %v2196_v53, %v494_v60 }
 0x21a   : > { %v2405_v63 = vpop.f32.mrb[0].mxu0 }
 0x21b   : > { %v2814_v1 = vadd.f32 %v2813_v61, %v2405_v63  ;;  %v2407_v2 = vpop.f32.mrb[1].mxu0 }
 0x21c   : > { %v2816_v4 = vadd.f32 %v2815_v62, %v2407_v2  ;;  %v2409_v5 = vpop.f32.mrb[2].mxu0 }
 0x21d   : > { %v2414_v6 = vmax.f32 %v2814_v1, 0.0  ;;  %v2818_v7 = vadd.f32 %v2817_v0, %v2409_v5  ;;  %v2411_v8 = vpop.f32.mrb[3].mxu0 }
 0x21e   : > { %v2415_v9 = vmax.f32 %v2816_v4, 0.0  ;;  %v2820_v10 = vadd.f32 %v2819_v3, %v2411_v8 }
 0x21f   : > { %v2416_v11 = vmax.f32 %v2818_v7, 0.0 }
 0x220   : > { %v2811_v12 = vpack.c.bf16 %v2415_v9, %v2414_v6  ;;  %v2417_v13 = vmax.f32 %v2820_v10, 0.0 }
 0x222   : > { %2430 = vst [vmem:[%s177_s18] sm:$0xff] %v2811_v12  ;;  %v2812_v14 = vpack.c.bf16 %v2417_v13, %v2416_v11 }
 0x224   : > { %2431 = vst [vmem:[%s177_s18 + $0x8] sm:$0xff] %v2812_v14 }
 0x225 PF: > { %s13_s12 = sadd.s32 1, %s3323_s12  }
 0x226   : > { %p10_p4 = scmp.ge.s32.totalorder %s13_s12, 4  }
 0x228   :  { %12 = sbr.rel (!%p10_p4) target bundleno = 1 (0x1), region = 62 }

// kernel: so_forward.9
= control target key start
LH: loop header
LB: loop body
LE: loop exit
PB: predicated region body
PF: predicated region fallthrough
CT: control target
= control target key end

     0   :  { %s4616_s1 = inlined_call_operand.vmem [shape: bf16[4096,128], index: 1, kind: input, shape index: {}]   ;;  %s4617_s0 = inlined_call_operand.vmem [shape: bf16[8,4096], index: 0, kind: input, shape index: {}]   ;;  %s4618_s2 = inlined_call_operand.vmem [shape: f32[1,128], index: 2, kind: input, shape index: {}]   ;;  %s4619_s3 = inlined_call_operand.vmem [shape: bf16[8,128], index: 3, kind: output, shape index: {}]  }
   0x1   :  { %v3486_v0 = vld [vmem:[%s4616_s1 + $0x40] sm:$0xff]   ;;  %v3490_v4 = vld [vmem:[%s4616_s1 + $0x48] sm:$0xff]   ;;  %v3494_v8 = vld [vmem:[%s4616_s1 + $0x50] sm:$0xff]  }
   0x2   :  { %v3487_v1 = vld [vmem:[%s4616_s1 + $0xc0] sm:$0xff]   ;;  %3134 = vmatprep.subr.bf16.mxu0 %v3486_v0  ;;  %v3491_v5 = vld [vmem:[%s4616_s1 + $0xc8] sm:$0xff]   ;;  %v3495_v9 = vld [vmem:[%s4616_s1 + $0xd0] sm:$0xff]  }
   0x3   :  { %v3488_v2 = vld [vmem:[%s4616_s1] sm:$0xff]   ;;  %3156 = vmatprep.subr.bf16.mxu1 %v3487_v1  ;;  %v3492_v6 = vld [vmem:[%s4616_s1 + $0x8] sm:$0xff]   ;;  %v3496_v10 = vld [vmem:[%s4616_s1 + $0x10] sm:$0xff]  }
   0x4   :  { %v3489_v3 = vld [vmem:[%s4616_s1 + $0x80] sm:$0xff]   ;;  %3135 = vmatpush3.bf16.msra.mxu0 %v3488_v2  ;;  %v3493_v7 = vld [vmem:[%s4616_s1 + $0x88] sm:$0xff]   ;;  %v3497_v11 = vld [vmem:[%s4616_s1 + $0x90] sm:$0xff]  }
   0x5   :  { %3157 = vmatpush3.bf16.msra.mxu1 %v3489_v3  ;;  %3136 = vmatprep.subr.bf16.mxu0 %v3490_v4  ;;  %v3498_v12 = vld [vmem:[%s4616_s1 + $0x58] sm:$0xff]   ;;  %v3502_v16 = vld [vmem:[%s4616_s1 + $0x60] sm:$0xff]   ;;  %v3506_v20 = vld [vmem:[%s4616_s1 + $0x68] sm:$0xff]  }
   0x6   :  { %3158 = vmatprep.subr.bf16.mxu1 %v3491_v5  ;;  %v3499_v13 = vld [vmem:[%s4616_s1 + $0xd8] sm:$0xff]   ;;  %v3503_v17 = vld [vmem:[%s4616_s1 + $0xe0] sm:$0xff]   ;;  %v3507_v21 = vld [vmem:[%s4616_s1 + $0xe8] sm:$0xff]  }
   0x7   :  { %v3500_v14 = vld [vmem:[%s4616_s1 + $0x18] sm:$0xff]   ;;  %v3504_v18 = vld [vmem:[%s4616_s1 + $0x20] sm:$0xff]   ;;  %v3508_v22 = vld [vmem:[%s4616_s1 + $0x28] sm:$0xff]  }
   0x8   :  { %3137 = vmatpush3.bf16.msra.mxu0 %v3492_v6  ;;  %v3501_v15 = vld [vmem:[%s4616_s1 + $0x98] sm:$0xff]   ;;  %v3505_v19 = vld [vmem:[%s4616_s1 + $0xa0] sm:$0xff]   ;;  %v3509_v23 = vld [vmem:[%s4616_s1 + $0xa8] sm:$0xff]  }
   0x9   :  { %3159 = vmatpush3.bf16.msra.mxu1 %v3493_v7  ;;  %3138 = vmatprep.subr.bf16.mxu0 %v3494_v8  ;;  %v3510_v24 = vld [vmem:[%s4616_s1 + $0x70] sm:$0xff]   ;;  %v3514_v28 = vld [vmem:[%s4616_s1 + $0x78] sm:$0xff]   ;;  %v15_v32 = vld [vmem:[%s4617_s0] sm:$0xff] }
   0xa   :  { %3160 = vmatprep.subr.bf16.mxu1 %v3495_v9  ;;  %v3511_v25 = vld [vmem:[%s4616_s1 + $0xf0] sm:$0xff]   ;;  %v3515_v29 = vld [vmem:[%s4616_s1 + $0xf8] sm:$0xff]   ;;  %v16_v33 = vld [vmem:[%s4617_s0 + $0x8] sm:$0xff]  ;;  %v2846_v34 = vcombine.low %v15_v32, %v15_v32  ;;  %v2847_v35 = vcombine.high %v15_v32, %v15_v32 }
   0xb   :  { %v3512_v26 = vld [vmem:[%s4616_s1 + $0x30] sm:$0xff]   ;;  %v3516_v30 = vld [vmem:[%s4616_s1 + $0x38] sm:$0xff]   ;;  %v2848_v36 = vcombine.low %v16_v33, %v16_v33  ;;  %v2849_v37 = vcombine.high %v16_v33, %v16_v33  ;;  %v3522_v38 = vld [vmem:[%s4616_s1 + $0x140] sm:$0xff]  }
   0xc   :  { %3139 = vmatpush3.bf16.msra.mxu0 %v3496_v10  ;;  %v3513_v27 = vld [vmem:[%s4616_s1 + $0xb0] sm:$0xff]   ;;  %v3517_v31 = vld [vmem:[%s4616_s1 + $0xb8] sm:$0xff]   ;;  %v3523_v39 = vld [vmem:[%s4616_s1 + $0x1c0] sm:$0xff]   ;;  %2230 = vmatprep.mubr.bf16.mxu0 %v2847_v35 }
   0xd   :  { %3161 = vmatpush3.bf16.msra.mxu1 %v3497_v11  ;;  %3140 = vmatprep.subr.bf16.mxu0 %v3498_v12  ;;  %v3524_v40 = vld [vmem:[%s4616_s1 + $0x100] sm:$0xff]   ;;  %v3526_v42 = vld [vmem:[%s4616_s1 + $0x148] sm:$0xff]   ;;  %v3530_v46 = vld [vmem:[%s4616_s1 + $0x150] sm:$0xff]  }
   0xe   :  { %3162 = vmatprep.subr.bf16.mxu1 %v3499_v13  ;;  %2270 = vmatprep.mubr.bf16.mxu1 %v2849_v37  ;;  %v3525_v41 = vld [vmem:[%s4616_s1 + $0x180] sm:$0xff]   ;;  %v3527_v43 = vld [vmem:[%s4616_s1 + $0x1c8] sm:$0xff]   ;;  %v3531_v47 = vld [vmem:[%s4616_s1 + $0x1d0] sm:$0xff]  }
   0xf   :  { %v3528_v44 = vld [vmem:[%s4616_s1 + $0x108] sm:$0xff]   ;;  %v3532_v48 = vld [vmem:[%s4616_s1 + $0x110] sm:$0xff]   ;;  %v3534_v50 = vld [vmem:[%s4616_s1 + $0x158] sm:$0xff]  }
  0x10   :  { %3141 = vmatpush3.bf16.msra.mxu0 %v3500_v14  ;;  %v3529_v45 = vld [vmem:[%s4616_s1 + $0x188] sm:$0xff]   ;;  %v3533_v49 = vld [vmem:[%s4616_s1 + $0x190] sm:$0xff]   ;;  %v3535_v51 = vld [vmem:[%s4616_s1 + $0x1d8] sm:$0xff]  }
  0x11   :  { %3163 = vmatpush3.bf16.msra.mxu1 %v3501_v15  ;;  %3142 = vmatprep.subr.bf16.mxu0 %v3502_v16  ;;  %v3536_v52 = vld [vmem:[%s4616_s1 + $0x118] sm:$0xff]   ;;  %v3538_v54 = vld [vmem:[%s4616_s1 + $0x160] sm:$0xff]   ;;  %v3542_v58 = vld [vmem:[%s4616_s1 + $0x168] sm:$0xff]  }
  0x12   :  { %3164 = vmatprep.subr.bf16.mxu1 %v3503_v17  ;;  %v3537_v53 = vld [vmem:[%s4616_s1 + $0x198] sm:$0xff]   ;;  %v3539_v55 = vld [vmem:[%s4616_s1 + $0x1e0] sm:$0xff]   ;;  %v3543_v59 = vld [vmem:[%s4616_s1 + $0x1e8] sm:$0xff]  }
  0x13   :  { %v3540_v56 = vld [vmem:[%s4616_s1 + $0x120] sm:$0xff]   ;;  %v3544_v60 = vld [vmem:[%s4616_s1 + $0x128] sm:$0xff]   ;;  %v3546_v62 = vld [vmem:[%s4616_s1 + $0x170] sm:$0xff]  }
  0x14   :  { %3143 = vmatpush3.bf16.msra.mxu0 %v3504_v18  ;;  %v3541_v57 = vld [vmem:[%s4616_s1 + $0x1a0] sm:$0xff]   ;;  %v3545_v61 = vld [vmem:[%s4616_s1 + $0x1a8] sm:$0xff]   ;;  %v3547_v63 = vld [vmem:[%s4616_s1 + $0x1f0] sm:$0xff]  }
  0x15   :  { %3165 = vmatpush3.bf16.msra.mxu1 %v3505_v19  ;;  %3144 = vmatprep.subr.bf16.mxu0 %v3506_v20  ;;  %v3548_v0 = vld [vmem:[%s4616_s1 + $0x130] sm:$0xff]   ;;  %v3550_v2 = vld [vmem:[%s4616_s1 + $0x178] sm:$0xff]   ;;  %v3558_v12 = vld [vmem:[%s4616_s1 + $0x240] sm:$0xff]  }
  0x16   :  { %3166 = vmatprep.subr.bf16.mxu1 %v3507_v21  ;;  %v3549_v1 = vld [vmem:[%s4616_s1 + $0x1b0] sm:$0xff]   ;;  %v3551_v3 = vld [vmem:[%s4616_s1 + $0x1f8] sm:$0xff]   ;;  %v3559_v13 = vld [vmem:[%s4616_s1 + $0x2c0] sm:$0xff]  }
  0x17   :  { %v3552_v4 = vld [vmem:[%s4616_s1 + $0x138] sm:$0xff]   ;;  %v17_v6 = vld [vmem:[%s4617_s0 + $0x10] sm:$0xff]  ;;  %v3560_v14 = vld [vmem:[%s4616_s1 + $0x200] sm:$0xff]  }
  0x18   :  { %3145 = vmatpush3.bf16.msra.mxu0 %v3508_v22  ;;  %v3553_v5 = vld [vmem:[%s4616_s1 + $0x1b8] sm:$0xff]   ;;  %v2850_v7 = vcombine.low %v17_v6, %v17_v6  ;;  %v2851_v8 = vcombine.high %v17_v6, %v17_v6  ;;  %v3561_v15 = vld [vmem:[%s4616_s1 + $0x280] sm:$0xff]   ;;  %v3562_v16 = vld [vmem:[%s4616_s1 + $0x248] sm:$0xff]  }
  0x19   :  { %3167 = vmatpush3.bf16.msra.mxu1 %v3509_v23  ;;  %3146 = vmatprep.subr.bf16.mxu0 %v3510_v24  ;;  %v18_v9 = vld [vmem:[%s4617_s0 + $0x18] sm:$0xff]  ;;  %v3563_v17 = vld [vmem:[%s4616_s1 + $0x2c8] sm:$0xff]   ;;  %v3566_v20 = vld [vmem:[%s4616_s1 + $0x250] sm:$0xff]  }
  0x1a   :  { %3168 = vmatprep.subr.bf16.mxu1 %v3511_v25  ;;  %v2852_v10 = vcombine.low %v18_v9, %v18_v9  ;;  %v2853_v11 = vcombine.high %v18_v9, %v18_v9  ;;  %v3564_v18 = vld [vmem:[%s4616_s1 + $0x208] sm:$0xff]   ;;  %v3567_v21 = vld [vmem:[%s4616_s1 + $0x2d0] sm:$0xff]   ;;  %v3570_v24 = vld [vmem:[%s4616_s1 + $0x258] sm:$0xff]  }
  0x1b   :  { %v3565_v19 = vld [vmem:[%s4616_s1 + $0x288] sm:$0xff]   ;;  %v3568_v22 = vld [vmem:[%s4616_s1 + $0x210] sm:$0xff]   ;;  %v3571_v25 = vld [vmem:[%s4616_s1 + $0x2d8] sm:$0xff]  }
  0x1c   :  { %3147 = vmatpush3.bf16.msra.mxu0 %v3512_v26  ;;  %v3569_v23 = vld [vmem:[%s4616_s1 + $0x290] sm:$0xff]   ;;  %v3572_v26 = vld [vmem:[%s4616_s1 + $0x218] sm:$0xff]   ;;  %v3578_v32 = vld [vmem:[%s4616_s1 + $0x268] sm:$0xff]  }
  0x1d   :  { %3169 = vmatpush3.bf16.msra.mxu1 %v3513_v27  ;;  %3148 = vmatprep.subr.bf16.mxu0 %v3514_v28  ;;  %v3573_v27 = vld [vmem:[%s4616_s1 + $0x298] sm:$0xff]   ;;  %v3574_v28 = vld [vmem:[%s4616_s1 + $0x260] sm:$0xff]   ;;  %v3579_v33 = vld [vmem:[%s4616_s1 + $0x2e8] sm:$0xff]  }
  0x1e   :  { %3170 = vmatprep.subr.bf16.mxu1 %v3515_v29  ;;  %v3575_v29 = vld [vmem:[%s4616_s1 + $0x2e0] sm:$0xff]   ;;  %v3581_v35 = vld [vmem:[%s4616_s1 + $0x2a8] sm:$0xff]   ;;  %v3583_v37 = vld [vmem:[%s4616_s1 + $0x2f0] sm:$0xff]  }
  0x1f   :  { %v3614_v6 = vld [vmem:[%s4616_s1 + $0x368] sm:$0xff]  }
  0x20   :  { %3149 = vmatpush3.bf16.msra.mxu0 %v3516_v30  ;;  %v3576_v30 = vld [vmem:[%s4616_s1 + $0x220] sm:$0xff]   ;;  %v3617_v9 = vld [vmem:[%s4616_s1 + $0x3a8] sm:$0xff]  }
  0x21   :  { %3171 = vmatpush3.bf16.msra.mxu1 %v3517_v31  ;;  %3178 = vmatprep.subr.bf16.mxu0 %v3522_v38  ;;  %v3577_v31 = vld [vmem:[%s4616_s1 + $0x2a0] sm:$0xff]   ;;  %v3584_v38 = vld [vmem:[%s4616_s1 + $0x230] sm:$0xff]  }
  0x22   :  { %3200 = vmatprep.subr.bf16.mxu1 %v3523_v39  ;;  %v3585_v39 = vld [vmem:[%s4616_s1 + $0x2b0] sm:$0xff]  }
  0x23   :  { %2231 = vmatmul.mubr.bf16.vlgmr.msra.gmra.mrb[0].mxu0 %v2846_v34  ;;  %v3580_v34 = vld [vmem:[%s4616_s1 + $0x228] sm:$0xff]  }
  0x24   :  { %2271 = vmatmul.mubr.bf16.vlgmr.msra.gmra.mrb[0].mxu1 %v2848_v36  ;;  %3179 = vmatpush3.bf16.msra.mxu0 %v3524_v40  ;;  %v3582_v36 = vld [vmem:[%s4616_s1 + $0x270] sm:$0xff]   ;;  %v3586_v40 = vld [vmem:[%s4616_s1 + $0x278] sm:$0xff]  }
  0x25   :  { %3201 = vmatpush3.bf16.msra.mxu1 %v3525_v41  ;;  %3180 = vmatprep.subr.bf16.mxu0 %v3526_v42  ;;  %v3587_v41 = vld [vmem:[%s4616_s1 + $0x2f8] sm:$0xff]  }
  0x26   :  { %3202 = vmatprep.subr.bf16.mxu1 %v3527_v43  ;;  %2310 = vmatprep.mubr.bf16.mxu0 %v2851_v8  ;;  %v3588_v42 = vld [vmem:[%s4616_s1 + $0x238] sm:$0xff]   ;;  %v3616_v8 = vld [vmem:[%s4616_s1 + $0x328] sm:$0xff]  }
  0x27   :  { %2350 = vmatprep.mubr.bf16.mxu1 %v2853_v11  ;;  %v3589_v43 = vld [vmem:[%s4616_s1 + $0x2b8] sm:$0xff]   ;;  %v3619_v11 = vld [vmem:[%s4616_s1 + $0x3f0] sm:$0xff]  }
  0x28   :  { %3181 = vmatpush3.bf16.msra.mxu0 %v3528_v44  ;;  %v19_v44 = vld [vmem:[%s4617_s0 + $0x20] sm:$0xff] }
  0x29   :  { %3203 = vmatpush3.bf16.msra.mxu1 %v3529_v45  ;;  %3182 = vmatprep.subr.bf16.mxu0 %v3530_v46  ;;  %v20_v45 = vld [vmem:[%s4617_s0 + $0x28] sm:$0xff]  ;;  %v2854_v46 = vcombine.low %v19_v44, %v19_v44 }
  0x2a   :  { %3204 = vmatprep.subr.bf16.mxu1 %v3531_v47  ;;  %v2855_v47 = vcombine.high %v19_v44, %v19_v44  ;;  %v3650_v44 = vld [vmem:[%s4616_s1 + $0x468] sm:$0xff]  }
  0x2c   :  { %3183 = vmatpush3.bf16.msra.mxu0 %v3532_v48  ;;  %v2856_v48 = vcombine.low %v20_v45, %v20_v45 }
  0x2d   :  { %3205 = vmatpush3.bf16.msra.mxu1 %v3533_v49  ;;  %3184 = vmatprep.subr.bf16.mxu0 %v3534_v50  ;;  %v2857_v49 = vcombine.high %v20_v45, %v20_v45  ;;  %v3594_v50 = vld [vmem:[%s4616_s1 + $0x340] sm:$0xff]   ;;  %v3651_v45 = vld [vmem:[%s4616_s1 + $0x4e8] sm:$0xff]  }
  0x2e   :  { %3206 = vmatprep.subr.bf16.mxu1 %v3535_v51  ;;  %v3595_v51 = vld [vmem:[%s4616_s1 + $0x3c0] sm:$0xff]  }
  0x30   :  { %3185 = vmatpush3.bf16.msra.mxu0 %v3536_v52  ;;  %v3596_v52 = vld [vmem:[%s4616_s1 + $0x300] sm:$0xff]  }
  0x31   :  { %3207 = vmatpush3.bf16.msra.mxu1 %v3537_v53  ;;  %3186 = vmatprep.subr.bf16.mxu0 %v3538_v54  ;;  %v3597_v53 = vld [vmem:[%s4616_s1 + $0x380] sm:$0xff]   ;;  %v3598_v54 = vld [vmem:[%s4616_s1 + $0x348] sm:$0xff]  }
  0x32   :  { %3208 = vmatprep.subr.bf16.mxu1 %v3539_v55  ;;  %v3599_v55 = vld [vmem:[%s4616_s1 + $0x3c8] sm:$0xff]  }
  0x34   :  { %3187 = vmatpush3.bf16.msra.mxu0 %v3540_v56  ;;  %v3600_v56 = vld [vmem:[%s4616_s1 + $0x308] sm:$0xff]  }
  0x35   :  { %3209 = vmatpush3.bf16.msra.mxu1 %v3541_v57  ;;  %3188 = vmatprep.subr.bf16.mxu0 %v3542_v58  ;;  %v3601_v57 = vld [vmem:[%s4616_s1 + $0x388] sm:$0xff]   ;;  %v3602_v58 = vld [vmem:[%s4616_s1 + $0x350] sm:$0xff]  }
  0x36   :  { %3210 = vmatprep.subr.bf16.mxu1 %v3543_v59  ;;  %v3603_v59 = vld [vmem:[%s4616_s1 + $0x3d0] sm:$0xff]  }
  0x38   :  { %3189 = vmatpush3.bf16.msra.mxu0 %v3544_v60  ;;  %v3604_v60 = vld [vmem:[%s4616_s1 + $0x310] sm:$0xff]  }
  0x39   :  { %3211 = vmatpush3.bf16.msra.mxu1 %v3545_v61  ;;  %3190 = vmatprep.subr.bf16.mxu0 %v3546_v62  ;;  %v3605_v61 = vld [vmem:[%s4616_s1 + $0x390] sm:$0xff]   ;;  %v3606_v62 = vld [vmem:[%s4616_s1 + $0x358] sm:$0xff]  }
  0x3a   :  { %3212 = vmatprep.subr.bf16.mxu1 %v3547_v63  ;;  %v3607_v63 = vld [vmem:[%s4616_s1 + $0x3d8] sm:$0xff]  }
  0x3c   :  { %3191 = vmatpush3.bf16.msra.mxu0 %v3548_v0  ;;  %v3608_v0 = vld [vmem:[%s4616_s1 + $0x318] sm:$0xff]  }
  0x3d   :  { %3213 = vmatpush3.bf16.msra.mxu1 %v3549_v1  ;;  %3192 = vmatprep.subr.bf16.mxu0 %v3550_v2  ;;  %v3609_v1 = vld [vmem:[%s4616_s1 + $0x398] sm:$0xff]   ;;  %v3610_v2 = vld [vmem:[%s4616_s1 + $0x360] sm:$0xff]  }
  0x3e   :  { %3214 = vmatprep.subr.bf16.mxu1 %v3551_v3  ;;  %v3611_v3 = vld [vmem:[%s4616_s1 + $0x3e0] sm:$0xff]  }
  0x40   :  { %3193 = vmatpush3.bf16.msra.mxu0 %v3552_v4  ;;  %v3612_v4 = vld [vmem:[%s4616_s1 + $0x320] sm:$0xff]  }
  0x41   :  { %3215 = vmatpush3.bf16.msra.mxu1 %v3553_v5  ;;  %3222 = vmatprep.subr.bf16.mxu0 %v3558_v12  ;;  %v3613_v5 = vld [vmem:[%s4616_s1 + $0x3a0] sm:$0xff]   ;;  %v3620_v12 = vld [vmem:[%s4616_s1 + $0x330] sm:$0xff]  }
  0x42   :  { %3244 = vmatprep.subr.bf16.mxu1 %v3559_v13  ;;  %v3621_v13 = vld [vmem:[%s4616_s1 + $0x3b0] sm:$0xff]  }
  0x43   :  { %2311 = vmatmul.mubr.bf16.vlgmr.msra.gmra.mrb[4].mxu0 %v2850_v7  ;;  %v3615_v7 = vld [vmem:[%s4616_s1 + $0x3e8] sm:$0xff]  }
  0x44   :  { %2351 = vmatmul.mubr.bf16.vlgmr.msra.gmra.mrb[4].mxu1 %v2852_v10  ;;  %3223 = vmatpush3.bf16.msra.mxu0 %v3560_v14  ;;  %v3618_v10 = vld [vmem:[%s4616_s1 + $0x370] sm:$0xff]   ;;  %v3622_v14 = vld [vmem:[%s4616_s1 + $0x378] sm:$0xff]  }
  0x45   :  { %3245 = vmatpush3.bf16.msra.mxu1 %v3561_v15  ;;  %3224 = vmatprep.subr.bf16.mxu0 %v3562_v16  ;;  %v3623_v15 = vld [vmem:[%s4616_s1 + $0x3f8] sm:$0xff]  }
  0x46   :  { %3246 = vmatprep.subr.bf16.mxu1 %v3563_v17  ;;  %2390 = vmatprep.mubr.bf16.mxu0 %v2855_v47  ;;  %v3624_v16 = vld [vmem:[%s4616_s1 + $0x338] sm:$0xff]   ;;  %v3653_v47 = vld [vmem:[%s4616_s1 + $0x4a8] sm:$0xff]  }
  0x47   :  { %2430 = vmatprep.mubr.bf16.mxu1 %v2857_v49  ;;  %v3625_v17 = vld [vmem:[%s4616_s1 + $0x3b8] sm:$0xff]   ;;  %v3655_v49 = vld [vmem:[%s4616_s1 + $0x4f0] sm:$0xff]  }
  0x48   :  { %3225 = vmatpush3.bf16.msra.mxu0 %v3564_v18  ;;  %v21_v18 = vld [vmem:[%s4617_s0 + $0x30] sm:$0xff] }
  0x49   :  { %3247 = vmatpush3.bf16.msra.mxu1 %v3565_v19  ;;  %3226 = vmatprep.subr.bf16.mxu0 %v3566_v20  ;;  %v22_v19 = vld [vmem:[%s4617_s0 + $0x38] sm:$0xff]  ;;  %v2858_v20 = vcombine.low %v21_v18, %v21_v18 }
  0x4a   :  { %3248 = vmatprep.subr.bf16.mxu1 %v3567_v21  ;;  %v2859_v21 = vcombine.high %v21_v18, %v21_v18  ;;  %v3686_v18 = vld [vmem:[%s4616_s1 + $0x568] sm:$0xff]  }
  0x4c   :  { %3227 = vmatpush3.bf16.msra.mxu0 %v3568_v22  ;;  %v2860_v22 = vcombine.low %v22_v19, %v22_v19 }
  0x4d   :  { %3249 = vmatpush3.bf16.msra.mxu1 %v3569_v23  ;;  %3228 = vmatprep.subr.bf16.mxu0 %v3570_v24  ;;  %v3630_v23 = vld [vmem:[%s4616_s1 + $0x440] sm:$0xff]   ;;  %v2861_v24 = vcombine.high %v22_v19, %v22_v19  ;;  %v3687_v19 = vld [vmem:[%s4616_s1 + $0x5e8] sm:$0xff]  }
  0x4e   :  { %3250 = vmatprep.subr.bf16.mxu1 %v3571_v25  ;;  %v3631_v25 = vld [vmem:[%s4616_s1 + $0x4c0] sm:$0xff]  }
  0x50   :  { %3229 = vmatpush3.bf16.msra.mxu0 %v3572_v26  ;;  %v3632_v26 = vld [vmem:[%s4616_s1 + $0x400] sm:$0xff]  }
  0x51   :  { %3251 = vmatpush3.bf16.msra.mxu1 %v3573_v27  ;;  %3230 = vmatprep.subr.bf16.mxu0 %v3574_v28  ;;  %v3633_v27 = vld [vmem:[%s4616_s1 + $0x480] sm:$0xff]   ;;  %v3634_v28 = vld [vmem:[%s4616_s1 + $0x448] sm:$0xff]  }
  0x52   :  { %3252 = vmatprep.subr.bf16.mxu1 %v3575_v29  ;;  %v3635_v29 = vld [vmem:[%s4616_s1 + $0x4c8] sm:$0xff]  }
  0x54   :  { %3231 = vmatpush3.bf16.msra.mxu0 %v3576_v30  ;;  %v3636_v30 = vld [vmem:[%s4616_s1 + $0x408] sm:$0xff]  }
  0x55   :  { %3253 = vmatpush3.bf16.msra.mxu1 %v3577_v31  ;;  %3232 = vmatprep.subr.bf16.mxu0 %v3578_v32  ;;  %v3637_v31 = vld [vmem:[%s4616_s1 + $0x488] sm:$0xff]   ;;  %v3638_v32 = vld [vmem:[%s4616_s1 + $0x450] sm:$0xff]  }
  0x56   :  { %3254 = vmatprep.subr.bf16.mxu1 %v3579_v33  ;;  %v3639_v33 = vld [vmem:[%s4616_s1 + $0x4d0] sm:$0xff]  }
  0x58   :  { %3233 = vmatpush3.bf16.msra.mxu0 %v3580_v34  ;;  %v3640_v34 = vld [vmem:[%s4616_s1 + $0x410] sm:$0xff]  }
  0x59   :  { %3255 = vmatpush3.bf16.msra.mxu1 %v3581_v35  ;;  %3234 = vmatprep.subr.bf16.mxu0 %v3582_v36  ;;  %v3641_v35 = vld [vmem:[%s4616_s1 + $0x490] sm:$0xff]   ;;  %v3642_v36 = vld [vmem:[%s4616_s1 + $0x458] sm:$0xff]  }
  0x5a   :  { %3256 = vmatprep.subr.bf16.mxu1 %v3583_v37  ;;  %v3643_v37 = vld [vmem:[%s4616_s1 + $0x4d8] sm:$0xff]  }
  0x5c   :  { %3235 = vmatpush3.bf16.msra.mxu0 %v3584_v38  ;;  %v3644_v38 = vld [vmem:[%s4616_s1 + $0x418] sm:$0xff]  }
  0x5d   :  { %3257 = vmatpush3.bf16.msra.mxu1 %v3585_v39  ;;  %3236 = vmatprep.subr.bf16.mxu0 %v3586_v40  ;;  %v3645_v39 = vld [vmem:[%s4616_s1 + $0x498] sm:$0xff]   ;;  %v3646_v40 = vld [vmem:[%s4616_s1 + $0x460] sm:$0xff]  }
  0x5e   :  { %3258 = vmatprep.subr.bf16.mxu1 %v3587_v41  ;;  %v3647_v41 = vld [vmem:[%s4616_s1 + $0x4e0] sm:$0xff]  }
  0x60   :  { %3237 = vmatpush3.bf16.msra.mxu0 %v3588_v42  ;;  %v3648_v42 = vld [vmem:[%s4616_s1 + $0x420] sm:$0xff]  }
  0x61   :  { %3259 = vmatpush3.bf16.msra.mxu1 %v3589_v43  ;;  %3266 = vmatprep.subr.bf16.mxu0 %v3594_v50  ;;  %v3649_v43 = vld [vmem:[%s4616_s1 + $0x4a0] sm:$0xff]   ;;  %v3656_v50 = vld [vmem:[%s4616_s1 + $0x430] sm:$0xff]  }
  0x62   :  { %3288 = vmatprep.subr.bf16.mxu1 %v3595_v51  ;;  %v3657_v51 = vld [vmem:[%s4616_s1 + $0x4b0] sm:$0xff]  }
  0x63   :  { %2391 = vmatmul.mubr.bf16.vlgmr.msra.gmra.mrb[8].mxu0 %v2854_v46  ;;  %v3652_v46 = vld [vmem:[%s4616_s1 + $0x428] sm:$0xff]  }
  0x64   :  { %2431 = vmatmul.mubr.bf16.vlgmr.msra.gmra.mrb[8].mxu1 %v2856_v48  ;;  %3267 = vmatpush3.bf16.msra.mxu0 %v3596_v52  ;;  %v3654_v48 = vld [vmem:[%s4616_s1 + $0x470] sm:$0xff]   ;;  %v3658_v52 = vld [vmem:[%s4616_s1 + $0x478] sm:$0xff]  }
  0x65   :  { %3289 = vmatpush3.bf16.msra.mxu1 %v3597_v53  ;;  %3268 = vmatprep.subr.bf16.mxu0 %v3598_v54  ;;  %v3659_v53 = vld [vmem:[%s4616_s1 + $0x4f8] sm:$0xff]  }
  0x66   :  { %3290 = vmatprep.subr.bf16.mxu1 %v3599_v55  ;;  %2470 = vmatprep.mubr.bf16.mxu0 %v2859_v21  ;;  %v3660_v54 = vld [vmem:[%s4616_s1 + $0x438] sm:$0xff]   ;;  %v3689_v21 = vld [vmem:[%s4616_s1 + $0x5a8] sm:$0xff]  }
  0x67   :  { %2510 = vmatprep.mubr.bf16.mxu1 %v2861_v24  ;;  %v3661_v55 = vld [vmem:[%s4616_s1 + $0x4b8] sm:$0xff]   ;;  %v3692_v24 = vld [vmem:[%s4616_s1 + $0x530] sm:$0xff]  }
  0x68   :  { %3269 = vmatpush3.bf16.msra.mxu0 %v3600_v56  ;;  %v23_v56 = vld [vmem:[%s4617_s0 + $0x40] sm:$0xff] }
  0x69   :  { %3291 = vmatpush3.bf16.msra.mxu1 %v3601_v57  ;;  %3270 = vmatprep.subr.bf16.mxu0 %v3602_v58  ;;  %v2862_v57 = vcombine.low %v23_v56, %v23_v56  ;;  %v2863_v58 = vcombine.high %v23_v56, %v23_v56  ;;  %v3722_v56 = vld [vmem:[%s4616_s1 + $0x668] sm:$0xff]  }
  0x6a   :  { %3292 = vmatprep.subr.bf16.mxu1 %v3603_v59  ;;  %v24_v59 = vld [vmem:[%s4617_s0 + $0x48] sm:$0xff] }
  0x6c   :  { %3271 = vmatpush3.bf16.msra.mxu0 %v3604_v60  ;;  %v2864_v60 = vcombine.low %v24_v59, %v24_v59 }
  0x6d   :  { %3293 = vmatpush3.bf16.msra.mxu1 %v3605_v61  ;;  %3272 = vmatprep.subr.bf16.mxu0 %v3606_v62  ;;  %v2865_v61 = vcombine.high %v24_v59, %v24_v59  ;;  %v3666_v62 = vld [vmem:[%s4616_s1 + $0x540] sm:$0xff]   ;;  %v3725_v59 = vld [vmem:[%s4616_s1 + $0x6a8] sm:$0xff]  }
  0x6e   :  { %3294 = vmatprep.subr.bf16.mxu1 %v3607_v63  ;;  %v3667_v63 = vld [vmem:[%s4616_s1 + $0x5c0] sm:$0xff]  }
  0x70   :  { %3273 = vmatpush3.bf16.msra.mxu0 %v3608_v0  ;;  %v3668_v0 = vld [vmem:[%s4616_s1 + $0x500] sm:$0xff]  }
  0x71   :  { %3295 = vmatpush3.bf16.msra.mxu1 %v3609_v1  ;;  %3274 = vmatprep.subr.bf16.mxu0 %v3610_v2  ;;  %v3669_v1 = vld [vmem:[%s4616_s1 + $0x580] sm:$0xff]   ;;  %v3670_v2 = vld [vmem:[%s4616_s1 + $0x548] sm:$0xff]  }
  0x72   :  { %3296 = vmatprep.subr.bf16.mxu1 %v3611_v3  ;;  %v3671_v3 = vld [vmem:[%s4616_s1 + $0x5c8] sm:$0xff]  }
  0x74   :  { %3275 = vmatpush3.bf16.msra.mxu0 %v3612_v4  ;;  %v3672_v4 = vld [vmem:[%s4616_s1 + $0x508] sm:$0xff]  }
  0x75   :  { %3297 = vmatpush3.bf16.msra.mxu1 %v3613_v5  ;;  %3276 = vmatprep.subr.bf16.mxu0 %v3614_v6  ;;  %v3673_v5 = vld [vmem:[%s4616_s1 + $0x588] sm:$0xff]   ;;  %v3674_v6 = vld [vmem:[%s4616_s1 + $0x550] sm:$0xff]  }
  0x76   :  { %3298 = vmatprep.subr.bf16.mxu1 %v3615_v7  ;;  %v3675_v7 = vld [vmem:[%s4616_s1 + $0x5d0] sm:$0xff]  }
  0x78   :  { %3277 = vmatpush3.bf16.msra.mxu0 %v3616_v8  ;;  %v3676_v8 = vld [vmem:[%s4616_s1 + $0x510] sm:$0xff]  }
  0x79   :  { %3299 = vmatpush3.bf16.msra.mxu1 %v3617_v9  ;;  %3278 = vmatprep.subr.bf16.mxu0 %v3618_v10  ;;  %v3677_v9 = vld [vmem:[%s4616_s1 + $0x590] sm:$0xff]   ;;  %v3678_v10 = vld [vmem:[%s4616_s1 + $0x558] sm:$0xff]  }
  0x7a   :  { %3300 = vmatprep.subr.bf16.mxu1 %v3619_v11  ;;  %v3679_v11 = vld [vmem:[%s4616_s1 + $0x5d8] sm:$0xff]  }
  0x7c   :  { %3279 = vmatpush3.bf16.msra.mxu0 %v3620_v12  ;;  %v3680_v12 = vld [vmem:[%s4616_s1 + $0x518] sm:$0xff]  }
  0x7d   :  { %3301 = vmatpush3.bf16.msra.mxu1 %v3621_v13  ;;  %3280 = vmatprep.subr.bf16.mxu0 %v3622_v14  ;;  %v3681_v13 = vld [vmem:[%s4616_s1 + $0x598] sm:$0xff]   ;;  %v3682_v14 = vld [vmem:[%s4616_s1 + $0x560] sm:$0xff]  }
  0x7e   :  { %3302 = vmatprep.subr.bf16.mxu1 %v3623_v15  ;;  %v3683_v15 = vld [vmem:[%s4616_s1 + $0x5e0] sm:$0xff]  }
  0x80   :  { %3281 = vmatpush3.bf16.msra.mxu0 %v3624_v16  ;;  %v3684_v16 = vld [vmem:[%s4616_s1 + $0x520] sm:$0xff]  }
  0x81   :  { %3303 = vmatpush3.bf16.msra.mxu1 %v3625_v17  ;;  %3310 = vmatprep.subr.bf16.mxu0 %v3630_v23  ;;  %v3685_v17 = vld [vmem:[%s4616_s1 + $0x5a0] sm:$0xff]   ;;  %v3691_v23 = vld [vmem:[%s4616_s1 + $0x5f0] sm:$0xff]  }
  0x82   :  { %3332 = vmatprep.subr.bf16.mxu1 %v3631_v25  ;;  %v3693_v25 = vld [vmem:[%s4616_s1 + $0x5b0] sm:$0xff]  }
  0x83   :  { %2471 = vmatmul.mubr.bf16.vlgmr.msra.gmra.mrb[12].mxu0 %v2858_v20  ;;  %v3688_v20 = vld [vmem:[%s4616_s1 + $0x528] sm:$0xff]  }
  0x84   :  { %2511 = vmatmul.mubr.bf16.vlgmr.msra.gmra.mrb[12].mxu1 %v2860_v22  ;;  %3311 = vmatpush3.bf16.msra.mxu0 %v3632_v26  ;;  %v3690_v22 = vld [vmem:[%s4616_s1 + $0x570] sm:$0xff]   ;;  %v3694_v26 = vld [vmem:[%s4616_s1 + $0x578] sm:$0xff]  }
  0x85   :  { %3333 = vmatpush3.bf16.msra.mxu1 %v3633_v27  ;;  %3312 = vmatprep.subr.bf16.mxu0 %v3634_v28  ;;  %v3695_v27 = vld [vmem:[%s4616_s1 + $0x5f8] sm:$0xff]  }
  0x86   :  { %3334 = vmatprep.subr.bf16.mxu1 %v3635_v29  ;;  %2550 = vmatprep.mubr.bf16.mxu0 %v2863_v58  ;;  %v3696_v28 = vld [vmem:[%s4616_s1 + $0x538] sm:$0xff]   ;;  %v3724_v58 = vld [vmem:[%s4616_s1 + $0x628] sm:$0xff]  }
  0x87   :  { %2590 = vmatprep.mubr.bf16.mxu1 %v2865_v61  ;;  %v3697_v29 = vld [vmem:[%s4616_s1 + $0x5b8] sm:$0xff]   ;;  %v3727_v61 = vld [vmem:[%s4616_s1 + $0x6f0] sm:$0xff]  }
  0x88   :  { %3313 = vmatpush3.bf16.msra.mxu0 %v3636_v30  ;;  %v25_v30 = vld [vmem:[%s4617_s0 + $0x50] sm:$0xff] }
  0x89   :  { %3335 = vmatpush3.bf16.msra.mxu1 %v3637_v31  ;;  %3314 = vmatprep.subr.bf16.mxu0 %v3638_v32  ;;  %v26_v31 = vld [vmem:[%s4617_s0 + $0x58] sm:$0xff]  ;;  %v2866_v32 = vcombine.low %v25_v30, %v25_v30 }
  0x8a   :  { %3336 = vmatprep.subr.bf16.mxu1 %v3639_v33  ;;  %v2867_v33 = vcombine.high %v25_v30, %v25_v30  ;;  %v3757_v30 = vld [vmem:[%s4616_s1 + $0x7a0] sm:$0xff]  }
  0x8c   :  { %3315 = vmatpush3.bf16.msra.mxu0 %v3640_v34  ;;  %v2868_v34 = vcombine.low %v26_v31, %v26_v31 }
  0x8d   :  { %3337 = vmatpush3.bf16.msra.mxu1 %v3641_v35  ;;  %3316 = vmatprep.subr.bf16.mxu0 %v3642_v36  ;;  %v2869_v35 = vcombine.high %v26_v31, %v26_v31  ;;  %v3702_v36 = vld [vmem:[%s4616_s1 + $0x640] sm:$0xff]  }
  0x8e   :  { %3338 = vmatprep.subr.bf16.mxu1 %v3643_v37  ;;  %v3703_v37 = vld [vmem:[%s4616_s1 + $0x6c0] sm:$0xff]  }
  0x90   :  { %3317 = vmatpush3.bf16.msra.mxu0 %v3644_v38  ;;  %v3704_v38 = vld [vmem:[%s4616_s1 + $0x600] sm:$0xff]  }
  0x91   :  { %3339 = vmatpush3.bf16.msra.mxu1 %v3645_v39  ;;  %3318 = vmatprep.subr.bf16.mxu0 %v3646_v40  ;;  %v3705_v39 = vld [vmem:[%s4616_s1 + $0x680] sm:$0xff]   ;;  %v3706_v40 = vld [vmem:[%s4616_s1 + $0x648] sm:$0xff]  }
  0x92   :  { %3340 = vmatprep.subr.bf16.mxu1 %v3647_v41  ;;  %v3707_v41 = vld [vmem:[%s4616_s1 + $0x6c8] sm:$0xff]  }
  0x94   :  { %3319 = vmatpush3.bf16.msra.mxu0 %v3648_v42  ;;  %v3708_v42 = vld [vmem:[%s4616_s1 + $0x608] sm:$0xff]  }
  0x95   :  { %3341 = vmatpush3.bf16.msra.mxu1 %v3649_v43  ;;  %3320 = vmatprep.subr.bf16.mxu0 %v3650_v44  ;;  %v3709_v43 = vld [vmem:[%s4616_s1 + $0x688] sm:$0xff]   ;;  %v3710_v44 = vld [vmem:[%s4616_s1 + $0x650] sm:$0xff]  }
  0x96   :  { %3342 = vmatprep.subr.bf16.mxu1 %v3651_v45  ;;  %v3711_v45 = vld [vmem:[%s4616_s1 + $0x6d0] sm:$0xff]  }
  0x98   :  { %3321 = vmatpush3.bf16.msra.mxu0 %v3652_v46  ;;  %v3712_v46 = vld [vmem:[%s4616_s1 + $0x610] sm:$0xff]  }
  0x99   :  { %3343 = vmatpush3.bf16.msra.mxu1 %v3653_v47  ;;  %3322 = vmatprep.subr.bf16.mxu0 %v3654_v48  ;;  %v3713_v47 = vld [vmem:[%s4616_s1 + $0x690] sm:$0xff]   ;;  %v3714_v48 = vld [vmem:[%s4616_s1 + $0x658] sm:$0xff]  }
  0x9a   :  { %3344 = vmatprep.subr.bf16.mxu1 %v3655_v49  ;;  %v3715_v49 = vld [vmem:[%s4616_s1 + $0x6d8] sm:$0xff]  }
  0x9c   :  { %3323 = vmatpush3.bf16.msra.mxu0 %v3656_v50  ;;  %v3716_v50 = vld [vmem:[%s4616_s1 + $0x618] sm:$0xff]  }
  0x9d   :  { %3345 = vmatpush3.bf16.msra.mxu1 %v3657_v51  ;;  %3324 = vmatprep.subr.bf16.mxu0 %v3658_v52  ;;  %v3717_v51 = vld [vmem:[%s4616_s1 + $0x698] sm:$0xff]   ;;  %v3718_v52 = vld [vmem:[%s4616_s1 + $0x660] sm:$0xff]  }
  0x9e   :  { %3346 = vmatprep.subr.bf16.mxu1 %v3659_v53  ;;  %v3719_v53 = vld [vmem:[%s4616_s1 + $0x6e0] sm:$0xff]  }
  0xa0   :  { %3325 = vmatpush3.bf16.msra.mxu0 %v3660_v54  ;;  %v3720_v54 = vld [vmem:[%s4616_s1 + $0x620] sm:$0xff]  }
  0xa1   :  { %3347 = vmatpush3.bf16.msra.mxu1 %v3661_v55  ;;  %3354 = vmatprep.subr.bf16.mxu0 %v3666_v62  ;;  %v3721_v55 = vld [vmem:[%s4616_s1 + $0x6a0] sm:$0xff]   ;;  %v3728_v62 = vld [vmem:[%s4616_s1 + $0x630] sm:$0xff]  }
  0xa2   :  { %3376 = vmatprep.subr.bf16.mxu1 %v3667_v63  ;;  %v3729_v63 = vld [vmem:[%s4616_s1 + $0x6b0] sm:$0xff]  }
  0xa3   :  { %2551 = vmatmul.mubr.bf16.vlgmr.msra.gmra.mrb[16].mxu0 %v2862_v57  ;;  %v3723_v57 = vld [vmem:[%s4616_s1 + $0x6e8] sm:$0xff]  }
  0xa4   :  { %2591 = vmatmul.mubr.bf16.vlgmr.msra.gmra.mrb[16].mxu1 %v2864_v60  ;;  %3355 = vmatpush3.bf16.msra.mxu0 %v3668_v0  ;;  %v3726_v60 = vld [vmem:[%s4616_s1 + $0x670] sm:$0xff]   ;;  %v3730_v0 = vld [vmem:[%s4616_s1 + $0x678] sm:$0xff]  }
  0xa5   :  { %3377 = vmatpush3.bf16.msra.mxu1 %v3669_v1  ;;  %3356 = vmatprep.subr.bf16.mxu0 %v3670_v2  ;;  %v3731_v1 = vld [vmem:[%s4616_s1 + $0x6f8] sm:$0xff]  }
  0xa6   :  { %3378 = vmatprep.subr.bf16.mxu1 %v3671_v3  ;;  %2630 = vmatprep.mubr.bf16.mxu0 %v2867_v33  ;;  %v3732_v2 = vld [vmem:[%s4616_s1 + $0x638] sm:$0xff]  }
  0xa7   :  { %2670 = vmatprep.mubr.bf16.mxu1 %v2869_v35  ;;  %v3733_v3 = vld [vmem:[%s4616_s1 + $0x6b8] sm:$0xff]  }
  0xa8   :  { %3357 = vmatpush3.bf16.msra.mxu0 %v3672_v4  ;;  %v27_v4 = vld [vmem:[%s4617_s0 + $0x60] sm:$0xff] }
  0xa9   :  { %3379 = vmatpush3.bf16.msra.mxu1 %v3673_v5  ;;  %3358 = vmatprep.subr.bf16.mxu0 %v3674_v6  ;;  %v28_v5 = vld [vmem:[%s4617_s0 + $0x68] sm:$0xff]  ;;  %v2870_v6 = vcombine.low %v27_v4, %v27_v4 }
  0xaa   :  { %3380 = vmatprep.subr.bf16.mxu1 %v3675_v7  ;;  %v2871_v7 = vcombine.high %v27_v4, %v27_v4 }
  0xac   :  { %3359 = vmatpush3.bf16.msra.mxu0 %v3676_v8  ;;  %v2872_v8 = vcombine.low %v28_v5, %v28_v5 }
  0xad   :  { %3381 = vmatpush3.bf16.msra.mxu1 %v3677_v9  ;;  %3360 = vmatprep.subr.bf16.mxu0 %v3678_v10  ;;  %v3738_v9 = vld [vmem:[%s4616_s1 + $0x740] sm:$0xff]   ;;  %v2873_v10 = vcombine.high %v28_v5, %v28_v5 }
  0xae   :  { %3382 = vmatprep.subr.bf16.mxu1 %v3679_v11  ;;  %v3739_v11 = vld [vmem:[%s4616_s1 + $0x7c0] sm:$0xff]  }
  0xb0   :  { %3361 = vmatpush3.bf16.msra.mxu0 %v3680_v12  ;;  %v3740_v12 = vld [vmem:[%s4616_s1 + $0x700] sm:$0xff]  }
  0xb1   :  { %3383 = vmatpush3.bf16.msra.mxu1 %v3681_v13  ;;  %3362 = vmatprep.subr.bf16.mxu0 %v3682_v14  ;;  %v3741_v13 = vld [vmem:[%s4616_s1 + $0x780] sm:$0xff]   ;;  %v3742_v14 = vld [vmem:[%s4616_s1 + $0x748] sm:$0xff]  }
  0xb2   :  { %3384 = vmatprep.subr.bf16.mxu1 %v3683_v15  ;;  %v3743_v15 = vld [vmem:[%s4616_s1 + $0x7c8] sm:$0xff]  }
  0xb4   :  { %3363 = vmatpush3.bf16.msra.mxu0 %v3684_v16  ;;  %v3744_v16 = vld [vmem:[%s4616_s1 + $0x708] sm:$0xff]  }
  0xb5   :  { %3385 = vmatpush3.bf16.msra.mxu1 %v3685_v17  ;;  %3364 = vmatprep.subr.bf16.mxu0 %v3686_v18  ;;  %v3745_v17 = vld [vmem:[%s4616_s1 + $0x788] sm:$0xff]   ;;  %v3746_v18 = vld [vmem:[%s4616_s1 + $0x750] sm:$0xff]  }
  0xb6   :  { %3386 = vmatprep.subr.bf16.mxu1 %v3687_v19  ;;  %v3747_v19 = vld [vmem:[%s4616_s1 + $0x7d0] sm:$0xff]  }
  0xb8   :  { %3365 = vmatpush3.bf16.msra.mxu0 %v3688_v20  ;;  %v3748_v20 = vld [vmem:[%s4616_s1 + $0x710] sm:$0xff]  }
  0xb9   :  { %3387 = vmatpush3.bf16.msra.mxu1 %v3689_v21  ;;  %3366 = vmatprep.subr.bf16.mxu0 %v3690_v22  ;;  %v3749_v21 = vld [vmem:[%s4616_s1 + $0x790] sm:$0xff]   ;;  %v3750_v22 = vld [vmem:[%s4616_s1 + $0x758] sm:$0xff]  }
  0xba   :  { %3388 = vmatprep.subr.bf16.mxu1 %v3691_v23  ;;  %v3751_v23 = vld [vmem:[%s4616_s1 + $0x7d8] sm:$0xff]  }
  0xbc   :  { %3367 = vmatpush3.bf16.msra.mxu0 %v3692_v24  ;;  %v3752_v24 = vld [vmem:[%s4616_s1 + $0x718] sm:$0xff]  }
  0xbd   :  { %3389 = vmatpush3.bf16.msra.mxu1 %v3693_v25  ;;  %3368 = vmatprep.subr.bf16.mxu0 %v3694_v26  ;;  %v3753_v25 = vld [vmem:[%s4616_s1 + $0x798] sm:$0xff]   ;;  %v3754_v26 = vld [vmem:[%s4616_s1 + $0x760] sm:$0xff]  }
  0xbe   :  { %3390 = vmatprep.subr.bf16.mxu1 %v3695_v27  ;;  %v3755_v27 = vld [vmem:[%s4616_s1 + $0x7e0] sm:$0xff]  }
  0xc0   :  { %3369 = vmatpush3.bf16.msra.mxu0 %v3696_v28  ;;  %v3756_v28 = vld [vmem:[%s4616_s1 + $0x720] sm:$0xff]  }
  0xc1   :  { %3391 = vmatpush3.bf16.msra.mxu1 %v3697_v29  ;;  %3398 = vmatprep.subr.bf16.mxu0 %v3702_v36 }
  0xc2   :  { %3420 = vmatprep.subr.bf16.mxu1 %v3703_v37  ;;  %v3758_v37 = vld [vmem:[%s4616_s1 + $0x768] sm:$0xff]  }
  0xc3   :  { %2631 = vmatmul.mubr.bf16.vlgmr.msra.gmra.mrb[20].mxu0 %v2866_v32  ;;  %v2845_v32 = vld [vmem:[%s4618_s2] ss:$0 sm:$0xff] }
  0xc4   :  { %2671 = vmatmul.mubr.bf16.vlgmr.msra.gmra.mrb[20].mxu1 %v2868_v34  ;;  %3399 = vmatpush3.bf16.msra.mxu0 %v3704_v38 }
  0xc5   :  { %3421 = vmatpush3.bf16.msra.mxu1 %v3705_v39  ;;  %3400 = vmatprep.subr.bf16.mxu0 %v3706_v40  ;;  %v3759_v39 = vld [vmem:[%s4616_s1 + $0x7e8] sm:$0xff]  }
  0xc6   :  { %3422 = vmatprep.subr.bf16.mxu1 %v3707_v41  ;;  %2710 = vmatprep.mubr.bf16.mxu0 %v2871_v7 }
  0xc7   :  { %2750 = vmatprep.mubr.bf16.mxu1 %v2873_v10 }
  0xc8   :  { %3401 = vmatpush3.bf16.msra.mxu0 %v3708_v42  ;;  %v3760_v42 = vld [vmem:[%s4616_s1 + $0x728] sm:$0xff]  }
  0xc9   :  { %3423 = vmatpush3.bf16.msra.mxu1 %v3709_v43  ;;  %3402 = vmatprep.subr.bf16.mxu0 %v3710_v44  ;;  %v3761_v44 = vld [vmem:[%s4616_s1 + $0x7a8] sm:$0xff]  }
  0xca   :  { %3424 = vmatprep.subr.bf16.mxu1 %v3711_v45 }
  0xcc   :  { %3403 = vmatpush3.bf16.msra.mxu0 %v3712_v46 }
  0xcd   :  { %3425 = vmatpush3.bf16.msra.mxu1 %v3713_v47  ;;  %3404 = vmatprep.subr.bf16.mxu0 %v3714_v48  ;;  %v3762_v47 = vld [vmem:[%s4616_s1 + $0x770] sm:$0xff]  }
  0xce   :  { %3426 = vmatprep.subr.bf16.mxu1 %v3715_v49  ;;  %v3763_v48 = vld [vmem:[%s4616_s1 + $0x7f0] sm:$0xff]  }
  0xcf   :  { %v3764_v49 = vld [vmem:[%s4616_s1 + $0x730] sm:$0xff]  }
  0xd0   :  { %3405 = vmatpush3.bf16.msra.mxu0 %v3716_v50  ;;  %v3765_v50 = vld [vmem:[%s4616_s1 + $0x7b0] sm:$0xff]  }
  0xd1   :  { %3427 = vmatpush3.bf16.msra.mxu1 %v3717_v51  ;;  %3406 = vmatprep.subr.bf16.mxu0 %v3718_v52  ;;  %v3766_v51 = vld [vmem:[%s4616_s1 + $0x778] sm:$0xff]  }
  0xd2   :  { %3428 = vmatprep.subr.bf16.mxu1 %v3719_v53  ;;  %v3767_v52 = vld [vmem:[%s4616_s1 + $0x7f8] sm:$0xff]  }
  0xd3   :  { %v3768_v53 = vld [vmem:[%s4616_s1 + $0x738] sm:$0xff]  }
  0xd4   :  { %3407 = vmatpush3.bf16.msra.mxu0 %v3720_v54  ;;  %v3769_v54 = vld [vmem:[%s4616_s1 + $0x7b8] sm:$0xff]  }
  0xd5   :  { %3429 = vmatpush3.bf16.msra.mxu1 %v3721_v55  ;;  %3408 = vmatprep.subr.bf16.mxu0 %v3722_v56  ;;  %v29_v55 = vld [vmem:[%s4617_s0 + $0x70] sm:$0xff]  ;;  %v30_v56 = vld [vmem:[%s4617_s0 + $0x78] sm:$0xff] }
  0xd6   :  { %3430 = vmatprep.subr.bf16.mxu1 %v3723_v57  ;;  %v2874_v57 = vcombine.low %v29_v55, %v29_v55 }
  0xd8   :  { %3409 = vmatpush3.bf16.msra.mxu0 %v3724_v58  ;;  %v2875_v58 = vcombine.high %v29_v55, %v29_v55 }
  0xd9   :  { %3431 = vmatpush3.bf16.msra.mxu1 %v3725_v59  ;;  %3410 = vmatprep.subr.bf16.mxu0 %v3726_v60  ;;  %v2876_v59 = vcombine.low %v30_v56, %v30_v56  ;;  %v2877_v60 = vcombine.high %v30_v56, %v30_v56 }
  0xda   :  { %3432 = vmatprep.subr.bf16.mxu1 %v3727_v61 }
  0xdc   :  { %3411 = vmatpush3.bf16.msra.mxu0 %v3728_v62 }
  0xdd   :  { %3433 = vmatpush3.bf16.msra.mxu1 %v3729_v63  ;;  %3412 = vmatprep.subr.bf16.mxu0 %v3730_v0 }
  0xde   :  { %3434 = vmatprep.subr.bf16.mxu1 %v3731_v1 }
  0xe0   :  { %3413 = vmatpush3.bf16.msra.mxu0 %v3732_v2 }
  0xe1   :  { %3435 = vmatpush3.bf16.msra.mxu1 %v3733_v3  ;;  %3442 = vmatprep.subr.bf16.mxu0 %v3738_v9 }
  0xe2   :  { %3464 = vmatprep.subr.bf16.mxu1 %v3739_v11 }
  0xe3   :  { %2711 = vmatmul.mubr.bf16.vlgmr.msra.gmra.mrb[24].mxu0 %v2870_v6 }
  0xe4   :  { %2751 = vmatmul.mubr.bf16.vlgmr.msra.gmra.mrb[24].mxu1 %v2872_v8  ;;  %3443 = vmatpush3.bf16.msra.mxu0 %v3740_v12 }
  0xe5   :  { %3465 = vmatpush3.bf16.msra.mxu1 %v3741_v13  ;;  %3444 = vmatprep.subr.bf16.mxu0 %v3742_v14 }
  0xe6   :  { %3466 = vmatprep.subr.bf16.mxu1 %v3743_v15  ;;  %2790 = vmatprep.mubr.bf16.mxu0 %v2875_v58 }
  0xe7   :  { %2830 = vmatprep.mubr.bf16.mxu1 %v2877_v60 }
  0xe8   :  { %3445 = vmatpush3.bf16.msra.mxu0 %v3744_v16 }
  0xe9   :  { %3467 = vmatpush3.bf16.msra.mxu1 %v3745_v17  ;;  %3446 = vmatprep.subr.bf16.mxu0 %v3746_v18 }
  0xea   :  { %3468 = vmatprep.subr.bf16.mxu1 %v3747_v19 }
  0xec   :  { %3447 = vmatpush3.bf16.msra.mxu0 %v3748_v20 }
  0xed   :  { %3469 = vmatpush3.bf16.msra.mxu1 %v3749_v21  ;;  %3448 = vmatprep.subr.bf16.mxu0 %v3750_v22 }
  0xee   :  { %3470 = vmatprep.subr.bf16.mxu1 %v3751_v23 }
  0xf0   :  { %3449 = vmatpush3.bf16.msra.mxu0 %v3752_v24 }
  0xf1   :  { %3471 = vmatpush3.bf16.msra.mxu1 %v3753_v25  ;;  %3450 = vmatprep.subr.bf16.mxu0 %v3754_v26 }
  0xf2   :  { %3472 = vmatprep.subr.bf16.mxu1 %v3755_v27 }
  0xf4   :  { %3451 = vmatpush3.bf16.msra.mxu0 %v3756_v28 }
  0xf5   :  { %3473 = vmatpush3.bf16.msra.mxu1 %v3757_v30  ;;  %3452 = vmatprep.subr.bf16.mxu0 %v3758_v37 }
  0xf6   :  { %v3150_v29 = vpop.f32.mrb[0].mxu0  ;;  %3474 = vmatprep.subr.bf16.mxu1 %v3759_v39 }
  0xf7   :  { %v3172_v31 = vpop.f32.mrb[0].mxu1  ;;  %v3151_v33 = vpop.f32.mrb[1].mxu0 }
  0xf8   :  { %v3173_v34 = vpop.f32.mrb[1].mxu1  ;;  %v3152_v35 = vadd.f32 %v3151_v33, %v3150_v29  ;;  %v3153_v38 = vpop.f32.mrb[2].mxu0  ;;  %3453 = vmatpush3.bf16.msra.mxu0 %v3760_v42 }
  0xf9   :  { %v3174_v36 = vadd.f32 %v3173_v34, %v3172_v31  ;;  %v3175_v40 = vpop.f32.mrb[2].mxu1  ;;  %v3154_v43 = vpop.f32.mrb[3].mxu0  ;;  %3475 = vmatpush3.bf16.msra.mxu1 %v3761_v44  ;;  %3454 = vmatprep.subr.bf16.mxu0 %v3762_v47 }
  0xfa   :  { %v2233_v41 = vadd.f32 %v3152_v35, %v2845_v32  ;;  %v3176_v45 = vpop.f32.mrb[3].mxu1  ;;  %3476 = vmatprep.subr.bf16.mxu1 %v3763_v48 }
  0xfc   :  { %v2273_v46 = vadd.f32 %v3174_v36, %v2233_v41  ;;  %3455 = vmatpush3.bf16.msra.mxu0 %v3764_v49 }
  0xfd   :  { %3477 = vmatpush3.bf16.msra.mxu1 %v3765_v50  ;;  %3456 = vmatprep.subr.bf16.mxu0 %v3766_v51 }
  0xfe   :  { %3478 = vmatprep.subr.bf16.mxu1 %v3767_v52 }
 0x100   :  { %3457 = vmatpush3.bf16.msra.mxu0 %v3768_v53 }
 0x101   :  { %3479 = vmatpush3.bf16.msra.mxu1 %v3769_v54 }
 0x103   :  { %2791 = vmatmul.mubr.bf16.vlgmr.msra.gmra.mrb[28].mxu0 %v2874_v57 }
 0x104   :  { %2831 = vmatmul.mubr.bf16.vlgmr.msra.gmra.mrb[28].mxu1 %v2876_v59 }
 0x116   :  { %v3194_v61 = vpop.f32.mrb[4].mxu0 }
 0x117   :  { %v3216_v62 = vpop.f32.mrb[4].mxu1  ;;  %v3195_v63 = vpop.f32.mrb[5].mxu0 }
 0x118   :  { %v3217_v0 = vpop.f32.mrb[5].mxu1  ;;  %v3196_v1 = vadd.f32 %v3195_v63, %v3194_v61  ;;  %v3197_v3 = vpop.f32.mrb[6].mxu0 }
 0x119   :  { %v3218_v2 = vadd.f32 %v3217_v0, %v3216_v62  ;;  %v3219_v4 = vpop.f32.mrb[6].mxu1  ;;  %v3198_v5 = vpop.f32.mrb[7].mxu0 }
 0x11a   :  { %v3220_v6 = vpop.f32.mrb[7].mxu1  ;;  %v2313_v7 = vadd.f32 %v3196_v1, %v2273_v46 }
 0x11c   :  { %v2353_v8 = vadd.f32 %v3218_v2, %v2313_v7 }
 0x136   :  { %v3238_v9 = vpop.f32.mrb[8].mxu0 }
 0x137   :  { %v3260_v10 = vpop.f32.mrb[8].mxu1  ;;  %v3239_v11 = vpop.f32.mrb[9].mxu0 }
 0x138   :  { %v3240_v12 = vadd.f32 %v3239_v11, %v3238_v9  ;;  %v3261_v13 = vpop.f32.mrb[9].mxu1  ;;  %v3241_v14 = vpop.f32.mrb[10].mxu0 }
 0x139   :  { %v3262_v15 = vadd.f32 %v3261_v13, %v3260_v10  ;;  %v3263_v16 = vpop.f32.mrb[10].mxu1  ;;  %v3242_v17 = vpop.f32.mrb[11].mxu0 }
 0x13a   :  { %v2393_v18 = vadd.f32 %v3240_v12, %v2353_v8  ;;  %v3264_v19 = vpop.f32.mrb[11].mxu1 }
 0x13c   :  { %v2433_v20 = vadd.f32 %v3262_v15, %v2393_v18 }
 0x156   :  { %v3282_v21 = vpop.f32.mrb[12].mxu0 }
 0x157   :  { %v3304_v22 = vpop.f32.mrb[12].mxu1  ;;  %v3283_v23 = vpop.f32.mrb[13].mxu0 }
 0x158   :  { %v3284_v24 = vadd.f32 %v3283_v23, %v3282_v21  ;;  %v3305_v25 = vpop.f32.mrb[13].mxu1  ;;  %v3285_v26 = vpop.f32.mrb[14].mxu0 }
 0x159   :  { %v3306_v27 = vadd.f32 %v3305_v25, %v3304_v22  ;;  %v3307_v28 = vpop.f32.mrb[14].mxu1  ;;  %v3286_v29 = vpop.f32.mrb[15].mxu0 }
 0x15a   :  { %v2473_v30 = vadd.f32 %v3284_v24, %v2433_v20  ;;  %v3308_v31 = vpop.f32.mrb[15].mxu1 }
 0x15c   :  { %v2513_v32 = vadd.f32 %v3306_v27, %v2473_v30 }
 0x176   :  { %v3326_v33 = vpop.f32.mrb[16].mxu0 }
 0x177   :  { %v3348_v34 = vpop.f32.mrb[16].mxu1  ;;  %v3327_v35 = vpop.f32.mrb[17].mxu0 }
 0x178   :  { %v3349_v36 = vpop.f32.mrb[17].mxu1  ;;  %v3328_v37 = vadd.f32 %v3327_v35, %v3326_v33  ;;  %v3329_v39 = vpop.f32.mrb[18].mxu0 }
 0x179   :  { %v3350_v38 = vadd.f32 %v3349_v36, %v3348_v34  ;;  %v3351_v40 = vpop.f32.mrb[18].mxu1  ;;  %v3330_v41 = vpop.f32.mrb[19].mxu0 }
 0x17a   :  { %v3352_v42 = vpop.f32.mrb[19].mxu1  ;;  %v2553_v43 = vadd.f32 %v3328_v37, %v2513_v32 }
 0x17c   :  { %v2593_v44 = vadd.f32 %v3350_v38, %v2553_v43 }
 0x196   :  { %v3370_v45 = vpop.f32.mrb[20].mxu0 }
 0x197   :  { %v3392_v46 = vpop.f32.mrb[20].mxu1  ;;  %v3371_v47 = vpop.f32.mrb[21].mxu0 }
 0x198   :  { %v3372_v48 = vadd.f32 %v3371_v47, %v3370_v45  ;;  %v3393_v49 = vpop.f32.mrb[21].mxu1  ;;  %v3373_v50 = vpop.f32.mrb[22].mxu0 }
 0x199   :  { %v3394_v51 = vadd.f32 %v3393_v49, %v3392_v46  ;;  %v3395_v52 = vpop.f32.mrb[22].mxu1  ;;  %v3374_v53 = vpop.f32.mrb[23].mxu0 }
 0x19a   :  { %v2633_v54 = vadd.f32 %v3372_v48, %v2593_v44  ;;  %v3396_v55 = vpop.f32.mrb[23].mxu1 }
 0x19c   :  { %v2673_v56 = vadd.f32 %v3394_v51, %v2633_v54 }
 0x1b6   :  { %v3414_v57 = vpop.f32.mrb[24].mxu0 }
 0x1b7   :  { %v3436_v58 = vpop.f32.mrb[24].mxu1  ;;  %v3415_v59 = vpop.f32.mrb[25].mxu0 }
 0x1b8   :  { %v3416_v60 = vadd.f32 %v3415_v59, %v3414_v57  ;;  %v3437_v61 = vpop.f32.mrb[25].mxu1  ;;  %v3417_v62 = vpop.f32.mrb[26].mxu0 }
 0x1b9   :  { %v3438_v63 = vadd.f32 %v3437_v61, %v3436_v58  ;;  %v3439_v0 = vpop.f32.mrb[26].mxu1  ;;  %v3418_v1 = vpop.f32.mrb[27].mxu0 }
 0x1ba   :  { %v2713_v2 = vadd.f32 %v3416_v60, %v2673_v56  ;;  %v3440_v3 = vpop.f32.mrb[27].mxu1 }
 0x1bc   :  { %v2753_v4 = vadd.f32 %v3438_v63, %v2713_v2 }
 0x1d6   :  { %v3458_v5 = vpop.f32.mrb[28].mxu0 }
 0x1d7   :  { %v3480_v6 = vpop.f32.mrb[28].mxu1  ;;  %v3459_v7 = vpop.f32.mrb[29].mxu0 }
 0x1d8   :  { %v3460_v8 = vadd.f32 %v3459_v7, %v3458_v5  ;;  %v3481_v9 = vpop.f32.mrb[29].mxu1  ;;  %v3461_v10 = vpop.f32.mrb[30].mxu0 }
 0x1d9   :  { %v3482_v11 = vadd.f32 %v3481_v9, %v3480_v6  ;;  %v3483_v12 = vpop.f32.mrb[30].mxu1  ;;  %v3462_v13 = vpop.f32.mrb[31].mxu0 }
 0x1da   :  { %v2793_v14 = vadd.f32 %v3460_v8, %v2753_v4  ;;  %v3484_v15 = vpop.f32.mrb[31].mxu1 }
 0x1dc   :  { %v2833_v16 = vadd.f32 %v3482_v11, %v2793_v14 }
 0x1de   :  { %v2838_v17 = vmax.f32 %v2833_v16, 0.0 }
 0x1e0   :  { %v2839_v18 = vpack.c.bf16 %v2838_v17, %v2838_v17 }
 0x1e2   :  { %2840 = vst [vmem:[%s4619_s3] sm:$0xf] %v2839_v18 }

</bundles_post_ra>
